<compile_context>
chip_gen: v5e
topology: v5e:2x2
jax: 0.10.0
libtpu: 0.0.40
codegen_flags: <defaults>
</compile_context>

<pallas_src>
import functools

import jax
import jax.numpy as jnp
from jax.experimental import pallas as pl
from jax.experimental.pallas import tpu as pltpu

H = 1024
HALF_H = H // 2
TILE_N = 512   # flattened (batch*seq) row tile


# ----------------------------------------------------------------------------
# Fused kernel: both towers + norm scatter + head
# ----------------------------------------------------------------------------
def _fused_kernel(x_ref, y_ref,
                  w11_ref, b11_ref, w12_ref, b12_ref, w13_ref, b13_ref,
                  w21_ref, b21_ref, w22_ref, b22_ref, w23_ref, b23_ref,
                  sel_ref, rep_ref, w3a_ref, w3b_ref, b3_ref, w4_ref, b4_ref,
                  out_ref,
                  acc1_ref, acc2_ref,
                  *, n_rows, tile_n):
    i = pl.program_id(0)
    last = pl.num_programs(0) - 1

    @pl.when(i == 0)
    def _init():
        acc1_ref[...] = jnp.zeros_like(acc1_ref)
        acc2_ref[...] = jnp.zeros_like(acc2_ref)

    def tower(v, w1, b1, w2, b2, w3, b3):
        h = jnp.dot(v, w1[...], preferred_element_type=jnp.float32) + b1[...]
        h = jnp.maximum(h, 0.0).astype(jnp.bfloat16)            # .clamp(min=0)
        h = jnp.dot(h, w2[...], preferred_element_type=jnp.float32) + b2[...]
        h = jnp.maximum(h, 0.0).astype(jnp.bfloat16)            # .clamp(min=0)
        h = jnp.dot(h, w3[...], preferred_element_type=jnp.float32) + b3[...]
        # torch.bmm(h.view(N,1,r), h.view(N,r,1)) == row-wise squared L2 norm.
        return jnp.sum(h * h, axis=-1).reshape(1, -1)           # (1, tile_n) f32

    norms1 = tower(x_ref[...].astype(jnp.bfloat16),
                   w11_ref, b11_ref, w12_ref, b12_ref, w13_ref, b13_ref)
    norms2 = tower(y_ref[...].astype(jnp.bfloat16),
                   w21_ref, b21_ref, w22_ref, b22_ref, w23_ref, b23_ref)

    if n_rows % tile_n != 0:
        # Partial last tile: rows >= n_rows carry garbage (possibly NaN/Inf) from
        # the out-of-bounds edge block; zero their norms so they cannot leak into
        # the head accumulators.
        col = jax.lax.broadcasted_iota(jnp.int32, (1, tile_n), 1) + i * tile_n
        valid = col < n_rows
        norms1 = jnp.where(valid, norms1, 0.0)
        norms2 = jnp.where(valid, norms2, 0.0)

    # Scatter the flat per-row norms into their (batch, seq) slots with two tiny 0/1
    # matmuls: sel (batch, tile) picks the batch row, rep (tile, seq) picks the seq
    # column.  Pure MXU work, exact in f32, no reshapes/transposes/dynamic slices.
    m1 = sel_ref[...] * norms1
    m2 = sel_ref[...] * norms2
    acc1_ref[...] += jnp.dot(m1, rep_ref[...], preferred_element_type=jnp.float32)
    acc2_ref[...] += jnp.dot(m2, rep_ref[...], preferred_element_type=jnp.float32)

    @pl.when(i == last)
    def _head():
        # h1 = relu(cat([norms1, norms2])) zero-padded to H columns.  Norms are >= 0
        # (relu is a no-op) and padded columns contribute exactly zero, so fc3
        # reduces to norms1 @ W3[:S] + norms2 @ W3[S:2S].  fc4 (H -> 1) is a VPU
        # multiply + lane reduction.
        h2 = (jnp.dot(acc1_ref[...], w3a_ref[...], preferred_element_type=jnp.float32)
              + jnp.dot(acc2_ref[...], w3b_ref[...], preferred_element_type=jnp.float32)
              + b3_ref[...])
        h2 = jnp.maximum(h2, 0.0)                               # .clamp(min=0)
        out_ref[...] = jnp.sum(h2 * w4_ref[...], axis=-1, keepdims=True) + b4_ref[...]


# ----------------------------------------------------------------------------
# pallas_call wrapper (forward pass, 3-D y branch of the reference module)
# ----------------------------------------------------------------------------
@jax.jit
def net_forward(params, x, y):
    if y.ndim != 3:
        # TODO(synk): the 2-D y branch of the reference (F.pad of y to dim2 and
        # norms2 = x2 passthrough) is not implemented; only the 3-D path is.
        raise NotImplementedError("only the 3-D y branch is implemented")

    bsz, seq, d1 = x.shape
    b2, s2, d2 = y.shape
    if b2 != bsz or s2 != seq:
        raise ValueError("reference .view() requires y to share x's (batch, seq)")
    if 2 * seq > H:
        raise ValueError(f"seqlen {seq} + {seq} exceeds head width H={H}")

    n = bsz * seq
    tile_n = n if n <= TILE_N else TILE_N
    num_tiles = pl.cdiv(n, tile_n)
    n_pad = num_tiles * tile_n

    # Pure metadata reshape (contiguous collapse) -- no HBM copy.
    x_flat = x.reshape(n, d1)
    y_flat = y.reshape(n, d2)

    # 0/1 row->(batch, seq) scatter matrices, built to the padded tile grid so their
    # per-tile blocks never go out of bounds; rows >= n are all-zero.
    r = jnp.arange(n_pad)
    in_range = r < n
    sel = (((r[None, :] // seq) == jnp.arange(bsz)[:, None]) & in_range[None, :]
           ).astype(jnp.float32)                               # (bsz, n_pad)
    rep = (((r[:, None] % seq) == jnp.arange(seq)[None, :]) & in_range[:, None]
           ).astype(jnp.float32)                               # (n_pad, seq)

    w11, b11 = params["fc1_1"]
    w12, b12 = params["fc1_2"]
    w13, b13 = params["fc1_3"]
    w21, b21 = params["fc2_1"]
    w22, b22 = params["fc2_2"]
    w23, b23 = params["fc2_3"]
    w3, b3 = params["fc3"]
    w4, b4 = params["fc4"]
    w3a = w3[:seq, :]           # fc3 restricted to its 2S live rows
    w3b = w3[seq:2 * seq, :]

    tower_w = (w11, b11, w12, b12, w13, b13, w21, b21, w22, b22, w23, b23)
    head_w = (w3a, w3b, b3, w4, b4)

    def row_spec(d):
        return pl.BlockSpec((tile_n, d), lambda i: (i, 0))

    def const_spec(a):          # same block every step -> DMA'd once, stays resident
        return pl.BlockSpec(a.shape, lambda i: (0, 0))

    # Advisory cost hint for XLA scheduling around the custom call.
    flops = int(2 * n * ((d1 + d2) * HALF_H + 4 * HALF_H * HALF_H)
                + 4 * n_pad * bsz * seq + 4 * bsz * seq * H + 4 * bsz * H)
    bytes_accessed = int(
        x_flat.size * x_flat.dtype.itemsize + y_flat.size * y_flat.dtype.itemsize
        + sum(int(w.size) * w.dtype.itemsize for w in tower_w + head_w)
        + sel.size * 4 + rep.size * 4 + bsz * 4)

    kernel = functools.partial(_fused_kernel, n_rows=n, tile_n=tile_n)

    return pl.pallas_call(
        kernel,
        grid=(num_tiles,),
        out_shape=jax.ShapeDtypeStruct((bsz, 1), jnp.float32),
        in_specs=([row_spec(d1), row_spec(d2)]
                  + [const_spec(w) for w in tower_w]
                  + [pl.BlockSpec((bsz, tile_n), lambda i: (0, i)),     # sel tile
                     pl.BlockSpec((tile_n, seq), lambda i: (i, 0))]     # rep tile
                  + [const_spec(w) for w in head_w]),
        out_specs=pl.BlockSpec((bsz, 1), lambda i: (0, 0)),
        scratch_shapes=[pltpu.VMEM((bsz, seq), jnp.float32),   # norms1 accumulator
                        pltpu.VMEM((bsz, seq), jnp.float32)],  # norms2 accumulator
        compiler_params=pltpu.CompilerParams(
            # The fused head reads cross-tile accumulators, so the row axis is a
            # sequential reduction.  (This forfeits v7x megacore sharding of the
            # towers, but removing the second pallas_call + the norms' HBM
            # round-trip dominates at the small batch*seq this net runs at.)
            dimension_semantics=("arbitrary",),
            vmem_limit_bytes=32 * 1024 * 1024),
        cost_estimate=pl.CostEstimate(flops=flops, transcendentals=0,
                                      bytes_accessed=bytes_accessed),
    )(x_flat, y_flat, *tower_w, sel, rep, *head_w)


# ----------------------------------------------------------------------------
# Parameter init (mimics nn.Linear's U(-1/sqrt(fan_in), +1/sqrt(fan_in)) init)
# ----------------------------------------------------------------------------
def init_linear(key, fan_in, fan_out, w_dtype=jnp.float32):
    kw, kb = jax.random.split(key)
    bound = 1.0 / float(fan_in) ** 0.5
    w = jax.random.uniform(kw, (fan_in, fan_out), jnp.float32, -bound, bound)
    b = jax.random.uniform(kb, (1, fan_out), jnp.float32, -bound, bound)
    return w.astype(w_dtype), b


def init_params(key, input1_size, input2_size):
    keys = jax.random.split(key, 8)
    p = {}
    # Tower weights in bf16 (full MXU rate, half the weight DMA); biases stay f32.
    # Intentional quantization vs. the f32 torch reference (documented).
    p["fc1_1"] = init_linear(keys[0], input1_size, HALF_H, jnp.bfloat16)
    p["fc1_2"] = init_linear(keys[1], HALF_H, HALF_H, jnp.bfloat16)
    p["fc1_3"] = init_linear(keys[2], HALF_H, HALF_H, jnp.bfloat16)
    p["fc2_1"] = init_linear(keys[3], input2_size, HALF_H, jnp.bfloat16)
    p["fc2_2"] = init_linear(keys[4], HALF_H, HALF_H, jnp.bfloat16)
    p["fc2_3"] = init_linear(keys[5], HALF_H, HALF_H, jnp.bfloat16)
    # Head stays f32 (after slicing fc3 to 2S live rows it is tiny).
    p["fc3"] = init_linear(keys[6], H, H)
    kw4, kb4 = jax.random.split(keys[7])
    bound = 1.0 / float(H) ** 0.5
    # fc4 stored as a (1, H) row so the kernel does a VPU multiply + reduce.
    p["fc4"] = (jax.random.uniform(kw4, (1, H), jnp.float32, -bound, bound),
                jax.random.uniform(kb4, (1, 1), jnp.float32, -bound, bound))
    return p


# ----------------------------------------------------------------------------
# Pure-JAX reference (same bf16 weights / f32 accumulation) for correctness
# ----------------------------------------------------------------------------
def net_forward_ref(params, x, y):
    def lin(p, v):
        w, b = p
        return jnp.dot(v.astype(w.dtype), w, preferred_element_type=jnp.float32) + b

    x1 = jnp.maximum(lin(params["fc1_1"], x), 0.0)
    x1 = jnp.maximum(lin(params["fc1_2"], x1), 0.0)
    x1 = lin(params["fc1_3"], x1)
    norms1 = jnp.sum(x1 * x1, axis=-1)

    x2 = jnp.maximum(lin(params["fc2_1"], y), 0.0)
    x2 = jnp.maximum(lin(params["fc2_2"], x2), 0.0)
    x2 = lin(params["fc2_3"], x2)
    norms2 = jnp.sum(x2 * x2, axis=-1)

    h1 = jnp.maximum(jnp.concatenate([norms1, norms2], axis=1), 0.0)
    h1 = jnp.pad(h1, ((0, 0), (0, H - h1.shape[1])))
    w3, b3 = params["fc3"]
    w4, b4 = params["fc4"]
    h2 = jnp.maximum(h1 @ w3 + b3, 0.0)
    return jnp.sum(h2 * w4, axis=-1, keepdims=True) + b4


if __name__ == "__main__":
    B, S, DIM1, DIM2 = 2, 8, 16, 16

    key = jax.random.PRNGKey(0)
    kp, kx, ky, kx2, ky2 = jax.random.split(key, 5)

    params = init_params(kp, DIM1, DIM2)

    # Reference problem size: single tile, fully fused single launch.
    x = jax.random.normal(kx, (B, S, DIM1), jnp.float32)
    y = jax.random.normal(ky, (B, S, DIM2), jnp.float32)
    out = jax.block_until_ready(net_forward(params, x, y))
    ref = jax.block_until_ready(net_forward_ref(params, x, y))
    assert out.shape == (B, 1), out.shape
    assert jnp.allclose(out, ref, rtol=2e-2, atol=2e-2), (out, ref)

    # Larger shape: exercises the multi-tile grid, the cross-tile accumulators and
    # the partial-last-tile masking path (5*128 = 640 rows -> 512 + 128-of-512).
    B2, S2 = 5, 128
    x2 = jax.random.normal(kx2, (B2, S2, DIM1), jnp.float32)
    y2 = jax.random.normal(ky2, (B2, S2, DIM2), jnp.float32)
    out2 = jax.block_until_ready(net_forward(params, x2, y2))
    ref2 = jax.block_until_ready(net_forward_ref(params, x2, y2))
    assert out2.shape == (B2, 1), out2.shape
    # Slightly looser atol: bf16 tower rounding accumulates over the longer seq.
    assert jnp.allclose(out2, ref2, rtol=2e-2, atol=5e-2), (out2, ref2)

    print("KERNEL_OK")
</pallas_src>

<mosaic_0001>
module attributes {stable_mosaic.version = 11 : i64} {
  func.func @_fused_kernel(%arg0: i32, %arg1: memref<16x16xf32, #tpu.memory_space<vmem>>, %arg2: memref<16x16xf32, #tpu.memory_space<vmem>>, %arg3: memref<16x512xbf16, #tpu.memory_space<vmem>>, %arg4: memref<1x512xf32, #tpu.memory_space<vmem>>, %arg5: memref<512x512xbf16, #tpu.memory_space<vmem>>, %arg6: memref<1x512xf32, #tpu.memory_space<vmem>>, %arg7: memref<512x512xbf16, #tpu.memory_space<vmem>>, %arg8: memref<1x512xf32, #tpu.memory_space<vmem>>, %arg9: memref<16x512xbf16, #tpu.memory_space<vmem>>, %arg10: memref<1x512xf32, #tpu.memory_space<vmem>>, %arg11: memref<512x512xbf16, #tpu.memory_space<vmem>>, %arg12: memref<1x512xf32, #tpu.memory_space<vmem>>, %arg13: memref<512x512xbf16, #tpu.memory_space<vmem>>, %arg14: memref<1x512xf32, #tpu.memory_space<vmem>>, %arg15: memref<2x16xf32, #tpu.memory_space<vmem>>, %arg16: memref<16x8xf32, #tpu.memory_space<vmem>>, %arg17: memref<8x1024xf32, #tpu.memory_space<vmem>>, %arg18: memref<8x1024xf32, #tpu.memory_space<vmem>>, %arg19: memref<1x1024xf32, #tpu.memory_space<vmem>>, %arg20: memref<1x1024xf32, #tpu.memory_space<vmem>>, %arg21: memref<1x1xf32, #tpu.memory_space<vmem>>, %arg22: memref<2x1xf32, #tpu.memory_space<vmem>>, %arg23: memref<2x8xf32, #tpu.memory_space<vmem>>, %arg24: memref<2x8xf32, #tpu.memory_space<vmem>>) attributes {dimension_semantics = [#tpu.dimension_semantics<arbitrary>], iteration_bounds = array<i64: 1>, scalar_prefetch = 0 : i64, scratch_operands = 2 : i64, tpu.core_type = #tpu.core_type<tc>, window_params = [{transform_indices = @transform_0, window_bounds = array<i64: 16, 16>}, {transform_indices = @transform_1, window_bounds = array<i64: 16, 16>}, {pipeline_mode = #tpu.pipeline_mode<synchronous>, transform_indices = @transform_2, window_bounds = array<i64: 16, 512>}, {pipeline_mode = #tpu.pipeline_mode<synchronous>, transform_indices = @transform_3, window_bounds = array<i64: 1, 512>}, {pipeline_mode = #tpu.pipeline_mode<synchronous>, transform_indices = @transform_4, window_bounds = array<i64: 512, 512>}, {pipeline_mode = #tpu.pipeline_mode<synchronous>, transform_indices = @transform_5, window_bounds = array<i64: 1, 512>}, {pipeline_mode = #tpu.pipeline_mode<synchronous>, transform_indices = @transform_6, window_bounds = array<i64: 512, 512>}, {pipeline_mode = #tpu.pipeline_mode<synchronous>, transform_indices = @transform_7, window_bounds = array<i64: 1, 512>}, {pipeline_mode = #tpu.pipeline_mode<synchronous>, transform_indices = @transform_8, window_bounds = array<i64: 16, 512>}, {pipeline_mode = #tpu.pipeline_mode<synchronous>, transform_indices = @transform_9, window_bounds = array<i64: 1, 512>}, {pipeline_mode = #tpu.pipeline_mode<synchronous>, transform_indices = @transform_10, window_bounds = array<i64: 512, 512>}, {pipeline_mode = #tpu.pipeline_mode<synchronous>, transform_indices = @transform_11, window_bounds = array<i64: 1, 512>}, {pipeline_mode = #tpu.pipeline_mode<synchronous>, transform_indices = @transform_12, window_bounds = array<i64: 512, 512>}, {pipeline_mode = #tpu.pipeline_mode<synchronous>, transform_indices = @transform_13, window_bounds = array<i64: 1, 512>}, {transform_indices = @transform_14, window_bounds = array<i64: 2, 16>}, {transform_indices = @transform_15, window_bounds = array<i64: 16, 8>}, {pipeline_mode = #tpu.pipeline_mode<synchronous>, transform_indices = @transform_16, window_bounds = array<i64: 8, 1024>}, {pipeline_mode = #tpu.pipeline_mode<synchronous>, transform_indices = @transform_17, window_bounds = array<i64: 8, 1024>}, {pipeline_mode = #tpu.pipeline_mode<synchronous>, transform_indices = @transform_18, window_bounds = array<i64: 1, 1024>}, {pipeline_mode = #tpu.pipeline_mode<synchronous>, transform_indices = @transform_19, window_bounds = array<i64: 1, 1024>}, {pipeline_mode = #tpu.pipeline_mode<synchronous>, transform_indices = @transform_20, window_bounds = array<i64: 1, 1>}, {pipeline_mode = #tpu.pipeline_mode<synchronous>, transform_indices = @transform_21, window_bounds = array<i64: 2, 1>}]} {
    %c0_i32 = arith.constant 0 : i32
    %0 = arith.cmpi eq, %arg0, %c0_i32 : i32
    %1 = arith.extui %0 : i1 to i32
    %c0_i32_0 = arith.constant 0 : i32
    %2 = arith.cmpi ne, %1, %c0_i32_0 : i32
    scf.if %2 {
      %cst_59 = arith.constant 0.000000e+00 : f32
      %74 = vector.broadcast %cst_59 : f32 to vector<2x8xf32>
      %c0_60 = arith.constant 0 : index
      %c0_61 = arith.constant 0 : index
      %75 = vector.load %arg23[%c0_60, %c0_61] : memref<2x8xf32, #tpu.memory_space<vmem>>, vector<2x8xf32>
      tpu.vector_store %arg23[%c0_60, %c0_61], %74 {strides = array<i32>} : memref<2x8xf32, #tpu.memory_space<vmem>>, vector<2x8xf32>,
      %cst_62 = arith.constant 0.000000e+00 : f32
      %76 = vector.broadcast %cst_62 : f32 to vector<2x8xf32>
      %c0_63 = arith.constant 0 : index
      %c0_64 = arith.constant 0 : index
      %77 = vector.load %arg24[%c0_63, %c0_64] : memref<2x8xf32, #tpu.memory_space<vmem>>, vector<2x8xf32>
      tpu.vector_store %arg24[%c0_63, %c0_64], %76 {strides = array<i32>} : memref<2x8xf32, #tpu.memory_space<vmem>>, vector<2x8xf32>,
    } else {
    }
    %c0 = arith.constant 0 : index
    %c0_1 = arith.constant 0 : index
    %3 = vector.load %arg1[%c0, %c0_1] : memref<16x16xf32, #tpu.memory_space<vmem>>, vector<16x16xf32>
    %4 = arith.truncf %3 : vector<16x16xf32> to vector<16x16xbf16>
    %c0_2 = arith.constant 0 : index
    %c0_3 = arith.constant 0 : index
    %5 = vector.load %arg3[%c0_2, %c0_3] : memref<16x512xbf16, #tpu.memory_space<vmem>>, vector<16x512xbf16>
    %cst = arith.constant dense<0.000000e+00> : vector<16x512xf32>
    %6 = tpu.matmul %4, %5, %cst {dimension_numbers = #tpu.dot_dimension_numbers<[1], [0], [0], [1], [0, 0, 1, 1], [], []>} : vector<16x16xbf16>, vector<16x512xbf16>, vector<16x512xf32> -> vector<16x512xf32>
    %c0_4 = arith.constant 0 : index
    %c0_5 = arith.constant 0 : index
    %7 = vector.load %arg4[%c0_4, %c0_5] : memref<1x512xf32, #tpu.memory_space<vmem>>, vector<1x512xf32>
    %8 = vector.broadcast %7 : vector<1x512xf32> to vector<16x512xf32>
    %9 = arith.addf %6, %8 : vector<16x512xf32>
    %cst_6 = arith.constant 0.000000e+00 : f32
    %10 = vector.broadcast %cst_6 : f32 to vector<16x512xf32>
    %11 = arith.maximumf %9, %10 : vector<16x512xf32>
    %12 = arith.truncf %11 : vector<16x512xf32> to vector<16x512xbf16>
    %c0_7 = arith.constant 0 : index
    %c0_8 = arith.constant 0 : index
    %13 = vector.load %arg5[%c0_7, %c0_8] : memref<512x512xbf16, #tpu.memory_space<vmem>>, vector<512x512xbf16>
    %cst_9 = arith.constant dense<0.000000e+00> : vector<16x512xf32>
    %14 = tpu.matmul %12, %13, %cst_9 {dimension_numbers = #tpu.dot_dimension_numbers<[1], [0], [0], [1], [0, 0, 1, 1], [], []>} : vector<16x512xbf16>, vector<512x512xbf16>, vector<16x512xf32> -> vector<16x512xf32>
    %c0_10 = arith.constant 0 : index
    %c0_11 = arith.constant 0 : index
    %15 = vector.load %arg6[%c0_10, %c0_11] : memref<1x512xf32, #tpu.memory_space<vmem>>, vector<1x512xf32>
    %16 = vector.broadcast %15 : vector<1x512xf32> to vector<16x512xf32>
    %17 = arith.addf %14, %16 : vector<16x512xf32>
    %cst_12 = arith.constant 0.000000e+00 : f32
    %18 = vector.broadcast %cst_12 : f32 to vector<16x512xf32>
    %19 = arith.maximumf %17, %18 : vector<16x512xf32>
    %20 = arith.truncf %19 : vector<16x512xf32> to vector<16x512xbf16>
    %c0_13 = arith.constant 0 : index
    %c0_14 = arith.constant 0 : index
    %21 = vector.load %arg7[%c0_13, %c0_14] : memref<512x512xbf16, #tpu.memory_space<vmem>>, vector<512x512xbf16>
    %cst_15 = arith.constant dense<0.000000e+00> : vector<16x512xf32>
    %22 = tpu.matmul %20, %21, %cst_15 {dimension_numbers = #tpu.dot_dimension_numbers<[1], [0], [0], [1], [0, 0, 1, 1], [], []>} : vector<16x512xbf16>, vector<512x512xbf16>, vector<16x512xf32> -> vector<16x512xf32>
    %c0_16 = arith.constant 0 : index
    %c0_17 = arith.constant 0 : index
    %23 = vector.load %arg8[%c0_16, %c0_17] : memref<1x512xf32, #tpu.memory_space<vmem>>, vector<1x512xf32>
    %24 = vector.broadcast %23 : vector<1x512xf32> to vector<16x512xf32>
    %25 = arith.addf %22, %24 : vector<16x512xf32>
    %26 = arith.mulf %25, %25 : vector<16x512xf32>
    %cst_18 = arith.constant dense<0.000000e+00> : vector<16xf32>
    %27 = vector.multi_reduction <add>, %26, %cst_18 [1] : vector<16x512xf32> to vector<16xf32>
    %28 = vector.shape_cast %27 : vector<16xf32> to vector<1x16xf32>
    %c0_19 = arith.constant 0 : index
    %c0_20 = arith.constant 0 : index
    %29 = vector.load %arg2[%c0_19, %c0_20] : memref<16x16xf32, #tpu.memory_space<vmem>>, vector<16x16xf32>
    %30 = arith.truncf %29 : vector<16x16xf32> to vector<16x16xbf16>
    %c0_21 = arith.constant 0 : index
    %c0_22 = arith.constant 0 : index
    %31 = vector.load %arg9[%c0_21, %c0_22] : memref<16x512xbf16, #tpu.memory_space<vmem>>, vector<16x512xbf16>
    %cst_23 = arith.constant dense<0.000000e+00> : vector<16x512xf32>
    %32 = tpu.matmul %30, %31, %cst_23 {dimension_numbers = #tpu.dot_dimension_numbers<[1], [0], [0], [1], [0, 0, 1, 1], [], []>} : vector<16x16xbf16>, vector<16x512xbf16>, vector<16x512xf32> -> vector<16x512xf32>
    %c0_24 = arith.constant 0 : index
    %c0_25 = arith.constant 0 : index
    %33 = vector.load %arg10[%c0_24, %c0_25] : memref<1x512xf32, #tpu.memory_space<vmem>>, vector<1x512xf32>
    %34 = vector.broadcast %33 : vector<1x512xf32> to vector<16x512xf32>
    %35 = arith.addf %32, %34 : vector<16x512xf32>
    %cst_26 = arith.constant 0.000000e+00 : f32
    %36 = vector.broadcast %cst_26 : f32 to vector<16x512xf32>
    %37 = arith.maximumf %35, %36 : vector<16x512xf32>
    %38 = arith.truncf %37 : vector<16x512xf32> to vector<16x512xbf16>
    %c0_27 = arith.constant 0 : index
    %c0_28 = arith.constant 0 : index
    %39 = vector.load %arg11[%c0_27, %c0_28] : memref<512x512xbf16, #tpu.memory_space<vmem>>, vector<512x512xbf16>
    %cst_29 = arith.constant dense<0.000000e+00> : vector<16x512xf32>
    %40 = tpu.matmul %38, %39, %cst_29 {dimension_numbers = #tpu.dot_dimension_numbers<[1], [0], [0], [1], [0, 0, 1, 1], [], []>} : vector<16x512xbf16>, vector<512x512xbf16>, vector<16x512xf32> -> vector<16x512xf32>
    %c0_30 = arith.constant 0 : index
    %c0_31 = arith.constant 0 : index
    %41 = vector.load %arg12[%c0_30, %c0_31] : memref<1x512xf32, #tpu.memory_space<vmem>>, vector<1x512xf32>
    %42 = vector.broadcast %41 : vector<1x512xf32> to vector<16x512xf32>
    %43 = arith.addf %40, %42 : vector<16x512xf32>
    %cst_32 = arith.constant 0.000000e+00 : f32
    %44 = vector.broadcast %cst_32 : f32 to vector<16x512xf32>
    %45 = arith.maximumf %43, %44 : vector<16x512xf32>
    %46 = arith.truncf %45 : vector<16x512xf32> to vector<16x512xbf16>
    %c0_33 = arith.constant 0 : index
    %c0_34 = arith.constant 0 : index
    %47 = vector.load %arg13[%c0_33, %c0_34] : memref<512x512xbf16, #tpu.memory_space<vmem>>, vector<512x512xbf16>
    %cst_35 = arith.constant dense<0.000000e+00> : vector<16x512xf32>
    %48 = tpu.matmul %46, %47, %cst_35 {dimension_numbers = #tpu.dot_dimension_numbers<[1], [0], [0], [1], [0, 0, 1, 1], [], []>} : vector<16x512xbf16>, vector<512x512xbf16>, vector<16x512xf32> -> vector<16x512xf32>
    %c0_36 = arith.constant 0 : index
    %c0_37 = arith.constant 0 : index
    %49 = vector.load %arg14[%c0_36, %c0_37] : memref<1x512xf32, #tpu.memory_space<vmem>>, vector<1x512xf32>
    %50 = vector.broadcast %49 : vector<1x512xf32> to vector<16x512xf32>
    %51 = arith.addf %48, %50 : vector<16x512xf32>
    %52 = arith.mulf %51, %51 : vector<16x512xf32>
    %cst_38 = arith.constant dense<0.000000e+00> : vector<16xf32>
    %53 = vector.multi_reduction <add>, %52, %cst_38 [1] : vector<16x512xf32> to vector<16xf32>
    %54 = vector.shape_cast %53 : vector<16xf32> to vector<1x16xf32>
    %c0_39 = arith.constant 0 : index
    %c0_40 = arith.constant 0 : index
    %55 = vector.load %arg15[%c0_39, %c0_40] : memref<2x16xf32, #tpu.memory_space<vmem>>, vector<2x16xf32>
    %56 = vector.broadcast %28 : vector<1x16xf32> to vector<2x16xf32>
    %57 = arith.mulf %55, %56 : vector<2x16xf32>
    %c0_41 = arith.constant 0 : index
    %c0_42 = arith.constant 0 : index
    %58 = vector.load %arg15[%c0_41, %c0_42] : memref<2x16xf32, #tpu.memory_space<vmem>>, vector<2x16xf32>
    %59 = vector.broadcast %54 : vector<1x16xf32> to vector<2x16xf32>
    %60 = arith.mulf %58, %59 : vector<2x16xf32>
    %c0_43 = arith.constant 0 : index
    %c0_44 = arith.constant 0 : index
    %61 = vector.load %arg23[%c0_43, %c0_44] : memref<2x8xf32, #tpu.memory_space<vmem>>, vector<2x8xf32>
    %c0_45 = arith.constant 0 : index
    %c0_46 = arith.constant 0 : index
    %62 = vector.load %arg16[%c0_45, %c0_46] : memref<16x8xf32, #tpu.memory_space<vmem>>, vector<16x8xf32>
    %cst_47 = arith.constant dense<0.000000e+00> : vector<2x8xf32>
    %63 = tpu.matmul %57, %62, %cst_47 {dimension_numbers = #tpu.dot_dimension_numbers<[1], [0], [0], [1], [0, 0, 1, 1], [], []>} : vector<2x16xf32>, vector<16x8xf32>, vector<2x8xf32> -> vector<2x8xf32>
    %64 = arith.addf %61, %63 : vector<2x8xf32>
    %c0_48 = arith.constant 0 : index
    %c0_49 = arith.constant 0 : index
    %65 = vector.load %arg23[%c0_48, %c0_49] : memref<2x8xf32, #tpu.memory_space<vmem>>, vector<2x8xf32>
    tpu.vector_store %arg23[%c0_48, %c0_49], %64 {strides = array<i32>} : memref<2x8xf32, #tpu.memory_space<vmem>>, vector<2x8xf32>,
    %c0_50 = arith.constant 0 : index
    %c0_51 = arith.constant 0 : index
    %66 = vector.load %arg24[%c0_50, %c0_51] : memref<2x8xf32, #tpu.memory_space<vmem>>, vector<2x8xf32>
    %c0_52 = arith.constant 0 : index
    %c0_53 = arith.constant 0 : index
    %67 = vector.load %arg16[%c0_52, %c0_53] : memref<16x8xf32, #tpu.memory_space<vmem>>, vector<16x8xf32>
    %cst_54 = arith.constant dense<0.000000e+00> : vector<2x8xf32>
    %68 = tpu.matmul %60, %67, %cst_54 {dimension_numbers = #tpu.dot_dimension_numbers<[1], [0], [0], [1], [0, 0, 1, 1], [], []>} : vector<2x16xf32>, vector<16x8xf32>, vector<2x8xf32> -> vector<2x8xf32>
    %69 = arith.addf %66, %68 : vector<2x8xf32>
    %c0_55 = arith.constant 0 : index
    %c0_56 = arith.constant 0 : index
    %70 = vector.load %arg24[%c0_55, %c0_56] : memref<2x8xf32, #tpu.memory_space<vmem>>, vector<2x8xf32>
    tpu.vector_store %arg24[%c0_55, %c0_56], %69 {strides = array<i32>} : memref<2x8xf32, #tpu.memory_space<vmem>>, vector<2x8xf32>,
    %c0_i32_57 = arith.constant 0 : i32
    %71 = arith.cmpi eq, %arg0, %c0_i32_57 : i32
    %72 = arith.extui %71 : i1 to i32
    %c0_i32_58 = arith.constant 0 : i32
    %73 = arith.cmpi ne, %72, %c0_i32_58 : i32
    scf.if %73 {
      %c0_59 = arith.constant 0 : index
      %c0_60 = arith.constant 0 : index
      %74 = vector.load %arg23[%c0_59, %c0_60] : memref<2x8xf32, #tpu.memory_space<vmem>>, vector<2x8xf32>
      %c0_61 = arith.constant 0 : index
      %c0_62 = arith.constant 0 : index
      %75 = vector.load %arg17[%c0_61, %c0_62] : memref<8x1024xf32, #tpu.memory_space<vmem>>, vector<8x1024xf32>
      %cst_63 = arith.constant dense<0.000000e+00> : vector<2x1024xf32>
      %76 = tpu.matmul %74, %75, %cst_63 {dimension_numbers = #tpu.dot_dimension_numbers<[1], [0], [0], [1], [0, 0, 1, 1], [], []>} : vector<2x8xf32>, vector<8x1024xf32>, vector<2x1024xf32> -> vector<2x1024xf32>
      %c0_64 = arith.constant 0 : index
      %c0_65 = arith.constant 0 : index
      %77 = vector.load %arg24[%c0_64, %c0_65] : memref<2x8xf32, #tpu.memory_space<vmem>>, vector<2x8xf32>
      %c0_66 = arith.constant 0 : index
      %c0_67 = arith.constant 0 : index
      %78 = vector.load %arg18[%c0_66, %c0_67] : memref<8x1024xf32, #tpu.memory_space<vmem>>, vector<8x1024xf32>
      %cst_68 = arith.constant dense<0.000000e+00> : vector<2x1024xf32>
      %79 = tpu.matmul %77, %78, %cst_68 {dimension_numbers = #tpu.dot_dimension_numbers<[1], [0], [0], [1], [0, 0, 1, 1], [], []>} : vector<2x8xf32>, vector<8x1024xf32>, vector<2x1024xf32> -> vector<2x1024xf32>
      %80 = arith.addf %76, %79 : vector<2x1024xf32>
      %c0_69 = arith.constant 0 : index
      %c0_70 = arith.constant 0 : index
      %81 = vector.load %arg19[%c0_69, %c0_70] : memref<1x1024xf32, #tpu.memory_space<vmem>>, vector<1x1024xf32>
      %82 = vector.broadcast %81 : vector<1x1024xf32> to vector<2x1024xf32>
      %83 = arith.addf %80, %82 : vector<2x1024xf32>
      %cst_71 = arith.constant 0.000000e+00 : f32
      %84 = vector.broadcast %cst_71 : f32 to vector<2x1024xf32>
      %85 = arith.maximumf %83, %84 : vector<2x1024xf32>
      %c0_72 = arith.constant 0 : index
      %c0_73 = arith.constant 0 : index
      %86 = vector.load %arg20[%c0_72, %c0_73] : memref<1x1024xf32, #tpu.memory_space<vmem>>, vector<1x1024xf32>
      %87 = vector.broadcast %86 : vector<1x1024xf32> to vector<2x1024xf32>
      %88 = arith.mulf %85, %87 : vector<2x1024xf32>
      %cst_74 = arith.constant dense<0.000000e+00> : vector<2xf32>
      %89 = vector.multi_reduction <add>, %88, %cst_74 [1] : vector<2x1024xf32> to vector<2xf32>
      %90 = vector.shape_cast %89 : vector<2xf32> to vector<2x1xf32>
      %c0_75 = arith.constant 0 : index
      %c0_76 = arith.constant 0 : index
      %91 = vector.load %arg21[%c0_75, %c0_76] : memref<1x1xf32, #tpu.memory_space<vmem>>, vector<1x1xf32>
      %92 = vector.broadcast %91 : vector<1x1xf32> to vector<2x1xf32>
      %93 = arith.addf %90, %92 : vector<2x1xf32>
      %c0_77 = arith.constant 0 : index
      %c0_78 = arith.constant 0 : index
      %94 = vector.load %arg22[%c0_77, %c0_78] : memref<2x1xf32, #tpu.memory_space<vmem>>, vector<2x1xf32>
      tpu.vector_store %arg22[%c0_77, %c0_78], %93 {strides = array<i32>} : memref<2x1xf32, #tpu.memory_space<vmem>>, vector<2x1xf32>,
    } else {
    }
    return
  }
  func.func @transform_0(%arg0: i32) -> (i32, i32) {
    %c0_i32 = arith.constant 0 : i32
    %c0_i32_0 = arith.constant 0 : i32
    return %arg0, %c0_i32 : i32, i32
  }
  func.func @transform_1(%arg0: i32) -> (i32, i32) {
    %c0_i32 = arith.constant 0 : i32
    %c0_i32_0 = arith.constant 0 : i32
    return %arg0, %c0_i32 : i32, i32
  }
  func.func @transform_2(%arg0: i32) -> (i32, i32) {
    %c0_i32 = arith.constant 0 : i32
    %c0_i32_0 = arith.constant 0 : i32
    %c0_i32_1 = arith.constant 0 : i32
    return %c0_i32, %c0_i32_0 : i32, i32
  }
  func.func @transform_3(%arg0: i32) -> (i32, i32) {
    %c0_i32 = arith.constant 0 : i32
    %c0_i32_0 = arith.constant 0 : i32
    %c0_i32_1 = arith.constant 0 : i32
    return %c0_i32, %c0_i32_0 : i32, i32
  }
  func.func @transform_4(%arg0: i32) -> (i32, i32) {
    %c0_i32 = arith.constant 0 : i32
    %c0_i32_0 = arith.constant 0 : i32
    %c0_i32_1 = arith.constant 0 : i32
    return %c0_i32, %c0_i32_0 : i32, i32
  }
  func.func @transform_5(%arg0: i32) -> (i32, i32) {
    %c0_i32 = arith.constant 0 : i32
    %c0_i32_0 = arith.constant 0 : i32
    %c0_i32_1 = arith.constant 0 : i32
    return %c0_i32, %c0_i32_0 : i32, i32
  }
  func.func @transform_6(%arg0: i32) -> (i32, i32) {
    %c0_i32 = arith.constant 0 : i32
    %c0_i32_0 = arith.constant 0 : i32
    %c0_i32_1 = arith.constant 0 : i32
    return %c0_i32, %c0_i32_0 : i32, i32
  }
  func.func @transform_7(%arg0: i32) -> (i32, i32) {
    %c0_i32 = arith.constant 0 : i32
    %c0_i32_0 = arith.constant 0 : i32
    %c0_i32_1 = arith.constant 0 : i32
    return %c0_i32, %c0_i32_0 : i32, i32
  }
  func.func @transform_8(%arg0: i32) -> (i32, i32) {
    %c0_i32 = arith.constant 0 : i32
    %c0_i32_0 = arith.constant 0 : i32
    %c0_i32_1 = arith.constant 0 : i32
    return %c0_i32, %c0_i32_0 : i32, i32
  }
  func.func @transform_9(%arg0: i32) -> (i32, i32) {
    %c0_i32 = arith.constant 0 : i32
    %c0_i32_0 = arith.constant 0 : i32
    %c0_i32_1 = arith.constant 0 : i32
    return %c0_i32, %c0_i32_0 : i32, i32
  }
  func.func @transform_10(%arg0: i32) -> (i32, i32) {
    %c0_i32 = arith.constant 0 : i32
    %c0_i32_0 = arith.constant 0 : i32
    %c0_i32_1 = arith.constant 0 : i32
    return %c0_i32, %c0_i32_0 : i32, i32
  }
  func.func @transform_11(%arg0: i32) -> (i32, i32) {
    %c0_i32 = arith.constant 0 : i32
    %c0_i32_0 = arith.constant 0 : i32
    %c0_i32_1 = arith.constant 0 : i32
    return %c0_i32, %c0_i32_0 : i32, i32
  }
  func.func @transform_12(%arg0: i32) -> (i32, i32) {
    %c0_i32 = arith.constant 0 : i32
    %c0_i32_0 = arith.constant 0 : i32
    %c0_i32_1 = arith.constant 0 : i32
    return %c0_i32, %c0_i32_0 : i32, i32
  }
  func.func @transform_13(%arg0: i32) -> (i32, i32) {
    %c0_i32 = arith.constant 0 : i32
    %c0_i32_0 = arith.constant 0 : i32
    %c0_i32_1 = arith.constant 0 : i32
    return %c0_i32, %c0_i32_0 : i32, i32
  }
  func.func @transform_14(%arg0: i32) -> (i32, i32) {
    %c0_i32 = arith.constant 0 : i32
    %c0_i32_0 = arith.constant 0 : i32
    return %c0_i32, %arg0 : i32, i32
  }
  func.func @transform_15(%arg0: i32) -> (i32, i32) {
    %c0_i32 = arith.constant 0 : i32
    %c0_i32_0 = arith.constant 0 : i32
    return %arg0, %c0_i32 : i32, i32
  }
  func.func @transform_16(%arg0: i32) -> (i32, i32) {
    %c0_i32 = arith.constant 0 : i32
    %c0_i32_0 = arith.constant 0 : i32
    %c0_i32_1 = arith.constant 0 : i32
    return %c0_i32, %c0_i32_0 : i32, i32
  }
  func.func @transform_17(%arg0: i32) -> (i32, i32) {
    %c0_i32 = arith.constant 0 : i32
    %c0_i32_0 = arith.constant 0 : i32
    %c0_i32_1 = arith.constant 0 : i32
    return %c0_i32, %c0_i32_0 : i32, i32
  }
  func.func @transform_18(%arg0: i32) -> (i32, i32) {
    %c0_i32 = arith.constant 0 : i32
    %c0_i32_0 = arith.constant 0 : i32
    %c0_i32_1 = arith.constant 0 : i32
    return %c0_i32, %c0_i32_0 : i32, i32
  }
  func.func @transform_19(%arg0: i32) -> (i32, i32) {
    %c0_i32 = arith.constant 0 : i32
    %c0_i32_0 = arith.constant 0 : i32
    %c0_i32_1 = arith.constant 0 : i32
    return %c0_i32, %c0_i32_0 : i32, i32
  }
  func.func @transform_20(%arg0: i32) -> (i32, i32) {
    %c0_i32 = arith.constant 0 : i32
    %c0_i32_0 = arith.constant 0 : i32
    %c0_i32_1 = arith.constant 0 : i32
    return %c0_i32, %c0_i32_0 : i32, i32
  }
  func.func @transform_21(%arg0: i32) -> (i32, i32) {
    %c0_i32 = arith.constant 0 : i32
    %c0_i32_0 = arith.constant 0 : i32
    %c0_i32_1 = arith.constant 0 : i32
    return %c0_i32, %c0_i32_0 : i32, i32
  }
}

</mosaic_0001>

<bundles_post_ra>
// kernel: net_forward.1
= control target key start
LH: loop header
LB: loop body
LE: loop exit
PB: predicated region body
PF: predicated region fallthrough
CT: control target
= control target key end

     0   :  { %s8731_s0 = inlined_call_operand.hbm [shape: f32[16,16], index: 0, kind: input, shape index: {}]   ;;  %s8732_s1 = inlined_call_operand.hbm [shape: f32[16,16], index: 1, kind: input, shape index: {}]   ;;  %s8733_s2 = inlined_call_operand.hbm [shape: bf16[16,512], index: 2, kind: input, shape index: {}]   ;;  %s8734_s3 = inlined_call_operand.hbm [shape: f32[1,512], index: 3, kind: input, shape index: {}]   ;;  %s8735_s4 = inlined_call_operand.hbm [shape: bf16[512,512], index: 4, kind: input, shape index: {}]   ;;  %s8736_s5 = inlined_call_operand.hbm [shape: f32[1,512], index: 5, kind: input, shape index: {}]   ;;  %s8737_s6 = inlined_call_operand.hbm [shape: bf16[512,512], index: 6, kind: input, shape index: {}]   ;;  %s8738_s7 = inlined_call_operand.hbm [shape: f32[1,512], index: 7, kind: input, shape index: {}]   ;;  %s8739_s8 = inlined_call_operand.hbm [shape: bf16[16,512], index: 8, kind: input, shape index: {}]   ;;  %s8740_s9 = inlined_call_operand.hbm [shape: f32[1,512], index: 9, kind: input, shape index: {}]   ;;  %s8741_s10 = inlined_call_operand.hbm [shape: bf16[512,512], index: 10, kind: input, shape index: {}]   ;;  %s8742_s11 = inlined_call_operand.hbm [shape: f32[1,512], index: 11, kind: input, shape index: {}]   ;;  %s8743_s12 = inlined_call_operand.hbm [shape: bf16[512,512], index: 12, kind: input, shape index: {}]   ;;  %s8744_s13 = inlined_call_operand.hbm [shape: f32[1,512], index: 13, kind: input, shape index: {}]   ;;  %s8745_s14 = inlined_call_operand.vmem [shape: f32[2,16], index: 14, kind: input, shape index: {}]   ;;  %s8746_s15 = inlined_call_operand.vmem [shape: f32[16,8], index: 15, kind: input, shape index: {}]   ;;  %s8747_s16 = inlined_call_operand.vmem [shape: f32[8,1024], index: 16, kind: input, shape index: {}]   ;;  %s8748_s17 = inlined_call_operand.vmem [shape: f32[8,1024], index: 17, kind: input, shape index: {}]   ;;  %s8749_s18 = inlined_call_operand.hbm [shape: f32[1,1024], index: 18, kind: input, shape index: {}]   ;;  %s8750_s19 = inlined_call_operand.hbm [shape: f32[1,1024], index: 19, kind: input, shape index: {}]   ;;  %s8751_s20 = inlined_call_operand.<no memory space> [shape: f32[1,1], index: 20, kind: input, shape index: {}]   ;;  %s8752_s21 = inlined_call_operand.vmem [shape: f32[2,1], index: 21, kind: output, shape index: {}]  }
   0x1   :  { %8755 = sst [smem:[#allocation39_spill]] %s8731_s0  ;;  %v26_v0 = vstv %s8751_s20 }
   0x2   :  { %8756 = sst [smem:[#allocation40_spill]] %s8732_s1  ;;  %27 = vst [vmem:[#allocation4] sm:$0x1] %v26_v0 }
   0x3   :  { %8757 = sst [smem:[#allocation41_spill]] %s8733_s2 }
   0x4   :  { %8758 = sst [smem:[#allocation42_spill]] %s8734_s3 }
   0x5   :  { %8759 = sst [smem:[#allocation43_spill]] %s8735_s4 }
   0x6   :  { %8760 = sst [smem:[#allocation44_spill]] %s8736_s5 }
   0x7   :  { %28 = vsyncpa [#allocation6], 0 }
   0x8   :  { %29 = vsyncpa [#allocation8], 0 }
   0x9   :  { %30 = vsyncpa [#allocation11], 0 }
   0xa   :  { %31 = vsyncpa [#allocation14], 0 }
   0xb   :  { %32 = vsyncpa [#allocation17], 0 }
   0xc   :  { %33 = vsyncpa [#allocation20], 0 }
   0xd   :  { %34 = vsyncpa [#allocation23], 0 }
   0xe   :  { %35 = vsyncpa [#allocation26], 0 }
   0xf   :  { %36 = vsyncpa [#allocation29], 0  ;;  %s8761_s3 = sld [smem:[#allocation40_spill]]  ;;  %s8168_s29 = smov [#allocation7]  }
  0x10   :  { %s56_s0 = sshll.u32 %s8168_s29, 4  ;;  %s8762_s30 = sld [smem:[#allocation42_spill]]  ;;  %s57_s0 = int_to_ptr.vmem [resolvable:$true] %s56_s0 }
  0x11   :  { %s8753_s22 = smov 128   ;;  %s8754_s23 = smov 8  }
  0x12   :  { %s8171_s1 = smov [#allocation10]   ;;  %s8763_s26 = sld [smem:[#allocation44_spill]] }
  0x13   :  { %s83_s24 = sshll.u32 %s8171_s1, 4  ;;  %s129_s4 = sshll.u32 %s8738_s7, 4  ;;  %s84_s24 = int_to_ptr.vmem [resolvable:$true] %s83_s24  ;;  %s130_s4 = int_to_ptr.hbm [resolvable:$true] %s129_s4 }
  0x14   :  { %s8172_s20 = smov [#allocation13]   ;;  %s8174_s25 = smov [#allocation19]  }
  0x15   :  { %s54_s28 = sshll.u32 %s8761_s3, 4  ;;  %s155_s7 = sshll.u32 %s8174_s25, 4  ;;  %s55_s28 = int_to_ptr.hbm [resolvable:$true] %s54_s28  ;;  %s156_s7 = int_to_ptr.vmem [resolvable:$true] %s155_s7 }
  0x16   :  { %s81_s5 = sshll.u32 %s8762_s30, 4  ;;  %s107_s30 = sshll.u32 %s8172_s20, 4  ;;  %s82_s5 = int_to_ptr.hbm [resolvable:$true] %s81_s5  ;;  %s108_s30 = int_to_ptr.vmem [resolvable:$true] %s107_s30 }
  0x17   :  { %62 = dma.hbm_to_vmem [thread:$0]  %s55_s28, 256, %s57_s0, [#allocation8], %s8753_s22, %s8753_s22, %s8754_s23  }
  0x18   :  { %s105_s27 = sshll.u32 %s8763_s26, 4  ;;  %s8173_s28 = smov [#allocation16]   ;;  %s106_s27 = int_to_ptr.hbm [resolvable:$true] %s105_s27 }
  0x19   :  { %86 = dma.hbm_to_vmem [thread:$0]  %s82_s5, 64, %s84_s24, [#allocation11]  }
  0x1a   :  { %110 = dma.hbm_to_vmem [thread:$0]  %s106_s27, 64, %s108_s30, [#allocation14]  }
  0x1b   :  { %s131_s0 = sshll.u32 %s8173_s28, 4  ;;  %s153_s23 = sshll.u32 %s8740_s9, 4  ;;  %s132_s0 = int_to_ptr.vmem [resolvable:$true] %s131_s0  ;;  %s154_s23 = int_to_ptr.hbm [resolvable:$true] %s153_s23 }
  0x1c   :  { %134 = dma.hbm_to_vmem [thread:$0]  %s130_s4, 64, %s132_s0, [#allocation17]  }
  0x1d   :  { %s177_s24 = sshll.u32 %s8742_s11, 4  ;;  %s8175_s26 = smov [#allocation22]   ;;  %s178_s24 = int_to_ptr.hbm [resolvable:$true] %s177_s24 }
  0x1e   :  { %158 = dma.hbm_to_vmem [thread:$0]  %s154_s23, 64, %s156_s7, [#allocation20]  }
  0x1f   :  { %s179_s27 = sshll.u32 %s8175_s26, 4  ;;  %s201_s20 = sshll.u32 %s8744_s13, 4  ;;  %s180_s27 = int_to_ptr.vmem [resolvable:$true] %s179_s27  ;;  %s202_s20 = int_to_ptr.hbm [resolvable:$true] %s201_s20 }
  0x20   :  { %182 = dma.hbm_to_vmem [thread:$0]  %s178_s24, 64, %s180_s27, [#allocation23]  }
  0x21   :  { %s8764_s4 = sld [smem:[#allocation39_spill]]  ;;  %s8176_s28 = smov [#allocation25]  }
  0x22   :  { %s203_s11 = sshll.u32 %s8176_s28, 4  ;;  %s8177_s0 = smov [#allocation5]   ;;  %s204_s11 = int_to_ptr.vmem [resolvable:$true] %s203_s11 }
  0x23   :  { %206 = dma.hbm_to_vmem [thread:$0]  %s202_s20, 64, %s204_s11, [#allocation26]  }
  0x24   :  { %s43_s23 = sshll.u32 %s8177_s0, 4  ;;  %s8765_s5 = sld [smem:[#allocation41_spill]]  ;;  %s44_s23 = int_to_ptr.vmem [resolvable:$true] %s43_s23 }
  0x25   :  { %s8766_s13 = smov 8   ;;  %s8767_s7 = smov 128  }
  0x26   :  { %s8178_s24 = smov [#allocation9]   ;;  %s8768_s29 = sld [smem:[#allocation43_spill]] }
  0x27   :  { %s41_s30 = sshll.u32 %s8764_s4, 4  ;;  %s69_s26 = sshll.u32 %s8178_s24, 4  ;;  %s42_s30 = int_to_ptr.hbm [resolvable:$true] %s41_s30  ;;  %s70_s26 = int_to_ptr.vmem [resolvable:$true] %s69_s26 }
  0x28   :  { %49 = dma.hbm_to_vmem [thread:$0]  %s42_s30, 256, %s44_s23, [#allocation6], %s8767_s7, %s8767_s7, %s8766_s13  }
  0x29   :  { %s8179_s20 = smov 256   ;;  %s8180_s22 = smov 16  }
  0x2a   :  { %s67_s25 = sshll.u32 %s8765_s5, 4  ;;  %s8181_s4 = smov [#allocation12]   ;;  %s68_s25 = int_to_ptr.hbm [resolvable:$true] %s67_s25 }
  0x2b   :  { %75 = dma.hbm_to_vmem [thread:$0]  %s68_s25, 512, %s70_s26, [#allocation8], %s8179_s20, %s8179_s20, %s8180_s22  }
  0x2c   :  { %s91_s9 = sshll.u32 %s8768_s29, 4  ;;  %s93_s28 = sshll.u32 %s8181_s4, 4  ;;  %s92_s9 = int_to_ptr.hbm [resolvable:$true] %s91_s9  ;;  %s94_s28 = int_to_ptr.vmem [resolvable:$true] %s93_s28 }
  0x2d   :  { %s115_s30 = sshll.u32 %s8737_s6, 4  ;;  %s139_s2 = sshll.u32 %s8739_s8, 4  ;;  %s116_s30 = int_to_ptr.hbm [resolvable:$true] %s115_s30  ;;  %s140_s2 = int_to_ptr.hbm [resolvable:$true] %s139_s2 }
  0x2e   :  { %99 = dma.hbm_to_vmem [thread:$0]  %s92_s9, 16384, %s94_s28, [#allocation11], %s8179_s20, %s8179_s20, %s8180_s22  }
  0x2f   :  { %s8182_s5 = smov [#allocation15]   ;;  %s8183_s25 = smov [#allocation18]  }
  0x30   :  { %s117_s13 = sshll.u32 %s8182_s5, 4  ;;  %s141_s6 = sshll.u32 %s8183_s25, 4  ;;  %s118_s13 = int_to_ptr.vmem [resolvable:$true] %s117_s13  ;;  %s142_s6 = int_to_ptr.vmem [resolvable:$true] %s141_s6 }
  0x31   :  { %123 = dma.hbm_to_vmem [thread:$0]  %s116_s30, 16384, %s118_s13, [#allocation14], %s8179_s20, %s8179_s20, %s8180_s22  }
  0x32   :  { %s163_s26 = sshll.u32 %s8741_s10, 4  ;;  %s187_s3 = sshll.u32 %s8743_s12, 4  ;;  %s164_s26 = int_to_ptr.hbm [resolvable:$true] %s163_s26  ;;  %s188_s3 = int_to_ptr.hbm [resolvable:$true] %s187_s3 }
  0x33   :  { %147 = dma.hbm_to_vmem [thread:$0]  %s140_s2, 512, %s142_s6, [#allocation17], %s8179_s20, %s8179_s20, %s8180_s22  }
  0x34   :  { %s8184_s29 = smov [#allocation21]   ;;  %s8185_s4 = smov [#allocation24]  }
  0x35   :  { %s165_s9 = sshll.u32 %s8184_s29, 4  ;;  %s189_s10 = sshll.u32 %s8185_s4, 4  ;;  %s166_s9 = int_to_ptr.vmem [resolvable:$true] %s165_s9  ;;  %s190_s10 = int_to_ptr.vmem [resolvable:$true] %s189_s10 }
  0x36   :  { %171 = dma.hbm_to_vmem [thread:$0]  %s164_s26, 16384, %s166_s9, [#allocation20], %s8179_s20, %s8179_s20, %s8180_s22  }
  0x37   :  { %s220_s0 = sshll.u32 %s8749_s18, 4  ;;  %s231_s23 = sshll.u32 %s8750_s19, 4  ;;  %s221_s0 = int_to_ptr.hbm [resolvable:$true] %s220_s0  ;;  %s232_s23 = int_to_ptr.hbm [resolvable:$true] %s231_s23 }
  0x38   :  { %195 = dma.hbm_to_vmem [thread:$0]  %s188_s3, 16384, %s190_s10, [#allocation23], %s8179_s20, %s8179_s20, %s8180_s22  }
  0x39   :  { %s8186_s1 = smov [#allocation27]   ;;  %s8187_s5 = smov [#allocation28]  }
  0x3a   :  { %s222_s2 = sshll.u32 %s8186_s1, 4  ;;  %s233_s13 = sshll.u32 %s8187_s5, 4  ;;  %s223_s2 = int_to_ptr.vmem [resolvable:$true] %s222_s2  ;;  %s234_s13 = int_to_ptr.vmem [resolvable:$true] %s233_s13 }
  0x3b   :  { %225 = dma.hbm_to_vmem [thread:$0]  %s221_s0, 128, %s223_s2, [#allocation26]  }
  0x3c   :  { %236 = dma.hbm_to_vmem [thread:$0]  %s232_s23, 128, %s234_s13, [#allocation29]  }
  0x3d   :  { %8150 = dma.done.wait [#allocation6], 256  }
  0x3e   :  { %8151 = vsyncadd [#allocation6], 4294967040 }
  0x3f   :  { %8152 = dma.done.wait [#allocation8], 768  }
  0x40   :  { %8153 = vsyncadd [#allocation8], 4294966528 }
  0x41   :  { %8154 = dma.done.wait [#allocation11], 16448  }
  0x42   :  { %8155 = vsyncadd [#allocation11], 4294950848 }
  0x43   :  { %8156 = dma.done.wait [#allocation14], 16448  }
  0x44   :  { %8157 = vsyncadd [#allocation14], 4294950848 }
  0x45   :  { %8158 = dma.done.wait [#allocation17], 576  }
  0x46   :  { %8159 = vsyncadd [#allocation17], 4294966720 }
  0x47   :  { %8160 = dma.done.wait [#allocation20], 16448  }
  0x48   :  { %8161 = vsyncadd [#allocation20], 4294950848 }
  0x49   :  { %8162 = dma.done.wait [#allocation23], 16448  }
  0x4a   :  { %8163 = vsyncadd [#allocation23], 4294950848 }
  0x4b   :  { %8164 = dma.done.wait [#allocation26], 192  }
  0x4c   :  { %8165 = vsyncadd [#allocation26], 4294967104 }
  0x4d   :  { %8166 = dma.done.wait [#allocation29], 128  }
  0x4e   :  { %8167 = vsyncadd [#allocation29], 4294967168  ;;  %v5120_v1 = vld [vmem:[#allocation9] sm:$0xf]  ;;  %v7226_v2 = vld [vmem:[#allocation9 + $0xc] sm:$0xf0] }
  0x4f   :  { %v7224_v3 = vld [vmem:[#allocation9 + $0x4] sm:$0xf]  ;;  %v5121_v4 = vor.u32 %v7226_v2, %v5120_v1  ;;  %v5122_v5 = vld [vmem:[#allocation9 + $0x10] sm:$0xf0]  ;;  %v5128_v6 = vld [vmem:[#allocation9 + $0x8] sm:$0xf] }
  0x50   :  { %v7227_v7 = vld [vmem:[#allocation9 + $0x14] sm:$0xf0]  ;;  %v5125_v8 = vor.u32 %v7224_v3, %v5122_v5  ;;  %v7225_v10 = vld [vmem:[#allocation9 + $0xc] sm:$0xf]  ;;  %v5130_v11 = vld [vmem:[#allocation9 + $0x18] sm:$0xf0] }
  0x51   :  { %v5129_v9 = vor.u32 %v7227_v7, %v5128_v6  ;;  %v311_v12 = vld [vmem:[#allocation5] sm:$0xff]  ;;  %359 = vmatpush.bf16.msra.mxu0 %v5121_v4  ;;  %v5133_v13 = vor.u32 %v7225_v10, %v5130_v11  ;;  %v312_v14 = vld [vmem:[#allocation5 + $0x8] sm:$0xff]  ;;  %vm348_vm0 = vcmask 130048   ;;  %v7258_v16 = vld [vmem:[#allocation12 + $0xec] sm:$0xf0]  ;;  %vm4604_vm1 = vcmask 130112  }
  0x52   :  { %v5252_v15 = vld [vmem:[#allocation12 + $0xe0] sm:$0xf]  ;;  %373 = vmatpush.bf16.msra.mxu1 %v5125_v8  ;;  %v313_v17 = vpack.c.bf16 %v312_v14, %v311_v12  ;;  %v7290_v20 = vld [vmem:[#allocation12 + $0x1ec] sm:$0xf0]  ;;  %vm308_vm2 = vcmask 58368   ;;  %vm4693_vm3 = vcmask 64512  }
  0x53   :  { %387 = vmatpush.bf16.msra.mxu2 %v5129_v9  ;;  %v5253_v18 = vor.u32 %v7258_v16, %v5252_v15  ;;  %v5380_v19 = vld [vmem:[#allocation12 + $0x1e0] sm:$0xf]  ;;  %401 = vmatpush.bf16.msra.mxu3 %v5133_v13  ;;  %v7254_v23 = vld [vmem:[#allocation12 + $0xcc] sm:$0xf0]  ;;  %vm5080_vm4 = vcmask 1041408   ;;  %vm5103_vm5 = vcmask 1024  }
  0x54   :  { %v5236_v21 = vld [vmem:[#allocation12 + $0xc0] sm:$0xf]  ;;  %v5381_v22 = vor.u32 %v7290_v20, %v5380_v19  ;;  %v7286_v25 = vld [vmem:[#allocation12 + $0x1cc] sm:$0xf0]  ;;  %5134 = vmatmul.msk.bf16.vlgmr.msra.gmra.mxu0 %vm348_vm0, %v313_v17 }
  0x55   :  { %v5364_v24 = vld [vmem:[#allocation12 + $0x1c0] sm:$0xf]  ;;  %v7322_v27 = vld [vmem:[#allocation12 + $0x2ec] sm:$0xf0]  ;;  %5135 = vmatmul.msk.bf16.vlgmr.msra.gmra.mxu1 %vm348_vm0, %v313_v17  ;;  %1198 = vmatpush.bf16.msrb.mxu0 %v5253_v18  ;;  %v5237_v31 = vor.u32 %v7254_v23, %v5236_v21 }
  0x56   :  { %v5508_v26 = vld [vmem:[#allocation12 + $0x2e0] sm:$0xf]  ;;  %5136 = vmatmul.msk.bf16.vlgmr.msra.gmra.mxu2 %vm348_vm0, %v313_v17  ;;  %v7354_v30 = vld [vmem:[#allocation12 + $0x3ec] sm:$0xf0]  ;;  %5137 = vmatmul.msk.bf16.vlgmr.msra.gmra.mxu3 %vm348_vm0, %v313_v17  ;;  %v5365_v36 = vor.u32 %v7286_v25, %v5364_v24 }
  0x57   :  { %v5636_v28 = vld [vmem:[#allocation12 + $0x3e0] sm:$0xf]  ;;  %v5509_v29 = vor.u32 %v7322_v27, %v5508_v26  ;;  %v7250_v34 = vld [vmem:[#allocation12 + $0xac] sm:$0xf0]  ;;  %1212 = vmatpush.bf16.msrb.mxu1 %v5381_v22 }
  0x58   :  { %v5637_v32 = vor.u32 %v7354_v30, %v5636_v28  ;;  %v5220_v33 = vld [vmem:[#allocation12 + $0xa0] sm:$0xf]  ;;  %v7318_v37 = vld [vmem:[#allocation12 + $0x2cc] sm:$0xf0] }
  0x59   :  { %v5492_v35 = vld [vmem:[#allocation12 + $0x2c0] sm:$0xf]  ;;  %1226 = vmatpush.bf16.msrb.mxu2 %v5509_v29  ;;  %v7350_v39 = vld [vmem:[#allocation12 + $0x3cc] sm:$0xf0]  ;;  %1199 = vmatpush.bf16.msrb.mxu0 %v5237_v31  ;;  %v5221_v46 = vor.u32 %v7250_v34, %v5220_v33 }
  0x5a   :  { %v5620_v38 = vld [vmem:[#allocation12 + $0x3c0] sm:$0xf]  ;;  %1240 = vmatpush.bf16.msrb.mxu3 %v5637_v32  ;;  %v7282_v41 = vld [vmem:[#allocation12 + $0x1ac] sm:$0xf0]  ;;  %v5493_v42 = vor.u32 %v7318_v37, %v5492_v35 }
  0x5b   :  { %v5348_v40 = vld [vmem:[#allocation12 + $0x1a0] sm:$0xf]  ;;  %v5621_v43 = vor.u32 %v7350_v39, %v5620_v38  ;;  %v7314_v45 = vld [vmem:[#allocation12 + $0x2ac] sm:$0xf0]  ;;  %1213 = vmatpush.bf16.msrb.mxu1 %v5365_v36  ;;  %v7256_v38 = vld [vmem:[#allocation12 + $0xe4] sm:$0xf] }
  0x5c   :  { %v5476_v44 = vld [vmem:[#allocation12 + $0x2a0] sm:$0xf]  ;;  %v7346_v48 = vld [vmem:[#allocation12 + $0x3ac] sm:$0xf0]  ;;  %v5349_v49 = vor.u32 %v7282_v41, %v5348_v40  ;;  %v5254_v40 = vld [vmem:[#allocation12 + $0xf0] sm:$0xf0] }
  0x5d   :  { %v5604_v47 = vld [vmem:[#allocation12 + $0x3a0] sm:$0xf]  ;;  %1227 = vmatpush.bf16.msrb.mxu2 %v5493_v42  ;;  %v7246_v51 = vld [vmem:[#allocation12 + $0x8c] sm:$0xf0]  ;;  %v5477_v53 = vor.u32 %v7314_v45, %v5476_v44  ;;  %1200 = vmatpush.bf16.msrb.mxu0 %v5221_v46  ;;  %v7288_v41 = vld [vmem:[#allocation12 + $0x1e4] sm:$0xf] }
  0x5e   :  { %v5204_v50 = vld [vmem:[#allocation12 + $0x80] sm:$0xf]  ;;  %1241 = vmatpush.bf16.msrb.mxu3 %v5621_v43  ;;  %v7278_v54 = vld [vmem:[#allocation12 + $0x18c] sm:$0xf0]  ;;  %v5605_v55 = vor.u32 %v7346_v48, %v5604_v47  ;;  %v5382_v42 = vld [vmem:[#allocation12 + $0x1f0] sm:$0xf0] }
  0x5f   :  { %v5332_v52 = vld [vmem:[#allocation12 + $0x180] sm:$0xf]  ;;  %v7310_v57 = vld [vmem:[#allocation12 + $0x28c] sm:$0xf0]  ;;  %v5205_v60 = vor.u32 %v7246_v51, %v5204_v50  ;;  %1214 = vmatpush.bf16.msrb.mxu1 %v5349_v49  ;;  %v7320_v49 = vld [vmem:[#allocation12 + $0x2e4] sm:$0xf] }
  0x60   :  { %v5460_v56 = vld [vmem:[#allocation12 + $0x280] sm:$0xf]  ;;  %v7342_v59 = vld [vmem:[#allocation12 + $0x38c] sm:$0xf0]  ;;  %v5333_v61 = vor.u32 %v7278_v54, %v5332_v52  ;;  %v5510_v50 = vld [vmem:[#allocation12 + $0x2f0] sm:$0xf0]  ;;  %v5257_v52 = vor.u32 %v7256_v38, %v5254_v40 }
  0x61   :  { %v5588_v58 = vld [vmem:[#allocation12 + $0x380] sm:$0xf]  ;;  %1228 = vmatpush.bf16.msrb.mxu2 %v5477_v53  ;;  %v7242_v63 = vld [vmem:[#allocation12 + $0x6c] sm:$0xf0]  ;;  %v5461_v1 = vor.u32 %v7310_v57, %v5460_v56  ;;  %1201 = vmatpush.bf16.msrb.mxu0 %v5205_v60  ;;  %v7352_v53 = vld [vmem:[#allocation12 + $0x3e4] sm:$0xf] }
  0x62   :  { %v5188_v62 = vld [vmem:[#allocation12 + $0x60] sm:$0xf]  ;;  %1242 = vmatpush.bf16.msrb.mxu3 %v5605_v55  ;;  %v7274_v2 = vld [vmem:[#allocation12 + $0x16c] sm:$0xf0]  ;;  %v5589_v3 = vor.u32 %v7342_v59, %v5588_v58  ;;  %v5638_v54 = vld [vmem:[#allocation12 + $0x3f0] sm:$0xf0]  ;;  %v5385_v55 = vor.u32 %v7288_v41, %v5382_v42 }
  0x63   :  { %v5316_v0 = vld [vmem:[#allocation12 + $0x160] sm:$0xf]  ;;  %v7306_v5 = vld [vmem:[#allocation12 + $0x26c] sm:$0xf0]  ;;  %v5189_v8 = vor.u32 %v7242_v63, %v5188_v62  ;;  %1215 = vmatpush.bf16.msrb.mxu1 %v5333_v61  ;;  %v7252_v56 = vld [vmem:[#allocation12 + $0xc4] sm:$0xf]  ;;  %v5513_v62 = vor.u32 %v7320_v49, %v5510_v50  ;;  %v5641_v63 = vor.u32 %v7352_v53, %v5638_v54 }
  0x64   :  { %v5444_v4 = vld [vmem:[#allocation12 + $0x260] sm:$0xf]  ;;  %v7338_v7 = vld [vmem:[#allocation12 + $0x36c] sm:$0xf0]  ;;  %v5317_v9 = vor.u32 %v7274_v2, %v5316_v0  ;;  %v5238_v57 = vld [vmem:[#allocation12 + $0xd0] sm:$0xf0] }
  0x65   :  { %v5572_v6 = vld [vmem:[#allocation12 + $0x360] sm:$0xf]  ;;  %1229 = vmatpush.bf16.msrb.mxu2 %v5461_v1  ;;  %v7238_v11 = vld [vmem:[#allocation12 + $0x4c] sm:$0xf0]  ;;  %v5445_v13 = vor.u32 %v7306_v5, %v5444_v4  ;;  %1202 = vmatpush.bf16.msrb.mxu0 %v5189_v8  ;;  %v7284_v59 = vld [vmem:[#allocation12 + $0x1c4] sm:$0xf]  ;;  %v5241_v2 = vor.u32 %v7252_v56, %v5238_v57 }
  0x66   :  { %v5172_v10 = vld [vmem:[#allocation12 + $0x40] sm:$0xf]  ;;  %1243 = vmatpush.bf16.msrb.mxu3 %v5589_v3  ;;  %v7270_v14 = vld [vmem:[#allocation12 + $0x14c] sm:$0xf0]  ;;  %v5573_v15 = vor.u32 %v7338_v7, %v5572_v6  ;;  %v5366_v60 = vld [vmem:[#allocation12 + $0x1d0] sm:$0xf0] }
  0x67   :  { %v5300_v12 = vld [vmem:[#allocation12 + $0x140] sm:$0xf]  ;;  %v7302_v17 = vld [vmem:[#allocation12 + $0x24c] sm:$0xf0]  ;;  %v5173_v20 = vor.u32 %v7238_v11, %v5172_v10  ;;  %1216 = vmatpush.bf16.msrb.mxu1 %v5317_v9  ;;  %v7316_v0 = vld [vmem:[#allocation12 + $0x2c4] sm:$0xf]  ;;  %v5369_v5 = vor.u32 %v7284_v59, %v5366_v60 }
  0x68   :  { %v5428_v16 = vld [vmem:[#allocation12 + $0x240] sm:$0xf]  ;;  %v7334_v19 = vld [vmem:[#allocation12 + $0x34c] sm:$0xf0]  ;;  %v5301_v21 = vor.u32 %v7270_v14, %v5300_v12  ;;  %v5494_v1 = vld [vmem:[#allocation12 + $0x2d0] sm:$0xf0] }
  0x69   :  { %v5556_v18 = vld [vmem:[#allocation12 + $0x340] sm:$0xf]  ;;  %1230 = vmatpush.bf16.msrb.mxu2 %v5445_v13  ;;  %v7234_v23 = vld [vmem:[#allocation12 + $0x2c] sm:$0xf0]  ;;  %v5429_v25 = vor.u32 %v7302_v17, %v5428_v16  ;;  %1203 = vmatpush.bf16.msrb.mxu0 %v5173_v20  ;;  %v7348_v3 = vld [vmem:[#allocation12 + $0x3c4] sm:$0xf]  ;;  %v5497_v10 = vor.u32 %v7316_v0, %v5494_v1 }
  0x6a   :  { %v5156_v22 = vld [vmem:[#allocation12 + $0x20] sm:$0xf]  ;;  %1244 = vmatpush.bf16.msrb.mxu3 %v5573_v15  ;;  %v7266_v26 = vld [vmem:[#allocation12 + $0x12c] sm:$0xf0]  ;;  %v5557_v27 = vor.u32 %v7334_v19, %v5556_v18  ;;  %v5622_v4 = vld [vmem:[#allocation12 + $0x3d0] sm:$0xf0] }
  0x6b   :  { %v5284_v24 = vld [vmem:[#allocation12 + $0x120] sm:$0xf]  ;;  %v7298_v29 = vld [vmem:[#allocation12 + $0x22c] sm:$0xf0]  ;;  %v5157_v32 = vor.u32 %v7234_v23, %v5156_v22  ;;  %1217 = vmatpush.bf16.msrb.mxu1 %v5301_v21  ;;  %v7248_v6 = vld [vmem:[#allocation12 + $0xa4] sm:$0xf]  ;;  %v5625_v11 = vor.u32 %v7348_v3, %v5622_v4 }
  0x6c   :  { %v5412_v28 = vld [vmem:[#allocation12 + $0x220] sm:$0xf]  ;;  %v7330_v31 = vld [vmem:[#allocation12 + $0x32c] sm:$0xf0]  ;;  %v5285_v35 = vor.u32 %v7266_v26, %v5284_v24  ;;  %v5222_v7 = vld [vmem:[#allocation12 + $0xb0] sm:$0xf0] }
  0x6d   :  { %v5540_v30 = vld [vmem:[#allocation12 + $0x320] sm:$0xf]  ;;  %v7230_v34 = vld [vmem:[#allocation12 + $0xc] sm:$0xf0]  ;;  %1231 = vmatpush.bf16.msrb.mxu2 %v5429_v25  ;;  %v5413_v39 = vor.u32 %v7298_v29, %v5412_v28  ;;  %1204 = vmatpush.bf16.msrb.mxu0 %v5157_v32  ;;  %v7280_v8 = vld [vmem:[#allocation12 + $0x1a4] sm:$0xf]  ;;  %v5225_v12 = vor.u32 %v7248_v6, %v5222_v7 }
  0x6e   :  { %v5140_v33 = vld [vmem:[#allocation12] sm:$0xf]  ;;  %v7262_v37 = vld [vmem:[#allocation12 + $0x10c] sm:$0xf0]  ;;  %1245 = vmatpush.bf16.msrb.mxu3 %v5557_v27  ;;  %v5541_v43 = vor.u32 %v7330_v31, %v5540_v30  ;;  %v5350_v9 = vld [vmem:[#allocation12 + $0x1b0] sm:$0xf0] }
  0x6f   :  { %v5268_v36 = vld [vmem:[#allocation12 + $0x100] sm:$0xf]  ;;  %v7294_v45 = vld [vmem:[#allocation12 + $0x20c] sm:$0xf0]  ;;  %v5141_v47 = vor.u32 %v7230_v34, %v5140_v33  ;;  %1218 = vmatpush.bf16.msrb.mxu1 %v5285_v35  ;;  %v5353_v13 = vor.u32 %v7280_v8, %v5350_v9  ;;  %v7244_v14 = vld [vmem:[#allocation12 + $0x84] sm:$0xf] }
  0x70   :  { %v5396_v44 = vld [vmem:[#allocation12 + $0x200] sm:$0xf]  ;;  %v7326_v48 = vld [vmem:[#allocation12 + $0x30c] sm:$0xf0]  ;;  %v5269_v51 = vor.u32 %v7262_v37, %v5268_v36  ;;  %v5206_v15 = vld [vmem:[#allocation12 + $0x90] sm:$0xf0] }
  0x71   :  { %v5524_v46 = vld [vmem:[#allocation12 + $0x300] sm:$0xf]  ;;  %1232 = vmatpush.bf16.msrb.mxu2 %v5413_v39  ;;  %v5397_v58 = vor.u32 %v7294_v45, %v5396_v44  ;;  %1205 = vmatpush.bf16.msrb.mxu0 %v5141_v47  ;;  %v7276_v16 = vld [vmem:[#allocation12 + $0x184] sm:$0xf]  ;;  %v5334_v17 = vld [vmem:[#allocation12 + $0x190] sm:$0xf0]  ;;  %v5209_v18 = vor.u32 %v7244_v14, %v5206_v15 }
  0x72   :  { %1246 = vmatpush.bf16.msrb.mxu3 %v5541_v43  ;;  %v5525_v61 = vor.u32 %v7326_v48, %v5524_v46  ;;  %v5337_v19 = vor.u32 %v7276_v16, %v5334_v17  ;;  %v7312_v20 = vld [vmem:[#allocation12 + $0x2a4] sm:$0xf]  ;;  %v5478_v21 = vld [vmem:[#allocation12 + $0x2b0] sm:$0xf0]  ;;  %v318_v16 = vld [vmem:[#allocation10] sm:$0xf] }
  0x73   :  { %1219 = vmatpush.bf16.msrb.mxu1 %v5269_v51  ;;  %v7344_v22 = vld [vmem:[#allocation12 + $0x3a4] sm:$0xf]  ;;  %v5481_v23 = vor.u32 %v7312_v20, %v5478_v21  ;;  %v5606_v24 = vld [vmem:[#allocation12 + $0x3b0] sm:$0xf0]  ;;  %v321_v20 = vperm.slane %v318_v16, 1 }
  0x74   :  { %v5609_v25 = vor.u32 %v7344_v22, %v5606_v24  ;;  %v7240_v26 = vld [vmem:[#allocation12 + $0x64] sm:$0xf]  ;;  %v5190_v27 = vld [vmem:[#allocation12 + $0x70] sm:$0xf0] }
  0x75   :  { %1254 = vmatpush.bf16.msra.mxu0 %v5257_v52  ;;  %1233 = vmatpush.bf16.msrb.mxu2 %v5397_v58  ;;  %v7272_v28 = vld [vmem:[#allocation12 + $0x164] sm:$0xf]  ;;  %v5193_v29 = vor.u32 %v7240_v26, %v5190_v27  ;;  %v5318_v30 = vld [vmem:[#allocation12 + $0x170] sm:$0xf0] }
  0x76   :  { %1247 = vmatpush.bf16.msrb.mxu3 %v5525_v61  ;;  %v5321_v31 = vor.u32 %v7272_v28, %v5318_v30  ;;  %v7308_v32 = vld [vmem:[#allocation12 + $0x284] sm:$0xf]  ;;  %v5462_v33 = vld [vmem:[#allocation12 + $0x290] sm:$0xf0]  ;;  %v7259_v30 = vld [vmem:[#allocation12 + $0xf4] sm:$0xf0] }
  0x77   :  { %1268 = vmatpush.bf16.msra.mxu1 %v5385_v55  ;;  %v5465_v34 = vor.u32 %v7308_v32, %v5462_v33  ;;  %v7340_v35 = vld [vmem:[#allocation12 + $0x384] sm:$0xf]  ;;  %v5590_v36 = vld [vmem:[#allocation12 + $0x390] sm:$0xf0]  ;;  %v322_v32 = vperm.slane %v318_v16, 2 }
  0x78   :  { %v5593_v37 = vor.u32 %v7340_v35, %v5590_v36  ;;  %v7236_v38 = vld [vmem:[#allocation12 + $0x44] sm:$0xf]  ;;  %v5174_v39 = vld [vmem:[#allocation12 + $0x50] sm:$0xf0]  ;;  %v7291_v35 = vld [vmem:[#allocation12 + $0x1f4] sm:$0xf0] }
  0x79   :  { %1282 = vmatpush.bf16.msra.mxu2 %v5513_v62  ;;  %1255 = vmatpush.bf16.msra.mxu0 %v5241_v2  ;;  %v7268_v40 = vld [vmem:[#allocation12 + $0x144] sm:$0xf]  ;;  %v5177_v41 = vor.u32 %v7236_v38, %v5174_v39  ;;  %v5302_v42 = vld [vmem:[#allocation12 + $0x150] sm:$0xf0]  ;;  %v323_v36 = vperm.slane %v318_v16, 3 }
  0x7a   :  { %1296 = vmatpush.bf16.msra.mxu3 %v5641_v63  ;;  %v5305_v43 = vor.u32 %v7268_v40, %v5302_v42  ;;  %v7304_v44 = vld [vmem:[#allocation12 + $0x264] sm:$0xf]  ;;  %v5446_v45 = vld [vmem:[#allocation12 + $0x270] sm:$0xf0]  ;;  %v5244_v42 = vld [vmem:[#allocation12 + $0xc8] sm:$0xf] }
  0x7b   :  { %1269 = vmatpush.bf16.msra.mxu1 %v5369_v5  ;;  %v7336_v46 = vld [vmem:[#allocation12 + $0x364] sm:$0xf]  ;;  %v5449_v47 = vor.u32 %v7304_v44, %v5446_v45  ;;  %v5574_v48 = vld [vmem:[#allocation12 + $0x370] sm:$0xf0] }
  0x7c   :  { %v5577_v49 = vor.u32 %v7336_v46, %v5574_v48  ;;  %v7232_v50 = vld [vmem:[#allocation12 + $0x24] sm:$0xf]  ;;  %v5158_v51 = vld [vmem:[#allocation12 + $0x30] sm:$0xf0]  ;;  %v5372_v46 = vld [vmem:[#allocation12 + $0x1c8] sm:$0xf] }
  0x7d   :  { %1283 = vmatpush.bf16.msra.mxu2 %v5497_v10  ;;  %1256 = vmatpush.bf16.msra.mxu0 %v5225_v12  ;;  %v5161_v52 = vor.u32 %v7232_v50, %v5158_v51  ;;  %v7264_v53 = vld [vmem:[#allocation12 + $0x124] sm:$0xf]  ;;  %v5286_v54 = vld [vmem:[#allocation12 + $0x130] sm:$0xf0] }
  0x7e   :  { %1297 = vmatpush.bf16.msra.mxu3 %v5625_v11  ;;  %v5289_v55 = vor.u32 %v7264_v53, %v5286_v54  ;;  %v7300_v56 = vld [vmem:[#allocation12 + $0x244] sm:$0xf]  ;;  %v5430_v57 = vld [vmem:[#allocation12 + $0x250] sm:$0xf0]  ;;  %v5516_v53 = vld [vmem:[#allocation12 + $0x2e8] sm:$0xf] }
  0x7f   :  { %1270 = vmatpush.bf16.msra.mxu1 %v5353_v13  ;;  %v7332_v58 = vld [vmem:[#allocation12 + $0x344] sm:$0xf]  ;;  %v5433_v59 = vor.u32 %v7300_v56, %v5430_v57  ;;  %v5558_v60 = vld [vmem:[#allocation12 + $0x350] sm:$0xf0]  ;;  %v7323_v54 = vld [vmem:[#allocation12 + $0x2f4] sm:$0xf0] }
  0x80   :  { %v5561_v61 = vor.u32 %v7332_v58, %v5558_v60  ;;  %v7228_v62 = vld [vmem:[#allocation12 + $0x4] sm:$0xf]  ;;  %v5142_v63 = vld [vmem:[#allocation12 + $0x10] sm:$0xf0]  ;;  %v7355_v58 = vld [vmem:[#allocation12 + $0x3f4] sm:$0xf0] }
  0x81   :  { %1257 = vmatpush.bf16.msra.mxu0 %v5209_v18  ;;  %1284 = vmatpush.bf16.msra.mxu2 %v5481_v23  ;;  %v7260_v0 = vld [vmem:[#allocation12 + $0x104] sm:$0xf]  ;;  %v5145_v1 = vor.u32 %v7228_v62, %v5142_v63  ;;  %v5270_v2 = vld [vmem:[#allocation12 + $0x110] sm:$0xf0]  ;;  %v320_v18 = vperm.slane %v318_v16, 0 }
  0x82   :  { %1298 = vmatpush.bf16.msra.mxu3 %v5609_v25  ;;  %v5273_v3 = vor.u32 %v7260_v0, %v5270_v2  ;;  %v7296_v4 = vld [vmem:[#allocation12 + $0x224] sm:$0xf]  ;;  %v5414_v5 = vld [vmem:[#allocation12 + $0x230] sm:$0xf0]  ;;  %v7251_v60 = vld [vmem:[#allocation12 + $0xb4] sm:$0xf0] }
  0x83   :  { %1271 = vmatpush.bf16.msra.mxu1 %v5337_v19  ;;  %v7328_v6 = vld [vmem:[#allocation12 + $0x324] sm:$0xf]  ;;  %v5542_v7 = vld [vmem:[#allocation12 + $0x330] sm:$0xf0]  ;;  %v5417_v8 = vor.u32 %v7296_v4, %v5414_v5  ;;  %v5356_v63 = vld [vmem:[#allocation12 + $0x1a8] sm:$0xf] }
  0x84   :  { %v5545_v9 = vor.u32 %v7328_v6, %v5542_v7  ;;  %v7292_v10 = vld [vmem:[#allocation12 + $0x204] sm:$0xf]  ;;  %v5398_v11 = vld [vmem:[#allocation12 + $0x210] sm:$0xf0]  ;;  %v7283_v0 = vld [vmem:[#allocation12 + $0x1b4] sm:$0xf0] }
  0x85   :  { %1258 = vmatpush.bf16.msra.mxu0 %v5193_v29  ;;  %1285 = vmatpush.bf16.msra.mxu2 %v5465_v34  ;;  %v5401_v12 = vor.u32 %v7292_v10, %v5398_v11  ;;  %v7324_v13 = vld [vmem:[#allocation12 + $0x304] sm:$0xf]  ;;  %v5526_v14 = vld [vmem:[#allocation12 + $0x310] sm:$0xf0]  ;;  %v5260_v29 = vld [vmem:[#allocation12 + $0xe8] sm:$0xf]  ;;  %v5357_v11 = vor.u32 %v7283_v0, %v5356_v63 }
  0x86   :  { %1299 = vmatpush.bf16.msra.mxu3 %v5593_v37  ;;  %v5529_v15 = vor.u32 %v7324_v13, %v5526_v14  ;;  %v5388_v34 = vld [vmem:[#allocation12 + $0x1e8] sm:$0xf]  ;;  %v5261_v39 = vor.u32 %v7259_v30, %v5260_v29  ;;  %v7247_v14 = vld [vmem:[#allocation12 + $0x94] sm:$0xf0] }
  0x87   :  { %1272 = vmatpush.bf16.msra.mxu1 %v5321_v31  ;;  %v5500_v7 = vld [vmem:[#allocation12 + $0x2c8] sm:$0xf]  ;;  %v7279_v16 = vld [vmem:[#allocation12 + $0x194] sm:$0xf0] }
  0x88   :  { %v5212_v13 = vld [vmem:[#allocation12 + $0x88] sm:$0xf]  ;;  %v7231_v0 = vld [vmem:[#allocation12 + $0x14] sm:$0xf0] }
  0x89   :  { %1259 = vmatpush.bf16.msra.mxu0 %v5177_v41  ;;  %1286 = vmatpush.bf16.msra.mxu2 %v5449_v47  ;;  %v5389_v41 = vor.u32 %v7291_v35, %v5388_v34  ;;  %v7287_v47 = vld [vmem:[#allocation12 + $0x1d4] sm:$0xf0]  ;;  %v5596_v35 = vld [vmem:[#allocation12 + $0x388] sm:$0xf] }
  0x8a   :  { %1300 = vmatpush.bf16.msra.mxu3 %v5577_v49  ;;  %v5373_v57 = vor.u32 %v7287_v47, %v5372_v46  ;;  %v7307_v46 = vld [vmem:[#allocation12 + $0x274] sm:$0xf0]  ;;  %v5148_v63 = vld [vmem:[#allocation12 + $0x8] sm:$0xf] }
  0x8b   :  { %1273 = vmatpush.bf16.msra.mxu1 %v5305_v43  ;;  %v7255_v43 = vld [vmem:[#allocation12 + $0xd4] sm:$0xf0] }
  0x8d   :  { %1260 = vmatpush.bf16.msra.mxu0 %v5161_v52  ;;  %1287 = vmatpush.bf16.msra.mxu2 %v5433_v59  ;;  %v5245_v52 = vor.u32 %v7255_v43, %v5244_v42  ;;  %v5228_v59 = vld [vmem:[#allocation12 + $0xa8] sm:$0xf] }
  0x8e   :  { %1301 = vmatpush.bf16.msra.mxu3 %v5561_v61  ;;  %v5229_v6 = vor.u32 %v7251_v60, %v5228_v59  ;;  %v5564_v59 = vld [vmem:[#allocation12 + $0x348] sm:$0xf] }
  0x8f   :  { %1274 = vmatpush.bf16.msra.mxu1 %v5289_v55  ;;  %v5644_v55 = vld [vmem:[#allocation12 + $0x3e8] sm:$0xf] }
  0x90   :  { %v5645_v5 = vor.u32 %v7355_v58, %v5644_v55  ;;  %v7303_v58 = vld [vmem:[#allocation12 + $0x254] sm:$0xf0] }
  0x91   :  { %1261 = vmatpush.bf16.msra.mxu0 %v5145_v1  ;;  %1288 = vmatpush.bf16.msra.mxu2 %v5417_v8  ;;  %v7319_v8 = vld [vmem:[#allocation12 + $0x2d4] sm:$0xf0] }
  0x92   :  { %1302 = vmatpush.bf16.msra.mxu3 %v5545_v9  ;;  %v5628_v9 = vld [vmem:[#allocation12 + $0x3c8] sm:$0xf] }
  0x93   :  { %1275 = vmatpush.bf16.msra.mxu1 %v5273_v3  ;;  %v5517_v3 = vor.u32 %v7323_v54, %v5516_v53  ;;  %v5292_v53 = vld [vmem:[#allocation12 + $0x128] sm:$0xf]  ;;  %v7267_v54 = vld [vmem:[#allocation12 + $0x134] sm:$0xf0] }
  0x95   :  { %1289 = vmatpush.bf16.msra.mxu2 %v5401_v12  ;;  %v7351_v12 = vld [vmem:[#allocation12 + $0x3d4] sm:$0xf0] }
  0x96   :  { %1303 = vmatpush.bf16.msra.mxu3 %v5529_v15  ;;  %v5340_v15 = vld [vmem:[#allocation12 + $0x188] sm:$0xf] }
  0xd1   :  { %v361_v17 = vpop.f32.mrf.mxu0 }
  0xd2   :  { %v375_v19 = vpop.f32.mrf.mxu1  ;;  %v362_v21 = vadd.f32 %v361_v17, %v320_v18  ;;  %v5501_v17 = vor.u32 %v7319_v8, %v5500_v7  ;;  %v7289_v7 = vld [vmem:[#allocation12 + $0x1ec] sm:$0xf]  ;;  %v5390_v8 = vld [vmem:[#allocation12 + $0x1f8] sm:$0xf0] }
  0xd3   :  { %v376_v22 = vadd.f32 %v375_v19, %v321_v20  ;;  %v5213_v19 = vor.u32 %v7247_v14, %v5212_v13  ;;  %v5149_v13 = vor.u32 %v7231_v0, %v5148_v63  ;;  %v7241_v63 = vld [vmem:[#allocation12 + $0x6c] sm:$0xf]  ;;  %v5198_v0 = vld [vmem:[#allocation12 + $0x78] sm:$0xf0] }
  0xd4   :  { %v408_v26 = vmax.f32 %v362_v21, 0.0  ;;  %v7315_v21 = vld [vmem:[#allocation12 + $0x2b4] sm:$0xf0] }
  0xd5   :  { %v409_v31 = vmax.f32 %v376_v22, 0.0  ;;  %v5341_v22 = vor.u32 %v7279_v16, %v5340_v15  ;;  %v5548_v15 = vld [vmem:[#allocation12 + $0x328] sm:$0xf]  ;;  %v7331_v16 = vld [vmem:[#allocation12 + $0x334] sm:$0xf0] }
  0xd9   :  { %v389_v23 = vpop.f32.mrf.mxu2  ;;  %v403_v24 = vpop.f32.mrf.mxu3 }
  0xda   :  { %v363_v25 = vpop.f32.mrf.mxu0  ;;  %v377_v28 = vpop.f32.mrf.mxu1  ;;  %v390_v44 = vadd.f32 %v389_v23, %v322_v32  ;;  %v404_v48 = vadd.f32 %v403_v24, %v323_v36  ;;  %v5612_v23 = vld [vmem:[#allocation12 + $0x3a8] sm:$0xf]  ;;  %v7347_v24 = vld [vmem:[#allocation12 + $0x3b4] sm:$0xf0] }
  0xdb   :  { %v364_v27 = vadd.f32 %v363_v25, %v320_v18  ;;  %v378_v33 = vadd.f32 %v377_v28, %v321_v20  ;;  %v5629_v18 = vor.u32 %v7351_v12, %v5628_v9  ;;  %v5484_v20 = vld [vmem:[#allocation12 + $0x2a8] sm:$0xf]  ;;  %v7275_v28 = vld [vmem:[#allocation12 + $0x174] sm:$0xf0]  ;;  %v5613_v30 = vor.u32 %v7347_v24, %v5612_v23  ;;  %v5374_v23 = vld [vmem:[#allocation12 + $0x1d8] sm:$0xf0] }
  0xdc   :  { %v410_v61 = vmax.f32 %v390_v44, 0.0  ;;  %v411_v1 = vmax.f32 %v404_v48, 0.0  ;;  %v5196_v25 = vld [vmem:[#allocation12 + $0x68] sm:$0xf]  ;;  %v5485_v29 = vor.u32 %v7315_v21, %v5484_v20  ;;  %v7299_v12 = vld [vmem:[#allocation12 + $0x234] sm:$0xf0]  ;;  %v5549_v24 = vor.u32 %v7331_v16, %v5548_v15 }
  0xdd   :  { %v412_v37 = vmax.f32 %v364_v27, 0.0  ;;  %v413_v38 = vmax.f32 %v378_v33, 0.0  ;;  %v5324_v27 = vld [vmem:[#allocation12 + $0x168] sm:$0xf]  ;;  %v5246_v21 = vld [vmem:[#allocation12 + $0xd8] sm:$0xf0] }
  0xde   :  { %v5325_v34 = vor.u32 %v7275_v28, %v5324_v27  ;;  %v5452_v44 = vld [vmem:[#allocation12 + $0x268] sm:$0xf]  ;;  %v7327_v28 = vld [vmem:[#allocation12 + $0x314] sm:$0xf0]  ;;  %v7269_v15 = vld [vmem:[#allocation12 + $0x14c] sm:$0xf] }
  0xdf   :  { %v8378_v40 = vpack.c.bf16 %v412_v37, %v408_v26  ;;  %v8380_v45 = vpack.c.bf16 %v413_v38, %v409_v31  ;;  %v7243_v26 = vld [vmem:[#allocation12 + $0x74] sm:$0xf0]  ;;  %v5468_v31 = vld [vmem:[#allocation12 + $0x288] sm:$0xf]  ;;  %v5453_v55 = vor.u32 %v7307_v46, %v5452_v44  ;;  %v7317_v44 = vld [vmem:[#allocation12 + $0x2cc] sm:$0xf] }
  0xe0   :  { %v5197_v33 = vor.u32 %v7243_v26, %v5196_v25  ;;  %v5180_v37 = vld [vmem:[#allocation12 + $0x48] sm:$0xf]  ;;  %v7239_v38 = vld [vmem:[#allocation12 + $0x54] sm:$0xf0]  ;;  %v5502_v46 = vld [vmem:[#allocation12 + $0x2d8] sm:$0xf0] }
  0xe1   :  { %v391_v49 = vpop.f32.mrf.mxu2  ;;  %1206 = vmatmul.bf16.vlgmr.msrb.gmra.mxu0 %v8378_v40  ;;  %v405_v51 = vpop.f32.mrf.mxu3  ;;  %1220 = vmatmul.bf16.vlgmr.msrb.gmra.mxu1 %v8380_v45  ;;  %v5181_v47 = vor.u32 %v7239_v38, %v5180_v37  ;;  %v5404_v25 = vld [vmem:[#allocation12 + $0x208] sm:$0xf]  ;;  %v7295_v26 = vld [vmem:[#allocation12 + $0x214] sm:$0xf0]  ;;  %v5230_v37 = vld [vmem:[#allocation12 + $0xb8] sm:$0xf0] }
  0xe2   :  { %v392_v50 = vadd.f32 %v391_v49, %v322_v32  ;;  %1310 = vmatpush.bf16.msrb.mxu0 %v5261_v39  ;;  %v406_v56 = vadd.f32 %v405_v51, %v323_v36  ;;  %1324 = vmatpush.bf16.msrb.mxu1 %v5389_v41  ;;  %v7311_v32 = vld [vmem:[#allocation12 + $0x294] sm:$0xf0]  ;;  %v5308_v39 = vld [vmem:[#allocation12 + $0x148] sm:$0xf]  ;;  %v7281_v38 = vld [vmem:[#allocation12 + $0x1ac] sm:$0xf] }
  0xe3   :  { %v7343_v36 = vld [vmem:[#allocation12 + $0x394] sm:$0xf0]  ;;  %v5469_v42 = vor.u32 %v7311_v32, %v5468_v31  ;;  %v5580_v49 = vld [vmem:[#allocation12 + $0x368] sm:$0xf]  ;;  %v5310_v16 = vld [vmem:[#allocation12 + $0x158] sm:$0xf0] }
  0xe4   :  { %v414_v62 = vmax.f32 %v392_v50, 0.0  ;;  %v415_v2 = vmax.f32 %v406_v56, 0.0  ;;  %v7271_v41 = vld [vmem:[#allocation12 + $0x154] sm:$0xf0]  ;;  %v5597_v43 = vor.u32 %v7343_v36, %v5596_v35  ;;  %v5164_v51 = vld [vmem:[#allocation12 + $0x28] sm:$0xf]  ;;  %v5405_v36 = vor.u32 %v7295_v26, %v5404_v25 }
  0xe5   :  { %v5309_v48 = vor.u32 %v7271_v41, %v5308_v39  ;;  %v7339_v50 = vld [vmem:[#allocation12 + $0x374] sm:$0xf0]  ;;  %v5532_v27 = vld [vmem:[#allocation12 + $0x308] sm:$0xf]  ;;  %v7249_v35 = vld [vmem:[#allocation12 + $0xac] sm:$0xf] }
  0xe6   :  { %v8384_v4 = vpack.c.bf16 %v414_v62, %v410_v61  ;;  %1311 = vmatpush.bf16.msrb.mxu0 %v5245_v52  ;;  %v8386_v10 = vpack.c.bf16 %v415_v2, %v411_v1  ;;  %1325 = vmatpush.bf16.msrb.mxu1 %v5373_v57  ;;  %v7235_v52 = vld [vmem:[#allocation12 + $0x34] sm:$0xf0]  ;;  %v5581_v56 = vor.u32 %v7339_v50, %v5580_v49  ;;  %v5436_v57 = vld [vmem:[#allocation12 + $0x248] sm:$0xf]  ;;  %v5358_v39 = vld [vmem:[#allocation12 + $0x1b8] sm:$0xf0] }
  0xe7   :  { %v5165_v60 = vor.u32 %v7235_v52, %v5164_v51  ;;  %v5293_v61 = vor.u32 %v7267_v54, %v5292_v53  ;;  %v7335_v62 = vld [vmem:[#allocation12 + $0x354] sm:$0xf0]  ;;  %v5276_v1 = vld [vmem:[#allocation12 + $0x108] sm:$0xf]  ;;  %v5533_v41 = vor.u32 %v7327_v28, %v5532_v27  ;;  %v7349_v49 = vld [vmem:[#allocation12 + $0x3cc] sm:$0xf] }
  0xe8   :  { %1234 = vmatmul.bf16.vlgmr.msrb.gmra.mxu2 %v8384_v4  ;;  %1248 = vmatmul.bf16.vlgmr.msrb.gmra.mxu3 %v8386_v10  ;;  %v7263_v2 = vld [vmem:[#allocation12 + $0x114] sm:$0xf0]  ;;  %v5565_v9 = vor.u32 %v7335_v62, %v5564_v59  ;;  %v5630_v50 = vld [vmem:[#allocation12 + $0x3d8] sm:$0xf0]  ;;  %v7245_v51 = vld [vmem:[#allocation12 + $0x8c] sm:$0xf] }
  0xe9   :  { %1338 = vmatpush.bf16.msrb.mxu2 %v5517_v3  ;;  %1352 = vmatpush.bf16.msrb.mxu3 %v5645_v5  ;;  %v7257_v3 = vld [vmem:[#allocation12 + $0xec] sm:$0xf]  ;;  %v5437_v5 = vor.u32 %v7303_v58, %v5436_v57  ;;  %v5277_v14 = vor.u32 %v7263_v2, %v5276_v1  ;;  %v5214_v52 = vld [vmem:[#allocation12 + $0x98] sm:$0xf0] }
  0xea   :  { %1312 = vmatpush.bf16.msrb.mxu0 %v5229_v6  ;;  %1326 = vmatpush.bf16.msrb.mxu1 %v5357_v11  ;;  %v5262_v6 = vld [vmem:[#allocation12 + $0xf8] sm:$0xf0]  ;;  %v5420_v11 = vld [vmem:[#allocation12 + $0x228] sm:$0xf]  ;;  %v7277_v53 = vld [vmem:[#allocation12 + $0x18c] sm:$0xf]  ;;  %v5217_v59 = vor.u32 %v7245_v51, %v5214_v52 }
  0xeb   :  { %v5421_v20 = vor.u32 %v7299_v12, %v5420_v11  ;;  %v5342_v54 = vld [vmem:[#allocation12 + $0x198] sm:$0xf0]  ;;  %v7313_v57 = vld [vmem:[#allocation12 + $0x2ac] sm:$0xf] }
  0xec   :  { %v5486_v58 = vld [vmem:[#allocation12 + $0x2b8] sm:$0xf0]  ;;  %v7273_v1 = vld [vmem:[#allocation12 + $0x16c] sm:$0xf] }
  0xed   :  { %1339 = vmatpush.bf16.msrb.mxu2 %v5501_v17  ;;  %1353 = vmatpush.bf16.msrb.mxu3 %v5629_v18  ;;  %v5265_v17 = vor.u32 %v7257_v3, %v5262_v6  ;;  %v5393_v18 = vor.u32 %v7289_v7, %v5390_v8  ;;  %v5614_v62 = vld [vmem:[#allocation12 + $0x3b8] sm:$0xf0]  ;;  %v5489_v3 = vor.u32 %v7313_v57, %v5486_v58  ;;  %v7309_v6 = vld [vmem:[#allocation12 + $0x28c] sm:$0xf] }
  0xee   :  { %1313 = vmatpush.bf16.msrb.mxu0 %v5213_v19  ;;  %1327 = vmatpush.bf16.msrb.mxu1 %v5341_v22  ;;  %v7253_v19 = vld [vmem:[#allocation12 + $0xcc] sm:$0xf]  ;;  %v5326_v2 = vld [vmem:[#allocation12 + $0x178] sm:$0xf0]  ;;  %v5201_v8 = vor.u32 %v7241_v63, %v5198_v0 }
  0xef   :  { %v7285_v22 = vld [vmem:[#allocation12 + $0x1cc] sm:$0xf]  ;;  %v5249_v31 = vor.u32 %v7253_v19, %v5246_v21  ;;  %v5470_v7 = vld [vmem:[#allocation12 + $0x298] sm:$0xf0] }
  0xf0   :  { %v5377_v32 = vor.u32 %v7285_v22, %v5374_v23  ;;  %v7341_v11 = vld [vmem:[#allocation12 + $0x38c] sm:$0xf]  ;;  %v5598_v12 = vld [vmem:[#allocation12 + $0x398] sm:$0xf0]  ;;  %v5313_v22 = vor.u32 %v7269_v15, %v5310_v16  ;;  %v7374_v15 = vld [vmem:[#allocation15 + $0x8c] sm:$0xf0] }
  0xf1   :  { %1340 = vmatpush.bf16.msrb.mxu2 %v5485_v29  ;;  %1262 = vmatmul.bf16.vlgmr.msra.gmra.mxu0 %v8378_v40  ;;  %v7321_v29 = vld [vmem:[#allocation12 + $0x2ec] sm:$0xf]  ;;  %v5166_v26 = vld [vmem:[#allocation12 + $0x38] sm:$0xf0] }
  0xf2   :  { %1354 = vmatpush.bf16.msrb.mxu3 %v5613_v30  ;;  %1276 = vmatmul.bf16.vlgmr.msra.gmra.mxu1 %v8380_v45  ;;  %v5518_v30 = vld [vmem:[#allocation12 + $0x2f8] sm:$0xf0]  ;;  %v7305_v19 = vld [vmem:[#allocation12 + $0x26c] sm:$0xf] }
  0xf3   :  { %1314 = vmatpush.bf16.msrb.mxu0 %v5197_v33  ;;  %1328 = vmatpush.bf16.msrb.mxu1 %v5325_v34  ;;  %v7353_v33 = vld [vmem:[#allocation12 + $0x3ec] sm:$0xf]  ;;  %v5646_v34 = vld [vmem:[#allocation12 + $0x3f8] sm:$0xf0] }
  0xf4   :  { %v7337_v23 = vld [vmem:[#allocation12 + $0x36c] sm:$0xf]  ;;  %v5294_v28 = vld [vmem:[#allocation12 + $0x138] sm:$0xf0] }
  0xf5   :  { %1341 = vmatpush.bf16.msrb.mxu2 %v5469_v42  ;;  %v5521_v42 = vor.u32 %v7321_v29, %v5518_v30  ;;  %v7233_v25 = vld [vmem:[#allocation12 + $0x2c] sm:$0xf]  ;;  %v5406_v0 = vld [vmem:[#allocation12 + $0x218] sm:$0xf0] }
  0xf6   :  { %1355 = vmatpush.bf16.msrb.mxu3 %v5597_v43  ;;  %v5649_v43 = vor.u32 %v7353_v33, %v5646_v34  ;;  %v7265_v27 = vld [vmem:[#allocation12 + $0x12c] sm:$0xf]  ;;  %v5169_v34 = vor.u32 %v7233_v25, %v5166_v26  ;;  %v5668_v25 = vld [vmem:[#allocation15 + $0x20] sm:$0xf]  ;;  %v7362_v26 = vld [vmem:[#allocation15 + $0x2c] sm:$0xf0] }
  0xf7   :  { %1315 = vmatpush.bf16.msrb.mxu0 %v5181_v47  ;;  %1329 = vmatpush.bf16.msrb.mxu1 %v5309_v48  ;;  %v5233_v47 = vor.u32 %v7249_v35, %v5230_v37  ;;  %v5361_v48 = vor.u32 %v7281_v38, %v5358_v39  ;;  %v7333_v33 = vld [vmem:[#allocation12 + $0x34c] sm:$0xf]  ;;  %v5297_v35 = vor.u32 %v7265_v27, %v5294_v28  ;;  %v5150_v38 = vld [vmem:[#allocation12 + $0x18] sm:$0xf0]  ;;  %v7358_v28 = vld [vmem:[#allocation15 + $0xc] sm:$0xf0] }
  0xf8   :  { %1290 = vmatmul.bf16.vlgmr.msra.gmra.mxu2 %v8384_v4  ;;  %1304 = vmatmul.bf16.vlgmr.msra.gmra.mxu3 %v8386_v10  ;;  %v7229_v37 = vld [vmem:[#allocation12 + $0xc] sm:$0xf]  ;;  %v5669_v27 = vor.u32 %v7362_v26, %v5668_v25  ;;  %v5862_v25 = vld [vmem:[#allocation15 + $0x1b0] sm:$0xf0] }
  0xf9   :  { %1342 = vmatpush.bf16.msrb.mxu2 %v5453_v55  ;;  %v5505_v55 = vor.u32 %v7317_v44, %v5502_v46  ;;  %v7261_v39 = vld [vmem:[#allocation12 + $0x10c] sm:$0xf]  ;;  %v7386_v44 = vld [vmem:[#allocation15 + $0xec] sm:$0xf0]  ;;  %v5892_v46 = vld [vmem:[#allocation15 + $0x1e0] sm:$0xf]  ;;  %v5153_v51 = vor.u32 %v7229_v37, %v5150_v38 }
  0xfa   :  { %1356 = vmatpush.bf16.msrb.mxu3 %v5581_v56  ;;  %v5633_v56 = vor.u32 %v7349_v49, %v5630_v50  ;;  %v7297_v49 = vld [vmem:[#allocation12 + $0x22c] sm:$0xf]  ;;  %v5422_v50 = vld [vmem:[#allocation12 + $0x238] sm:$0xf0]  ;;  %v7380_v37 = vld [vmem:[#allocation15 + $0xc4] sm:$0xf] }
  0xfb   :  { %1316 = vmatpush.bf16.msrb.mxu0 %v5165_v60  ;;  %1330 = vmatpush.bf16.msrb.mxu1 %v5293_v61  ;;  %v5345_v60 = vor.u32 %v7277_v53, %v5342_v54  ;;  %v7345_v61 = vld [vmem:[#allocation12 + $0x3ac] sm:$0xf]  ;;  %v5550_v54 = vld [vmem:[#allocation12 + $0x338] sm:$0xf0]  ;;  %v5425_v58 = vor.u32 %v7297_v49, %v5422_v50  ;;  %v5750_v38 = vld [vmem:[#allocation15 + $0xd0] sm:$0xf0] }
  0xfc   :  { %v7329_v53 = vld [vmem:[#allocation12 + $0x32c] sm:$0xf]  ;;  %v7376_v49 = vld [vmem:[#allocation15 + $0xa4] sm:$0xf]  ;;  %v5734_v50 = vld [vmem:[#allocation15 + $0xb0] sm:$0xf0] }
  0xfd   :  { %1343 = vmatpush.bf16.msrb.mxu2 %v5437_v5  ;;  %v5617_v5 = vor.u32 %v7345_v61, %v5614_v62  ;;  %v7414_v61 = vld [vmem:[#allocation15 + $0x1cc] sm:$0xf0]  ;;  %v5553_v62 = vor.u32 %v7329_v53, %v5550_v54  ;;  %v7293_v63 = vld [vmem:[#allocation12 + $0x20c] sm:$0xf]  ;;  %v5988_v54 = vld [vmem:[#allocation15 + $0x2a0] sm:$0xf] }
  0xfe   :  { %1357 = vmatpush.bf16.msrb.mxu3 %v5565_v9  ;;  %v5329_v9 = vor.u32 %v7273_v1, %v5326_v2  ;;  %v7325_v1 = vld [vmem:[#allocation12 + $0x30c] sm:$0xf]  ;;  %v5534_v2 = vld [vmem:[#allocation12 + $0x318] sm:$0xf0]  ;;  %v7394_v53 = vld [vmem:[#allocation15 + $0x12c] sm:$0xf0] }
  0xff   :  { %1317 = vmatpush.bf16.msrb.mxu0 %v5149_v13  ;;  %1331 = vmatpush.bf16.msrb.mxu1 %v5277_v14  ;;  %v7237_v13 = vld [vmem:[#allocation12 + $0x4c] sm:$0xf]  ;;  %v5182_v14 = vld [vmem:[#allocation12 + $0x58] sm:$0xf0] }
 0x100   :  { %v5185_v21 = vor.u32 %v7237_v13, %v5182_v14  ;;  %v5716_v14 = vld [vmem:[#allocation15 + $0x80] sm:$0xf] }
 0x101   :  { %1344 = vmatpush.bf16.msrb.mxu2 %v5421_v20  ;;  %v5454_v20 = vld [vmem:[#allocation12 + $0x278] sm:$0xf0] }
 0x102   :  { %1358 = vmatpush.bf16.msrb.mxu3 %v5549_v24  ;;  %1318 = vmatmul.bf16.vlgmr.msrb.gmra.mxu0 %v8378_v40  ;;  %v5582_v24 = vld [vmem:[#allocation12 + $0x378] sm:$0xf0]  ;;  %v5457_v29 = vor.u32 %v7305_v19, %v5454_v20  ;;  %v5717_v19 = vor.u32 %v7374_v15, %v5716_v14  ;;  %v7370_v20 = vld [vmem:[#allocation15 + $0x6c] sm:$0xf0]  ;;  %v7364_v14 = vld [vmem:[#allocation15 + $0x44] sm:$0xf] }
 0x103   :  { %1366 = vmatpush.bf16.msra.mxu0 %v5265_v17  ;;  %1380 = vmatpush.bf16.msra.mxu1 %v5393_v18  ;;  %v5473_v17 = vor.u32 %v7309_v6, %v5470_v7  ;;  %v5601_v18 = vor.u32 %v7341_v11, %v5598_v12  ;;  %v5585_v30 = vor.u32 %v7337_v23, %v5582_v24  ;;  %v5732_v7 = vld [vmem:[#allocation15 + $0xa0] sm:$0xf]  ;;  %v7410_v12 = vld [vmem:[#allocation15 + $0x1ac] sm:$0xf0]  ;;  %v5686_v15 = vld [vmem:[#allocation15 + $0x50] sm:$0xf0] }
 0x104   :  { %1332 = vmatmul.bf16.vlgmr.msrb.gmra.mxu1 %v8380_v45  ;;  %v5409_v6 = vor.u32 %v7293_v63, %v5406_v0  ;;  %v5860_v11 = vld [vmem:[#allocation15 + $0x1a0] sm:$0xf]  ;;  %v7366_v23 = vld [vmem:[#allocation15 + $0x4c] sm:$0xf0] }
 0x105   :  { %1345 = vmatpush.bf16.msrb.mxu2 %v5405_v36  ;;  %v5566_v36 = vld [vmem:[#allocation12 + $0x358] sm:$0xf0]  ;;  %v5861_v16 = vor.u32 %v7410_v12, %v5860_v11  ;;  %v5972_v63 = vld [vmem:[#allocation15 + $0x280] sm:$0xf]  ;;  %v7434_v12 = vld [vmem:[#allocation15 + $0x26c] sm:$0xf0] }
 0x106   :  { %1359 = vmatpush.bf16.msrb.mxu3 %v5533_v41  ;;  %v5278_v41 = vld [vmem:[#allocation12 + $0x118] sm:$0xf0]  ;;  %v5956_v11 = vld [vmem:[#allocation15 + $0x260] sm:$0xf] }
 0x107   :  { %1367 = vmatpush.bf16.msra.mxu0 %v5249_v31  ;;  %1381 = vmatpush.bf16.msra.mxu1 %v5377_v32  ;;  %v7301_v31 = vld [vmem:[#allocation12 + $0x24c] sm:$0xf]  ;;  %v5438_v32 = vld [vmem:[#allocation12 + $0x258] sm:$0xf0]  ;;  %v5281_v52 = vor.u32 %v7261_v39, %v5278_v41  ;;  %v5753_v41 = vor.u32 %v7380_v37, %v5750_v38 }
 0x108   :  { %1346 = vmatmul.bf16.vlgmr.msrb.gmra.mxu2 %v8384_v4 }
 0x109   :  { %1394 = vmatpush.bf16.msra.mxu2 %v5521_v42  ;;  %1360 = vmatmul.bf16.vlgmr.msrb.gmra.mxu3 %v8386_v10  ;;  %v5764_v42 = vld [vmem:[#allocation15 + $0xe0] sm:$0xf] }
 0x10a   :  { %1408 = vmatpush.bf16.msra.mxu3 %v5649_v43  ;;  %v5441_v43 = vor.u32 %v7301_v31, %v5438_v32  ;;  %v5828_v32 = vld [vmem:[#allocation15 + $0x160] sm:$0xf] }
 0x10b   :  { %1368 = vmatpush.bf16.msra.mxu0 %v5233_v47  ;;  %1382 = vmatpush.bf16.msra.mxu1 %v5361_v48  ;;  %v7418_v47 = vld [vmem:[#allocation15 + $0x1ec] sm:$0xf0]  ;;  %v5569_v48 = vor.u32 %v7333_v33, %v5566_v36 }
 0x10c   :  { %v5893_v57 = vor.u32 %v7418_v47, %v5892_v46  ;;  %v7402_v33 = vld [vmem:[#allocation15 + $0x16c] sm:$0xf0] }
 0x10d   :  { %1395 = vmatpush.bf16.msra.mxu2 %v5505_v55  ;;  %v5765_v55 = vor.u32 %v7386_v44, %v5764_v42  ;;  %v7450_v36 = vld [vmem:[#allocation15 + $0x2ec] sm:$0xf0]  ;;  %v5812_v42 = vld [vmem:[#allocation15 + $0x140] sm:$0xf] }
 0x10e   :  { %1409 = vmatpush.bf16.msra.mxu3 %v5633_v56  ;;  %v5748_v56 = vld [vmem:[#allocation15 + $0xc0] sm:$0xf]  ;;  %v7446_v47 = vld [vmem:[#allocation15 + $0x2cc] sm:$0xf0] }
 0x10f   :  { %1369 = vmatpush.bf16.msra.mxu0 %v5217_v59  ;;  %1383 = vmatpush.bf16.msra.mxu1 %v5345_v60  ;;  %v7382_v59 = vld [vmem:[#allocation15 + $0xcc] sm:$0xf0]  ;;  %v5876_v60 = vld [vmem:[#allocation15 + $0x1c0] sm:$0xf] }
 0x110   :  { %v6004_v44 = vld [vmem:[#allocation15 + $0x2c0] sm:$0xf] }
 0x111   :  { %1396 = vmatpush.bf16.msra.mxu2 %v5489_v3  ;;  %v5749_v3 = vor.u32 %v7382_v59, %v5748_v56  ;;  %v7442_v56 = vld [vmem:[#allocation15 + $0x2ac] sm:$0xf0] }
 0x112   :  { %1410 = vmatpush.bf16.msra.mxu3 %v5617_v5  ;;  %v5877_v5 = vor.u32 %v7414_v61, %v5876_v60  ;;  %v5989_v59 = vor.u32 %v7442_v56, %v5988_v54  ;;  %v5780_v61 = vld [vmem:[#allocation15 + $0x100] sm:$0xf]  ;;  %v7396_v54 = vld [vmem:[#allocation15 + $0x144] sm:$0xf] }
 0x113   :  { %1370 = vmatpush.bf16.msra.mxu0 %v5201_v8  ;;  %1384 = vmatpush.bf16.msra.mxu1 %v5329_v9  ;;  %v7378_v8 = vld [vmem:[#allocation15 + $0xac] sm:$0xf0]  ;;  %v5537_v9 = vor.u32 %v7325_v1, %v5534_v2  ;;  %v7368_v2 = vld [vmem:[#allocation15 + $0x64] sm:$0xf] }
 0x114   :  { %v5733_v13 = vor.u32 %v7378_v8, %v5732_v7  ;;  %v7438_v1 = vld [vmem:[#allocation15 + $0x28c] sm:$0xf0]  ;;  %v7416_v7 = vld [vmem:[#allocation15 + $0x1e4] sm:$0xf]  ;;  %v5894_v8 = vld [vmem:[#allocation15 + $0x1f0] sm:$0xf0] }
 0x115   :  { %1397 = vmatpush.bf16.msra.mxu2 %v5473_v17  ;;  %v5844_v17 = vld [vmem:[#allocation15 + $0x180] sm:$0xf]  ;;  %v7444_v56 = vld [vmem:[#allocation15 + $0x2c4] sm:$0xf] }
 0x116   :  { %1411 = vmatpush.bf16.msra.mxu3 %v5601_v18  ;;  %v7406_v18 = vld [vmem:[#allocation15 + $0x18c] sm:$0xf0] }
 0x117   :  { %1371 = vmatpush.bf16.msra.mxu0 %v5185_v21  ;;  %1385 = vmatpush.bf16.msra.mxu1 %v5313_v22  ;;  %v5684_v22 = vld [vmem:[#allocation15 + $0x40] sm:$0xf] }
 0x118   :  { %v5685_v24 = vor.u32 %v7366_v23, %v5684_v22  ;;  %v5670_v22 = vld [vmem:[#allocation15 + $0x30] sm:$0xf0]  ;;  %v7408_v23 = vld [vmem:[#allocation15 + $0x1a4] sm:$0xf] }
 0x119   :  { %1398 = vmatpush.bf16.msra.mxu2 %v5457_v29  ;;  %v5865_v26 = vor.u32 %v7408_v23, %v5862_v25 }
 0x11a   :  { %1412 = vmatpush.bf16.msra.mxu3 %v5585_v30  ;;  %v5766_v30 = vld [vmem:[#allocation15 + $0xf0] sm:$0xf0] }
 0x11b   :  { %1372 = vmatpush.bf16.msra.mxu0 %v5169_v34  ;;  %1386 = vmatpush.bf16.msra.mxu1 %v5297_v35  ;;  %v6020_v34 = vld [vmem:[#allocation15 + $0x2e0] sm:$0xf]  ;;  %v5829_v35 = vor.u32 %v7402_v33, %v5828_v32  ;;  %v5846_v32 = vld [vmem:[#allocation15 + $0x190] sm:$0xf0] }
 0x11c   :  { %v6021_v39 = vor.u32 %v7450_v36, %v6020_v34  ;;  %v5908_v34 = vld [vmem:[#allocation15 + $0x200] sm:$0xf] }
 0x11d   :  { %1399 = vmatpush.bf16.msra.mxu2 %v5441_v43  ;;  %v7398_v43 = vld [vmem:[#allocation15 + $0x14c] sm:$0xf0]  ;;  %v6148_v36 = vld [vmem:[#allocation15 + $0x3e0] sm:$0xf] }
 0x11e   :  { %1413 = vmatpush.bf16.msra.mxu3 %v5569_v48  ;;  %v5813_v46 = vor.u32 %v7398_v43, %v5812_v42  ;;  %v6005_v48 = vor.u32 %v7446_v47, %v6004_v44  ;;  %v5830_v42 = vld [vmem:[#allocation15 + $0x170] sm:$0xf0] }
 0x11f   :  { %1373 = vmatpush.bf16.msra.mxu0 %v5153_v51  ;;  %1387 = vmatpush.bf16.msra.mxu1 %v5281_v52  ;;  %v5737_v51 = vor.u32 %v7376_v49, %v5734_v50  ;;  %v5796_v52 = vld [vmem:[#allocation15 + $0x120] sm:$0xf]  ;;  %v6022_v47 = vld [vmem:[#allocation15 + $0x2f0] sm:$0xf0]  ;;  %v8402_v50 = vld [vmem:[#allocation13] sm:$0xf] }
 0x121   :  { %1400 = vmatpush.bf16.msra.mxu2 %v5425_v58  ;;  %v5718_v58 = vld [vmem:[#allocation15 + $0x90] sm:$0xf0] }
 0x122   :  { %1414 = vmatpush.bf16.msra.mxu3 %v5553_v62  ;;  %1374 = vmatmul.bf16.vlgmr.msra.gmra.mxu0 %v8378_v40  ;;  %v5700_v40 = vld [vmem:[#allocation15 + $0x60] sm:$0xf]  ;;  %v7390_v62 = vld [vmem:[#allocation15 + $0x10c] sm:$0xf0] }
 0x123   :  { %2212 = vmatpush.bf16.msrb.mxu0 %v5765_v55  ;;  %2226 = vmatpush.bf16.msrb.mxu1 %v5893_v57  ;;  %v5701_v21 = vor.u32 %v7370_v20, %v5700_v40  ;;  %v5797_v55 = vor.u32 %v7394_v53, %v5796_v52  ;;  %v7372_v57 = vld [vmem:[#allocation15 + $0x84] sm:$0xf]  ;;  %v5781_v0 = vor.u32 %v7390_v62, %v5780_v61  ;;  %v5940_v40 = vld [vmem:[#allocation15 + $0x240] sm:$0xf]  ;;  %v7430_v20 = vld [vmem:[#allocation15 + $0x24c] sm:$0xf0] }
 0x124   :  { %1388 = vmatmul.bf16.vlgmr.msra.gmra.mxu1 %v8380_v45  ;;  %v5845_v45 = vor.u32 %v7406_v18, %v5844_v17  ;;  %v5721_v60 = vor.u32 %v7372_v57, %v5718_v58  ;;  %v5689_v17 = vor.u32 %v7364_v14, %v5686_v15  ;;  %v5878_v18 = vld [vmem:[#allocation15 + $0x1d0] sm:$0xf0]  ;;  %v7478_v52 = vld [vmem:[#allocation15 + $0x3cc] sm:$0xf0]  ;;  %v6116_v61 = vld [vmem:[#allocation15 + $0x3a0] sm:$0xf] }
 0x125   :  { %1401 = vmatpush.bf16.msra.mxu2 %v5409_v6  ;;  %v6006_v58 = vld [vmem:[#allocation15 + $0x2d0] sm:$0xf0]  ;;  %v7474_v62 = vld [vmem:[#allocation15 + $0x3ac] sm:$0xf0]  ;;  %v7388_v14 = vld [vmem:[#allocation15 + $0x104] sm:$0xf] }
 0x126   :  { %1415 = vmatpush.bf16.msra.mxu3 %v5537_v9  ;;  %v5897_v9 = vor.u32 %v7416_v7, %v5894_v8  ;;  %v6100_v8 = vld [vmem:[#allocation15 + $0x380] sm:$0xf]  ;;  %v5782_v15 = vld [vmem:[#allocation15 + $0x110] sm:$0xf0] }
 0x127   :  { %2213 = vmatpush.bf16.msrb.mxu0 %v5749_v3  ;;  %2227 = vmatpush.bf16.msrb.mxu1 %v5877_v5  ;;  %v5702_v3 = vld [vmem:[#allocation15 + $0x70] sm:$0xf0]  ;;  %v5973_v5 = vor.u32 %v7438_v1, %v5972_v63  ;;  %v7392_v1 = vld [vmem:[#allocation15 + $0x124] sm:$0xf] }
 0x128   :  { %1402 = vmatmul.bf16.vlgmr.msra.gmra.mxu2 %v8384_v4  ;;  %v5652_v4 = vld [vmem:[#allocation15] sm:$0xf]  ;;  %v5705_v6 = vor.u32 %v7368_v2, %v5702_v3  ;;  %v5798_v2 = vld [vmem:[#allocation15 + $0x130] sm:$0xf0]  ;;  %v7440_v3 = vld [vmem:[#allocation15 + $0x2a4] sm:$0xf] }
 0x129   :  { %1416 = vmatmul.bf16.vlgmr.msra.gmra.mxu3 %v8386_v10  ;;  %v5653_v29 = vor.u32 %v7358_v28, %v5652_v4  ;;  %v7384_v10 = vld [vmem:[#allocation15 + $0xe4] sm:$0xf]  ;;  %2240 = vmatpush.bf16.msrb.mxu2 %v6021_v39  ;;  %v7426_v4 = vld [vmem:[#allocation15 + $0x22c] sm:$0xf0] }
 0x12a   :  { %v5769_v31 = vor.u32 %v7384_v10, %v5766_v30  ;;  %v5654_v10 = vld [vmem:[#allocation15 + $0x10] sm:$0xf0]  ;;  %v7404_v30 = vld [vmem:[#allocation15 + $0x184] sm:$0xf]  ;;  %v7482_v39 = vld [vmem:[#allocation15 + $0x3ec] sm:$0xf0] }
 0x12b   :  { %2214 = vmatpush.bf16.msrb.mxu0 %v5733_v13  ;;  %2228 = vmatpush.bf16.msrb.mxu1 %v5861_v16  ;;  %v5957_v13 = vor.u32 %v7434_v12, %v5956_v11  ;;  %v7412_v16 = vld [vmem:[#allocation15 + $0x1c4] sm:$0xf]  ;;  %v5849_v33 = vor.u32 %v7404_v30, %v5846_v32  ;;  %v6149_v43 = vor.u32 %v7482_v39, %v6148_v36 }
 0x12c   :  { %v7428_v32 = vld [vmem:[#allocation15 + $0x244] sm:$0xf] }
 0x12d   :  { %2241 = vmatpush.bf16.msrb.mxu2 %v6005_v48  ;;  %2254 = vmatpush.bf16.msrb.mxu3 %v6149_v43  ;;  %v6052_v43 = vld [vmem:[#allocation15 + $0x320] sm:$0xf] }
 0x12f   :  { %2215 = vmatpush.bf16.msrb.mxu0 %v5717_v19  ;;  %2229 = vmatpush.bf16.msrb.mxu1 %v5845_v45  ;;  %v5881_v19 = vor.u32 %v7412_v16, %v5878_v18  ;;  %v5941_v45 = vor.u32 %v7430_v20, %v5940_v40  ;;  %v7436_v16 = vld [vmem:[#allocation15 + $0x284] sm:$0xf]  ;;  %v5785_v18 = vor.u32 %v7388_v14, %v5782_v15  ;;  %v7379_v15 = vld [vmem:[#allocation15 + $0xb4] sm:$0xf0] }
 0x131   :  { %2242 = vmatpush.bf16.msrb.mxu2 %v5989_v59  ;;  %v6009_v59 = vor.u32 %v7444_v56, %v6006_v58  ;;  %v5756_v56 = vld [vmem:[#allocation15 + $0xc8] sm:$0xf]  ;;  %v7383_v58 = vld [vmem:[#allocation15 + $0xd4] sm:$0xf0] }
 0x133   :  { %2216 = vmatpush.bf16.msrb.mxu0 %v5701_v21  ;;  %2230 = vmatpush.bf16.msrb.mxu1 %v5829_v35  ;;  %v7360_v21 = vld [vmem:[#allocation15 + $0x24] sm:$0xf]  ;;  %v7422_v35 = vld [vmem:[#allocation15 + $0x20c] sm:$0xf0] }
 0x134   :  { %v5909_v38 = vor.u32 %v7422_v35, %v5908_v34 }
 0x135   :  { %2243 = vmatpush.bf16.msrb.mxu2 %v5973_v5  ;;  %v5801_v5 = vor.u32 %v7392_v1, %v5798_v2  ;;  %v5910_v1 = vld [vmem:[#allocation15 + $0x210] sm:$0xf0]  ;;  %v7480_v2 = vld [vmem:[#allocation15 + $0x3e4] sm:$0xf] }
 0x137   :  { %2217 = vmatpush.bf16.msrb.mxu0 %v5685_v24  ;;  %2231 = vmatpush.bf16.msrb.mxu1 %v5813_v46  ;;  %v5673_v24 = vor.u32 %v7360_v21, %v5670_v22  ;;  %v7448_v46 = vld [vmem:[#allocation15 + $0x2e4] sm:$0xf]  ;;  %v7466_v21 = vld [vmem:[#allocation15 + $0x36c] sm:$0xf0] }
 0x138   :  { %v6025_v49 = vor.u32 %v7448_v46, %v6022_v47  ;;  %v7387_v47 = vld [vmem:[#allocation15 + $0xf4] sm:$0xf0] }
 0x139   :  { %2244 = vmatpush.bf16.msrb.mxu2 %v5957_v13 }
 0x13b   :  { %2218 = vmatpush.bf16.msrb.mxu0 %v5669_v27  ;;  %2232 = vmatpush.bf16.msrb.mxu1 %v5797_v55  ;;  %v5924_v27 = vld [vmem:[#allocation15 + $0x220] sm:$0xf]  ;;  %v5814_v55 = vld [vmem:[#allocation15 + $0x150] sm:$0xf0] }
 0x13c   :  { %v5925_v28 = vor.u32 %v7426_v4, %v5924_v27  ;;  %v5817_v57 = vor.u32 %v7396_v54, %v5814_v55  ;;  %v5958_v27 = vld [vmem:[#allocation15 + $0x270] sm:$0xf0] }
 0x13d   :  { %2245 = vmatpush.bf16.msrb.mxu2 %v5941_v45  ;;  %v6084_v45 = vld [vmem:[#allocation15 + $0x360] sm:$0xf] }
 0x13e   :  { %v6085_v25 = vor.u32 %v7466_v21, %v6084_v45  ;;  %v5724_v45 = vld [vmem:[#allocation15 + $0x88] sm:$0xf] }
 0x13f   :  { %2219 = vmatpush.bf16.msrb.mxu0 %v5653_v29  ;;  %2233 = vmatpush.bf16.msrb.mxu1 %v5781_v0  ;;  %v7356_v29 = vld [vmem:[#allocation15 + $0x4] sm:$0xf]  ;;  %v6117_v0 = vor.u32 %v7474_v62, %v6116_v61 }
 0x141   :  { %2246 = vmatpush.bf16.msrb.mxu2 %v5925_v28 }
 0x143   :  { %2268 = vmatpush.bf16.msra.mxu0 %v5769_v31  ;;  %2282 = vmatpush.bf16.msra.mxu1 %v5897_v9  ;;  %v5657_v31 = vor.u32 %v7356_v29, %v5654_v10  ;;  %v7470_v9 = vld [vmem:[#allocation15 + $0x38c] sm:$0xf0]  ;;  %v6068_v29 = vld [vmem:[#allocation15 + $0x340] sm:$0xf] }
 0x144   :  { %v6101_v13 = vor.u32 %v7470_v9, %v6100_v8  ;;  %v7462_v10 = vld [vmem:[#allocation15 + $0x34c] sm:$0xf0]  ;;  %v5757_v9 = vor.u32 %v7383_v58, %v5756_v56 }
 0x145   :  { %2247 = vmatpush.bf16.msrb.mxu2 %v5909_v38 }
 0x147   :  { %2269 = vmatpush.bf16.msra.mxu0 %v5753_v41  ;;  %2283 = vmatpush.bf16.msra.mxu1 %v5881_v19  ;;  %v7400_v41 = vld [vmem:[#allocation15 + $0x164] sm:$0xf]  ;;  %v5974_v19 = vld [vmem:[#allocation15 + $0x290] sm:$0xf0] }
 0x148   :  { %v5833_v44 = vor.u32 %v7400_v41, %v5830_v42  ;;  %v5977_v20 = vor.u32 %v7436_v16, %v5974_v19  ;;  %v5772_v42 = vld [vmem:[#allocation15 + $0xe8] sm:$0xf]  ;;  %v7476_v16 = vld [vmem:[#allocation15 + $0x3c4] sm:$0xf] }
 0x149   :  { %2296 = vmatpush.bf16.msra.mxu2 %v6025_v49  ;;  %v7424_v49 = vld [vmem:[#allocation15 + $0x224] sm:$0xf] }
 0x14b   :  { %2270 = vmatpush.bf16.msra.mxu0 %v5737_v51  ;;  %2284 = vmatpush.bf16.msra.mxu1 %v5865_v26  ;;  %v6132_v51 = vld [vmem:[#allocation15 + $0x3c0] sm:$0xf]  ;;  %v7432_v26 = vld [vmem:[#allocation15 + $0x264] sm:$0xf] }
 0x14c   :  { %v6133_v53 = vor.u32 %v7478_v52, %v6132_v51  ;;  %v5961_v4 = vor.u32 %v7432_v26, %v5958_v27  ;;  %v5926_v51 = vld [vmem:[#allocation15 + $0x230] sm:$0xf0] }
 0x14d   :  { %2297 = vmatpush.bf16.msra.mxu2 %v6009_v59  ;;  %v6036_v59 = vld [vmem:[#allocation15 + $0x300] sm:$0xf] }
 0x14e   :  { %2255 = vmatpush.bf16.msrb.mxu3 %v6133_v53  ;;  %v5929_v53 = vor.u32 %v7424_v49, %v5926_v51  ;;  %v7415_v49 = vld [vmem:[#allocation15 + $0x1d4] sm:$0xf0]  ;;  %v7464_v51 = vld [vmem:[#allocation15 + $0x364] sm:$0xf] }
 0x14f   :  { %2271 = vmatpush.bf16.msra.mxu0 %v5721_v60  ;;  %2285 = vmatpush.bf16.msra.mxu1 %v5849_v33  ;;  %v550_v60 = vperm.slane %v8402_v50, 0  ;;  %v5942_v33 = vld [vmem:[#allocation15 + $0x250] sm:$0xf0] }
 0x150   :  { %v5945_v35 = vor.u32 %v7428_v32, %v5942_v33  ;;  %v7419_v33 = vld [vmem:[#allocation15 + $0x1f4] sm:$0xf0] }
 0x152   :  { %2256 = vmatpush.bf16.msrb.mxu3 %v6117_v0  ;;  %v7420_v0 = vld [vmem:[#allocation15 + $0x204] sm:$0xf] }
 0x153   :  { %2272 = vmatpush.bf16.msra.mxu0 %v5705_v6  ;;  %2286 = vmatpush.bf16.msra.mxu1 %v5833_v44  ;;  %v5990_v6 = vld [vmem:[#allocation15 + $0x2b0] sm:$0xf0]  ;;  %v7458_v44 = vld [vmem:[#allocation15 + $0x32c] sm:$0xf0] }
 0x154   :  { %v5993_v7 = vor.u32 %v7440_v3, %v5990_v6  ;;  %v6150_v6 = vld [vmem:[#allocation15 + $0x3f0] sm:$0xf0] }
 0x155   :  { %v6153_v8 = vor.u32 %v7480_v2, %v6150_v6  ;;  %v6070_v2 = vld [vmem:[#allocation15 + $0x350] sm:$0xf0] }
 0x156   :  { %2298 = vmatpush.bf16.msra.mxu2 %v5993_v7  ;;  %2257 = vmatpush.bf16.msrb.mxu3 %v6101_v13 }
 0x157   :  { %2273 = vmatpush.bf16.msra.mxu0 %v5689_v17  ;;  %2287 = vmatpush.bf16.msra.mxu1 %v5817_v57  ;;  %v5773_v57 = vor.u32 %v7387_v47, %v5772_v42  ;;  %v5884_v47 = vld [vmem:[#allocation15 + $0x1c8] sm:$0xf] }
 0x15a   :  { %2299 = vmatpush.bf16.msra.mxu2 %v5977_v20  ;;  %2258 = vmatpush.bf16.msrb.mxu3 %v6085_v25 }
 0x15b   :  { %2274 = vmatpush.bf16.msra.mxu0 %v5673_v24  ;;  %2288 = vmatpush.bf16.msra.mxu1 %v5801_v5  ;;  %v5913_v5 = vor.u32 %v7420_v0, %v5910_v1  ;;  %v7411_v0 = vld [vmem:[#allocation15 + $0x1b4] sm:$0xf0]  ;;  %v7460_v1 = vld [vmem:[#allocation15 + $0x344] sm:$0xf] }
 0x15c   :  { %v6073_v6 = vor.u32 %v7460_v1, %v6070_v2  ;;  %v5788_v2 = vld [vmem:[#allocation15 + $0x108] sm:$0xf] }
 0x15e   :  { %v1207_v37 = vpop.f32.mrf.mxu0  ;;  %v1221_v48 = vpop.f32.mrf.mxu1  ;;  %2300 = vmatpush.bf16.msra.mxu2 %v5961_v4 }
 0x15f   :  { %2275 = vmatpush.bf16.msra.mxu0 %v5657_v31  ;;  %v1208_v11 = vadd.f32 %v1207_v37, %v550_v60  ;;  %2289 = vmatpush.bf16.msra.mxu1 %v5785_v18  ;;  %v6069_v31 = vor.u32 %v7462_v10, %v6068_v29  ;;  %v551_v37 = vperm.slane %v8402_v50, 1  ;;  %v5708_v10 = vld [vmem:[#allocation15 + $0x68] sm:$0xf] }
 0x161   :  { %v1222_v22 = vadd.f32 %v1221_v48, %v1208_v11  ;;  %2259 = vmatpush.bf16.msrb.mxu3 %v6069_v31  ;;  %v6053_v48 = vor.u32 %v7458_v44, %v6052_v43  ;;  %v5740_v11 = vld [vmem:[#allocation15 + $0xa8] sm:$0xf] }
 0x162   :  { %2301 = vmatpush.bf16.msra.mxu2 %v5945_v35  ;;  %v5741_v20 = vor.u32 %v7379_v15, %v5740_v11  ;;  %v5900_v31 = vld [vmem:[#allocation15 + $0x1e8] sm:$0xf]  ;;  %v6102_v35 = vld [vmem:[#allocation15 + $0x390] sm:$0xf0]  ;;  %v7407_v15 = vld [vmem:[#allocation15 + $0x194] sm:$0xf0] }
 0x163   :  { %v5901_v43 = vor.u32 %v7419_v33, %v5900_v31  ;;  %v5692_v44 = vld [vmem:[#allocation15 + $0x48] sm:$0xf]  ;;  %v7451_v31 = vld [vmem:[#allocation15 + $0x2f4] sm:$0xf0]  ;;  %v5758_v33 = vld [vmem:[#allocation15 + $0xd8] sm:$0xf0] }
 0x164   :  { %v5660_v11 = vld [vmem:[#allocation15 + $0x8] sm:$0xf] }
 0x165   :  { %2260 = vmatpush.bf16.msrb.mxu3 %v6053_v48 }
 0x166   :  { %v1209_v63 = vpop.f32.mrf.mxu0  ;;  %v1223_v12 = vpop.f32.mrf.mxu1  ;;  %2302 = vmatpush.bf16.msra.mxu2 %v5929_v53 }
 0x167   :  { %v1210_v23 = vadd.f32 %v1209_v63, %v550_v60  ;;  %v7454_v60 = vld [vmem:[#allocation15 + $0x30c] sm:$0xf0] }
 0x168   :  { %v6037_v63 = vor.u32 %v7454_v60, %v6036_v59  ;;  %v5885_v59 = vor.u32 %v7415_v49, %v5884_v47  ;;  %v5676_v60 = vld [vmem:[#allocation15 + $0x28] sm:$0xf]  ;;  %v7377_v47 = vld [vmem:[#allocation15 + $0xac] sm:$0xf]  ;;  %v5742_v49 = vld [vmem:[#allocation15 + $0xb8] sm:$0xf0] }
 0x169   :  { %v1224_v30 = vadd.f32 %v1223_v12, %v1210_v23  ;;  %v7472_v23 = vld [vmem:[#allocation15 + $0x3a4] sm:$0xf] }
 0x16a   :  { %2261 = vmatpush.bf16.msrb.mxu3 %v6037_v63  ;;  %2303 = vmatpush.bf16.msra.mxu2 %v5913_v5  ;;  %v5868_v63 = vld [vmem:[#allocation15 + $0x1a8] sm:$0xf] }
 0x16b   :  { %v1235_v17 = vpop.f32.mrf.mxu2  ;;  %v1249_v40 = vpop.f32.mrf.mxu3 }
 0x16c   :  { %v1236_v28 = vadd.f32 %v1235_v17, %v1222_v22  ;;  %v6134_v17 = vld [vmem:[#allocation15 + $0x3d0] sm:$0xf0]  ;;  %v7375_v22 = vld [vmem:[#allocation15 + $0x94] sm:$0xf0] }
 0x16d   :  { %v6137_v18 = vor.u32 %v7476_v16, %v6134_v17  ;;  %v5725_v29 = vor.u32 %v7375_v22, %v5724_v45  ;;  %v7456_v16 = vld [vmem:[#allocation15 + $0x324] sm:$0xf]  ;;  %v6054_v17 = vld [vmem:[#allocation15 + $0x330] sm:$0xf0] }
 0x16e   :  { %v1263_v24 = vpop.f32.mrf.mxu0  ;;  %v1250_v36 = vadd.f32 %v1249_v40, %v1236_v28  ;;  %2310 = vmatpush.bf16.msra.mxu3 %v6153_v8 }
 0x16f   :  { %v1277_v38 = vpop.f32.mrf.mxu1  ;;  %v1264_v61 = vadd.f32 %v1263_v24, %v551_v37  ;;  %v6118_v24 = vld [vmem:[#allocation15 + $0x3b0] sm:$0xf0] }
 0x170   :  { %v1422_v54 = vmax.f32 %v1250_v36, 0.0  ;;  %v6121_v26 = vor.u32 %v7472_v23, %v6118_v24  ;;  %v552_v36 = vperm.slane %v8402_v50, 2 }
 0x171   :  { %v1278_v12 = vadd.f32 %v1277_v38, %v1264_v61  ;;  %v7363_v61 = vld [vmem:[#allocation15 + $0x34] sm:$0xf0] }
 0x172   :  { %2311 = vmatpush.bf16.msra.mxu3 %v6137_v18  ;;  %v5677_v8 = vor.u32 %v7363_v61, %v5676_v60  ;;  %v5726_v60 = vld [vmem:[#allocation15 + $0x98] sm:$0xf0]  ;;  %v553_v61 = vperm.slane %v8402_v50, 3 }
 0x173   :  { %v1237_v34 = vpop.f32.mrf.mxu2  ;;  %v1251_v41 = vpop.f32.mrf.mxu3 }
 0x174   :  { %v1238_v39 = vadd.f32 %v1237_v34, %v1224_v30  ;;  %v7371_v30 = vld [vmem:[#allocation15 + $0x74] sm:$0xf0]  ;;  %v7468_v34 = vld [vmem:[#allocation15 + $0x384] sm:$0xf] }
 0x175   :  { %v5709_v42 = vor.u32 %v7371_v30, %v5708_v10  ;;  %v6038_v10 = vld [vmem:[#allocation15 + $0x310] sm:$0xf0] }
 0x176   :  { %v1252_v46 = vadd.f32 %v1251_v41, %v1238_v39  ;;  %v1265_v52 = vpop.f32.mrf.mxu0  ;;  %2312 = vmatpush.bf16.msra.mxu3 %v6121_v26  ;;  %v7403_v26 = vld [vmem:[#allocation15 + $0x174] sm:$0xf0] }
 0x177   :  { %v1266_v13 = vadd.f32 %v1265_v52, %v551_v37  ;;  %v1279_v14 = vpop.f32.mrf.mxu1  ;;  %v6105_v37 = vor.u32 %v7468_v34, %v6102_v35  ;;  %v6086_v52 = vld [vmem:[#allocation15 + $0x370] sm:$0xf0] }
 0x178   :  { %v1426_v55 = vmax.f32 %v1252_v46, 0.0  ;;  %v7367_v46 = vld [vmem:[#allocation15 + $0x54] sm:$0xf0] }
 0x179   :  { %v1280_v21 = vadd.f32 %v1279_v14, %v1266_v13  ;;  %v5693_v58 = vor.u32 %v7367_v46, %v5692_v44  ;;  %v5852_v13 = vld [vmem:[#allocation15 + $0x188] sm:$0xf]  ;;  %v7447_v46 = vld [vmem:[#allocation15 + $0x2d4] sm:$0xf0] }
 0x17a   :  { %v8406_v62 = vpack.c.bf16 %v1426_v55, %v1422_v54  ;;  %2313 = vmatpush.bf16.msra.mxu3 %v6105_v37  ;;  %v6089_v55 = vor.u32 %v7464_v51, %v6086_v52  ;;  %v5853_v24 = vor.u32 %v7407_v15, %v5852_v13  ;;  %v5964_v15 = vld [vmem:[#allocation15 + $0x268] sm:$0xf] }
 0x17b   :  { %v1291_v3 = vpop.f32.mrf.mxu2  ;;  %v1305_v7 = vpop.f32.mrf.mxu3 }
 0x17c   :  { %2220 = vmatmul.bf16.vlgmr.msrb.gmra.mxu0 %v8406_v62  ;;  %v1292_v19 = vadd.f32 %v1291_v3, %v1278_v12  ;;  %v7359_v12 = vld [vmem:[#allocation15 + $0x14] sm:$0xf0] }
 0x17d   :  { %2324 = vmatpush.bf16.msrb.mxu0 %v5773_v57 }
 0x17e   :  { %v1306_v27 = vadd.f32 %v1305_v7, %v1292_v19  ;;  %2314 = vmatpush.bf16.msra.mxu3 %v6089_v55  ;;  %v7385_v19 = vld [vmem:[#allocation15 + $0xec] sm:$0xf]  ;;  %v5804_v55 = vld [vmem:[#allocation15 + $0x128] sm:$0xf] }
 0x17f   :  { %v1319_v40 = vpop.f32.mrf.mxu0 }
 0x180   :  { %v1423_v38 = vmax.f32 %v1306_v27, 0.0  ;;  %v1320_v53 = vadd.f32 %v1319_v40, %v552_v36  ;;  %v5774_v40 = vld [vmem:[#allocation15 + $0xf8] sm:$0xf0] }
 0x181   :  { %2325 = vmatpush.bf16.msrb.mxu0 %v5757_v9  ;;  %v1333_v39 = vpop.f32.mrf.mxu1  ;;  %v5869_v9 = vor.u32 %v7411_v0, %v5868_v63 }
 0x182   :  { %v1334_v3 = vadd.f32 %v1333_v39, %v1320_v53  ;;  %2315 = vmatpush.bf16.msra.mxu3 %v6073_v6  ;;  %v7439_v6 = vld [vmem:[#allocation15 + $0x294] sm:$0xf0] }
 0x183   :  { %v1293_v25 = vpop.f32.mrf.mxu2  ;;  %v1307_v28 = vpop.f32.mrf.mxu3 }
 0x184   :  { %v1294_v4 = vadd.f32 %v1293_v25, %v1280_v21  ;;  %v5661_v21 = vor.u32 %v7359_v12, %v5660_v11  ;;  %v5836_v25 = vld [vmem:[#allocation15 + $0x168] sm:$0xf]  ;;  %v7417_v11 = vld [vmem:[#allocation15 + $0x1ec] sm:$0xf]  ;;  %v5902_v12 = vld [vmem:[#allocation15 + $0x1f8] sm:$0xf0] }
 0x185   :  { %2326 = vmatpush.bf16.msrb.mxu0 %v5741_v20  ;;  %v6057_v20 = vor.u32 %v7456_v16, %v6054_v17  ;;  %v5837_v37 = vor.u32 %v7403_v26, %v5836_v25  ;;  %v5905_v17 = vor.u32 %v7417_v11, %v5902_v12  ;;  %v5948_v26 = vld [vmem:[#allocation15 + $0x248] sm:$0xf] }
 0x186   :  { %v1308_v32 = vadd.f32 %v1307_v28, %v1294_v4  ;;  %v5777_v4 = vor.u32 %v7385_v19, %v5774_v40  ;;  %v6028_v28 = vld [vmem:[#allocation15 + $0x2e8] sm:$0xf]  ;;  %v7365_v19 = vld [vmem:[#allocation15 + $0x4c] sm:$0xf]  ;;  %v5694_v40 = vld [vmem:[#allocation15 + $0x58] sm:$0xf0] }
 0x187   :  { %v1321_v54 = vpop.f32.mrf.mxu0  ;;  %2316 = vmatpush.bf16.msra.mxu3 %v6057_v20  ;;  %v5697_v25 = vor.u32 %v7365_v19, %v5694_v40  ;;  %v6014_v19 = vld [vmem:[#allocation15 + $0x2d8] sm:$0xf0] }
 0x188   :  { %v1427_v41 = vmax.f32 %v1308_v32, 0.0  ;;  %v1322_v5 = vadd.f32 %v1321_v54, %v552_v36  ;;  %v7381_v32 = vld [vmem:[#allocation15 + $0xcc] sm:$0xf]  ;;  %v5745_v54 = vor.u32 %v7377_v47, %v5742_v49  ;;  %v5854_v49 = vld [vmem:[#allocation15 + $0x198] sm:$0xf0] }
 0x189   :  { %2327 = vmatpush.bf16.msrb.mxu0 %v5725_v29  ;;  %v1335_v14 = vpop.f32.mrf.mxu1  ;;  %v7452_v29 = vld [vmem:[#allocation15 + $0x304] sm:$0xf]  ;;  %v5761_v39 = vor.u32 %v7381_v32, %v5758_v33  ;;  %v5870_v32 = vld [vmem:[#allocation15 + $0x1b8] sm:$0xf0] }
 0x18a   :  { %v8410_v48 = vpack.c.bf16 %v1427_v41, %v1423_v38  ;;  %v1336_v18 = vadd.f32 %v1335_v14, %v1322_v5  ;;  %v6041_v34 = vor.u32 %v7452_v29, %v6038_v10  ;;  %v6029_v38 = vor.u32 %v7451_v31, %v6028_v28  ;;  %v5820_v41 = vld [vmem:[#allocation15 + $0x148] sm:$0xf]  ;;  %v7431_v29 = vld [vmem:[#allocation15 + $0x254] sm:$0xf0]  ;;  %v7361_v10 = vld [vmem:[#allocation15 + $0x2c] sm:$0xf] }
 0x18b   :  { %v1347_v56 = vpop.f32.mrf.mxu2  ;;  %v5980_v5 = vld [vmem:[#allocation15 + $0x288] sm:$0xf]  ;;  %v7409_v31 = vld [vmem:[#allocation15 + $0x1ac] sm:$0xf] }
 0x18c   :  { %v1361_v57 = vpop.f32.mrf.mxu3  ;;  %2234 = vmatmul.bf16.vlgmr.msrb.gmra.mxu1 %v8410_v48  ;;  %2276 = vmatmul.bf16.vlgmr.msra.gmra.mxu0 %v8406_v62  ;;  %v1348_v7 = vadd.f32 %v1347_v56, %v1334_v3  ;;  %v7395_v56 = vld [vmem:[#allocation15 + $0x134] sm:$0xf0]  ;;  %v5981_v50 = vor.u32 %v7439_v6, %v5980_v5  ;;  %v7449_v5 = vld [vmem:[#allocation15 + $0x2ec] sm:$0xf]  ;;  %v6030_v6 = vld [vmem:[#allocation15 + $0x2f8] sm:$0xf0] }
 0x18d   :  { %2328 = vmatpush.bf16.msrb.mxu0 %v5709_v42  ;;  %2338 = vmatpush.bf16.msrb.mxu1 %v5901_v43  ;;  %v7399_v42 = vld [vmem:[#allocation15 + $0x154] sm:$0xf0]  ;;  %v6012_v43 = vld [vmem:[#allocation15 + $0x2c8] sm:$0xf]  ;;  %v5805_v63 = vor.u32 %v7395_v56, %v5804_v55 }
 0x18e   :  { %v1362_v22 = vadd.f32 %v1361_v57, %v1348_v7  ;;  %2317 = vmatpush.bf16.msra.mxu3 %v6041_v34  ;;  %v5821_v51 = vor.u32 %v7399_v42, %v5820_v41  ;;  %v6013_v53 = vor.u32 %v7447_v46, %v6012_v43  ;;  %v5996_v57 = vld [vmem:[#allocation15 + $0x2a8] sm:$0xf]  ;;  %v7391_v3 = vld [vmem:[#allocation15 + $0x114] sm:$0xf0]  ;;  %v7369_v7 = vld [vmem:[#allocation15 + $0x6c] sm:$0xf]  ;;  %v5873_v41 = vor.u32 %v7409_v31, %v5870_v32 }
 0x18f   :  { %v5789_v13 = vor.u32 %v7391_v3, %v5788_v2  ;;  %v7357_v42 = vld [vmem:[#allocation15 + $0xc] sm:$0xf]  ;;  %v5662_v43 = vld [vmem:[#allocation15 + $0x18] sm:$0xf0] }
 0x190   :  { %v1424_v35 = vmax.f32 %v1362_v22, 0.0  ;;  %v5886_v22 = vld [vmem:[#allocation15 + $0x1d8] sm:$0xf0]  ;;  %v7405_v46 = vld [vmem:[#allocation15 + $0x18c] sm:$0xf] }
 0x191   :  { %2329 = vmatpush.bf16.msrb.mxu0 %v5693_v58  ;;  %2339 = vmatpush.bf16.msrb.mxu1 %v5885_v59  ;;  %v7443_v58 = vld [vmem:[#allocation15 + $0x2b4] sm:$0xf0]  ;;  %v7373_v59 = vld [vmem:[#allocation15 + $0x8c] sm:$0xf]  ;;  %v5838_v3 = vld [vmem:[#allocation15 + $0x178] sm:$0xf0] }
 0x192   :  { %v5997_v0 = vor.u32 %v7443_v58, %v5996_v57  ;;  %v5729_v1 = vor.u32 %v7373_v59, %v5726_v60  ;;  %v5665_v57 = vor.u32 %v7357_v42, %v5662_v43  ;;  %v5916_v58 = vld [vmem:[#allocation15 + $0x208] sm:$0xf]  ;;  %v7423_v59 = vld [vmem:[#allocation15 + $0x214] sm:$0xf0]  ;;  %v7437_v31 = vld [vmem:[#allocation15 + $0x28c] sm:$0xf] }
 0x193   :  { %v1349_v45 = vpop.f32.mrf.mxu2  ;;  %v5982_v32 = vld [vmem:[#allocation15 + $0x298] sm:$0xf0]  ;;  %v7467_v42 = vld [vmem:[#allocation15 + $0x374] sm:$0xf0]  ;;  %v7433_v43 = vld [vmem:[#allocation15 + $0x26c] sm:$0xf] }
 0x194   :  { %v1350_v23 = vadd.f32 %v1349_v45, %v1336_v18  ;;  %v1363_v27 = vpop.f32.mrf.mxu3  ;;  %v7435_v18 = vld [vmem:[#allocation15 + $0x274] sm:$0xf0] }
 0x195   :  { %2330 = vmatpush.bf16.msrb.mxu0 %v5677_v8  ;;  %2340 = vmatpush.bf16.msrb.mxu1 %v5869_v9  ;;  %v5710_v8 = vld [vmem:[#allocation15 + $0x78] sm:$0xf0] }
 0x196   :  { %v1364_v30 = vadd.f32 %v1363_v27, %v1350_v23  ;;  %v5713_v14 = vor.u32 %v7369_v7, %v5710_v8 }
 0x198   :  { %v1428_v36 = vmax.f32 %v1364_v30, 0.0  ;;  %v5678_v30 = vld [vmem:[#allocation15 + $0x38] sm:$0xf0] }
 0x199   :  { %2331 = vmatpush.bf16.msrb.mxu0 %v5661_v21  ;;  %2341 = vmatpush.bf16.msrb.mxu1 %v5853_v24  ;;  %v7413_v21 = vld [vmem:[#allocation15 + $0x1cc] sm:$0xf]  ;;  %v5965_v24 = vor.u32 %v7435_v18, %v5964_v15  ;;  %v7479_v15 = vld [vmem:[#allocation15 + $0x3d4] sm:$0xf0] }
 0x19a   :  { %v8414_v44 = vpack.c.bf16 %v1428_v36, %v1424_v35  ;;  %v5889_v28 = vor.u32 %v7413_v21, %v5886_v22  ;;  %v5949_v35 = vor.u32 %v7431_v29, %v5948_v26  ;;  %v5681_v36 = vor.u32 %v7361_v10, %v5678_v30  ;;  %v7445_v18 = vld [vmem:[#allocation15 + $0x2cc] sm:$0xf]  ;;  %v6124_v21 = vld [vmem:[#allocation15 + $0x3a8] sm:$0xf]  ;;  %v7475_v22 = vld [vmem:[#allocation15 + $0x3b4] sm:$0xf0] }
 0x19b   :  { %v5998_v26 = vld [vmem:[#allocation15 + $0x2b8] sm:$0xf0]  ;;  %v7471_v29 = vld [vmem:[#allocation15 + $0x394] sm:$0xf0]  ;;  %v7389_v10 = vld [vmem:[#allocation15 + $0x10c] sm:$0xf] }
 0x19c   :  { %2290 = vmatmul.bf16.vlgmr.msra.gmra.mxu1 %v8410_v48  ;;  %2332 = vmatmul.bf16.vlgmr.msrb.gmra.mxu0 %v8406_v62  ;;  %v5790_v30 = vld [vmem:[#allocation15 + $0x118] sm:$0xf0] }
 0x19d   :  { %2380 = vmatpush.bf16.msra.mxu0 %v5777_v4  ;;  %2248 = vmatmul.bf16.vlgmr.msrb.gmra.mxu2 %v8414_v44 }
 0x19e   :  { %2342 = vmatpush.bf16.msrb.mxu1 %v5837_v37  ;;  %2352 = vmatpush.bf16.msrb.mxu2 %v6029_v38  ;;  %v5932_v37 = vld [vmem:[#allocation15 + $0x228] sm:$0xf]  ;;  %v7427_v38 = vld [vmem:[#allocation15 + $0x234] sm:$0xf0] }
 0x19f   :  { %v1375_v52 = vpop.f32.mrf.mxu0  ;;  %v5933_v56 = vor.u32 %v7427_v38, %v5932_v37  ;;  %v2455_v37 = vld [vmem:[#allocation7 + $0x8] sm:$0xff]  ;;  %v5793_v38 = vor.u32 %v7389_v10, %v5790_v30  ;;  %v6174_v30 = vld [vmem:[#allocation18 + $0x18] sm:$0xf0] }
 0x1a0   :  { %v1376_v16 = vadd.f32 %v1375_v52, %v553_v61  ;;  %v7486_v52 = vld [vmem:[#allocation18 + $0xc] sm:$0xf0]  ;;  %v7485_v10 = vld [vmem:[#allocation18 + $0xc] sm:$0xf] }
 0x1a1   :  { %2381 = vmatpush.bf16.msra.mxu0 %v5761_v39  ;;  %v1389_v9 = vpop.f32.mrf.mxu1 }
 0x1a2   :  { %2343 = vmatpush.bf16.msrb.mxu1 %v5821_v51  ;;  %2353 = vmatpush.bf16.msrb.mxu2 %v6013_v53  ;;  %v1390_v27 = vadd.f32 %v1389_v9, %v1376_v16  ;;  %v6164_v51 = vld [vmem:[#allocation18] sm:$0xf]  ;;  %v5917_v9 = vor.u32 %v7423_v59, %v5916_v58  ;;  %v7397_v16 = vld [vmem:[#allocation15 + $0x14c] sm:$0xf]  ;;  %v6060_v59 = vld [vmem:[#allocation15 + $0x328] sm:$0xf] }
 0x1a3   :  { %v6165_v2 = vor.u32 %v7486_v52, %v6164_v51 }
 0x1a5   :  { %2382 = vmatpush.bf16.msra.mxu0 %v5745_v54 }
 0x1a6   :  { %2344 = vmatpush.bf16.msrb.mxu1 %v5805_v63  ;;  %2354 = vmatpush.bf16.msrb.mxu2 %v5997_v0  ;;  %v6156_v63 = vld [vmem:[#allocation15 + $0x3e8] sm:$0xf]  ;;  %v7483_v0 = vld [vmem:[#allocation15 + $0x3f4] sm:$0xf0] }
 0x1a7   :  { %v1377_v20 = vpop.f32.mrf.mxu0  ;;  %v6157_v11 = vor.u32 %v7483_v0, %v6156_v63  ;;  %v5934_v63 = vld [vmem:[#allocation15 + $0x238] sm:$0xf0] }
 0x1a8   :  { %v1378_v4 = vadd.f32 %v1377_v20, %v553_v61  ;;  %v5857_v61 = vor.u32 %v7405_v46, %v5854_v49  ;;  %v5966_v46 = vld [vmem:[#allocation15 + $0x278] sm:$0xf0] }
 0x1a9   :  { %2383 = vmatpush.bf16.msra.mxu0 %v5729_v1  ;;  %v1391_v34 = vpop.f32.mrf.mxu1  ;;  %v7401_v1 = vld [vmem:[#allocation15 + $0x16c] sm:$0xf]  ;;  %v5969_v52 = vor.u32 %v7433_v43, %v5966_v46  ;;  %v7510_v43 = vld [vmem:[#allocation21 + $0xac] sm:$0xf0] }
 0x1aa   :  { %2345 = vmatpush.bf16.msrb.mxu1 %v5789_v13  ;;  %2355 = vmatpush.bf16.msrb.mxu2 %v5981_v50  ;;  %v1392_v39 = vadd.f32 %v1391_v34, %v1378_v4  ;;  %v5841_v13 = vor.u32 %v7401_v1, %v5838_v3  ;;  %v6033_v50 = vor.u32 %v7449_v5, %v6030_v6  ;;  %v6166_v34 = vld [vmem:[#allocation18 + $0x10] sm:$0xf0]  ;;  %v7421_v5 = vld [vmem:[#allocation15 + $0x20c] sm:$0xf]  ;;  %v5918_v6 = vld [vmem:[#allocation15 + $0x218] sm:$0xf0] }
 0x1ab   :  { %v1403_v45 = vpop.f32.mrf.mxu2  ;;  %v7455_v3 = vld [vmem:[#allocation15 + $0x314] sm:$0xf0] }
 0x1ac   :  { %v1417_v23 = vpop.f32.mrf.mxu3  ;;  %v1404_v33 = vadd.f32 %v1403_v45, %v1390_v27  ;;  %v6017_v45 = vor.u32 %v7445_v18, %v6014_v19  ;;  %v6125_v27 = vor.u32 %v7475_v22, %v6124_v21  ;;  %v7473_v18 = vld [vmem:[#allocation15 + $0x3ac] sm:$0xf]  ;;  %v6126_v19 = vld [vmem:[#allocation15 + $0x3b8] sm:$0xf0] }
 0x1ad   :  { %2384 = vmatpush.bf16.msra.mxu0 %v5713_v14  ;;  %2346 = vmatmul.bf16.vlgmr.msrb.gmra.mxu1 %v8410_v48  ;;  %v6140_v14 = vld [vmem:[#allocation15 + $0x3c8] sm:$0xf]  ;;  %v7465_v22 = vld [vmem:[#allocation15 + $0x36c] sm:$0xf] }
 0x1ae   :  { %2394 = vmatpush.bf16.msra.mxu1 %v5905_v17  ;;  %2304 = vmatmul.bf16.vlgmr.msra.gmra.mxu2 %v8414_v44  ;;  %v1418_v53 = vadd.f32 %v1417_v23, %v1404_v33  ;;  %v5822_v17 = vld [vmem:[#allocation15 + $0x158] sm:$0xf0]  ;;  %v6141_v40 = vor.u32 %v7479_v15, %v6140_v14  ;;  %v7393_v23 = vld [vmem:[#allocation15 + $0x12c] sm:$0xf]  ;;  %v7484_v33 = vld [vmem:[#allocation18 + $0x4] sm:$0xf] }
 0x1af   :  { %2356 = vmatpush.bf16.msrb.mxu2 %v5965_v24  ;;  %v5825_v20 = vor.u32 %v7397_v16, %v5822_v17  ;;  %v5806_v24 = vld [vmem:[#allocation15 + $0x138] sm:$0xf0]  ;;  %v7477_v14 = vld [vmem:[#allocation15 + $0x3cc] sm:$0xf] }
 0x1b0   :  { %v1425_v7 = vmax.f32 %v1418_v53, 0.0  ;;  %v6076_v53 = vld [vmem:[#allocation15 + $0x348] sm:$0xf]  ;;  %v6142_v15 = vld [vmem:[#allocation15 + $0x3d8] sm:$0xf0] }
 0x1b1   :  { %2385 = vmatpush.bf16.msra.mxu0 %v5697_v25  ;;  %v7441_v25 = vld [vmem:[#allocation15 + $0x2ac] sm:$0xf]  ;;  %v6145_v17 = vor.u32 %v7477_v14, %v6142_v15  ;;  %v7490_v14 = vld [vmem:[#allocation21 + $0xc] sm:$0xf0]  ;;  %v6376_v15 = vld [vmem:[#allocation21 + $0x180] sm:$0xf] }
 0x1b2   :  { %2395 = vmatpush.bf16.msra.mxu1 %v5889_v28  ;;  %v6001_v4 = vor.u32 %v7441_v25, %v5998_v26  ;;  %v6108_v28 = vld [vmem:[#allocation15 + $0x388] sm:$0xf]  ;;  %v7461_v25 = vld [vmem:[#allocation15 + $0x34c] sm:$0xf]  ;;  %v6078_v26 = vld [vmem:[#allocation15 + $0x358] sm:$0xf0] }
 0x1b3   :  { %v1405_v47 = vpop.f32.mrf.mxu2  ;;  %2357 = vmatpush.bf16.msrb.mxu2 %v5949_v35  ;;  %v6109_v35 = vor.u32 %v7471_v29, %v6108_v28  ;;  %v7453_v28 = vld [vmem:[#allocation15 + $0x30c] sm:$0xf]  ;;  %v6046_v29 = vld [vmem:[#allocation15 + $0x318] sm:$0xf0] }
 0x1b4   :  { %v1406_v54 = vadd.f32 %v1405_v47, %v1392_v39  ;;  %v1419_v55 = vpop.f32.mrf.mxu3  ;;  %v5985_v39 = vor.u32 %v7437_v31, %v5982_v32  ;;  %v6169_v47 = vor.u32 %v7484_v33, %v6166_v34  ;;  %v6049_v31 = vor.u32 %v7453_v28, %v6046_v29  ;;  %v6296_v33 = vld [vmem:[#allocation21 + $0xe0] sm:$0xf]  ;;  %v7518_v34 = vld [vmem:[#allocation21 + $0xec] sm:$0xf0]  ;;  %v7508_v28 = vld [vmem:[#allocation21 + $0xa4] sm:$0xf] }
 0x1b5   :  { %2386 = vmatpush.bf16.msra.mxu0 %v5681_v36  ;;  %v2454_v36 = vld [vmem:[#allocation7] sm:$0xff]  ;;  %v6177_v32 = vor.u32 %v7485_v10, %v6174_v30  ;;  %v6266_v29 = vld [vmem:[#allocation21 + $0xb0] sm:$0xf0] }
 0x1b6   :  { %v1420_v60 = vadd.f32 %v1419_v55, %v1406_v54  ;;  %2396 = vmatpush.bf16.msra.mxu1 %v5873_v41  ;;  %v6092_v41 = vld [vmem:[#allocation15 + $0x368] sm:$0xf]  ;;  %v8427_v49 = vpack.c.bf16 %v2455_v37, %v2454_v36  ;;  %v7463_v54 = vld [vmem:[#allocation15 + $0x354] sm:$0xf0]  ;;  %v7429_v55 = vld [vmem:[#allocation15 + $0x24c] sm:$0xf]  ;;  %v6269_v10 = vor.u32 %v7508_v28, %v6266_v29 }
 0x1b7   :  { %2358 = vmatpush.bf16.msrb.mxu2 %v5933_v56  ;;  %v6093_v51 = vor.u32 %v7467_v42, %v6092_v41  ;;  %v5950_v56 = vld [vmem:[#allocation15 + $0x258] sm:$0xf0]  ;;  %v6280_v36 = vld [vmem:[#allocation21 + $0xc0] sm:$0xf]  ;;  %v7514_v37 = vld [vmem:[#allocation21 + $0xcc] sm:$0xf0] }
 0x1b8   :  { %v1429_v8 = vmax.f32 %v1420_v60, 0.0  ;;  %v5953_v58 = vor.u32 %v7429_v55, %v5950_v56  ;;  %v7459_v60 = vld [vmem:[#allocation15 + $0x334] sm:$0xf0]  ;;  %v8440_v41 = vld [vmem:[#allocation16] sm:$0xf] }
 0x1b9   :  { %2387 = vmatpush.bf16.msra.mxu0 %v5665_v57  ;;  %v6077_v57 = vor.u32 %v7463_v54, %v6076_v53  ;;  %v6061_v0 = vor.u32 %v7459_v60, %v6060_v59  ;;  %v6264_v42 = vld [vmem:[#allocation21 + $0xa0] sm:$0xf]  ;;  %v7562_v28 = vld [vmem:[#allocation21 + $0x24c] sm:$0xf0] }
 0x1ba   :  { %v8422_v12 = vpack.c.bf16 %v1429_v8, %v1425_v7  ;;  %2397 = vmatpush.bf16.msra.mxu1 %v5857_v61  ;;  %v7425_v61 = vld [vmem:[#allocation15 + $0x22c] sm:$0xf]  ;;  %v6158_v8 = vld [vmem:[#allocation15 + $0x3f8] sm:$0xf0]  ;;  %v6265_v46 = vor.u32 %v7510_v43, %v6264_v42  ;;  %v6232_v56 = vld [vmem:[#allocation21 + $0x60] sm:$0xf] }
 0x1bb   :  { %2359 = vmatpush.bf16.msrb.mxu2 %v5917_v9  ;;  %v5937_v1 = vor.u32 %v7425_v61, %v5934_v63  ;;  %v7481_v7 = vld [vmem:[#allocation15 + $0x3ec] sm:$0xf]  ;;  %v7550_v61 = vld [vmem:[#allocation21 + $0x1ec] sm:$0xf0]  ;;  %v6216_v63 = vld [vmem:[#allocation21 + $0x40] sm:$0xf] }
 0x1bc   :  { %2262 = vmatmul.bf16.vlgmr.msrb.gmra.mxu3 %v8422_v12  ;;  %2388 = vmatmul.bf16.vlgmr.msra.gmra.mxu0 %v8406_v62  ;;  %v5809_v62 = vor.u32 %v7393_v23, %v5806_v24  ;;  %v6172_v9 = vld [vmem:[#allocation18 + $0x8] sm:$0xf]  ;;  %v6094_v23 = vld [vmem:[#allocation15 + $0x378] sm:$0xf0]  ;;  %v6552_v30 = vld [vmem:[#allocation21 + $0x2e0] sm:$0xf] }
 0x1bd   :  { %2501 = vmatpush.bf16.msrb.mxu0 %v6165_v2  ;;  %2366 = vmatpush.bf16.msrb.mxu3 %v6157_v11  ;;  %v6044_v2 = vld [vmem:[#allocation15 + $0x308] sm:$0xf]  ;;  %v7487_v11 = vld [vmem:[#allocation18 + $0x14] sm:$0xf0]  ;;  %v6097_v24 = vor.u32 %v7465_v22, %v6094_v23  ;;  %v7534_v22 = vld [vmem:[#allocation21 + $0x16c] sm:$0xf0] }
 0x1be   :  { %2398 = vmatpush.bf16.msra.mxu1 %v5841_v13  ;;  %2360 = vmatmul.bf16.vlgmr.msrb.gmra.mxu2 %v8414_v44  ;;  %v5921_v13 = vor.u32 %v7421_v5, %v5918_v6  ;;  %v6173_v16 = vor.u32 %v7487_v11, %v6172_v9  ;;  %v6392_v9 = vld [vmem:[#allocation21 + $0x1a0] sm:$0xf]  ;;  %v6250_v42 = vld [vmem:[#allocation21 + $0x90] sm:$0xf0] }
 0x1bf   :  { %2408 = vmatpush.bf16.msra.mxu2 %v6033_v50  ;;  %v6161_v50 = vor.u32 %v7481_v7, %v6158_v8  ;;  %v6200_v7 = vld [vmem:[#allocation21 + $0x20] sm:$0xf]  ;;  %v7494_v8 = vld [vmem:[#allocation21 + $0x2c] sm:$0xf0] }
 0x1c0   :  { %v6201_v11 = vor.u32 %v7494_v8, %v6200_v7 }
 0x1c1   :  { %2367 = vmatpush.bf16.msrb.mxu3 %v6141_v40  ;;  %v6129_v40 = vor.u32 %v7473_v18, %v6126_v19  ;;  %v7516_v18 = vld [vmem:[#allocation21 + $0xe4] sm:$0xf]  ;;  %v6298_v19 = vld [vmem:[#allocation21 + $0xf0] sm:$0xf0] }
 0x1c2   :  { %2399 = vmatpush.bf16.msra.mxu1 %v5825_v20  ;;  %v7469_v20 = vld [vmem:[#allocation15 + $0x38c] sm:$0xf] }
 0x1c3   :  { %2409 = vmatpush.bf16.msra.mxu2 %v6017_v45  ;;  %v6110_v45 = vld [vmem:[#allocation15 + $0x398] sm:$0xf0] }
 0x1c4   :  { %v6113_v21 = vor.u32 %v7469_v20, %v6110_v45  ;;  %v6301_v45 = vor.u32 %v7516_v18, %v6298_v19  ;;  %v7540_v18 = vld [vmem:[#allocation21 + $0x1a4] sm:$0xf] }
 0x1c5   :  { %2368 = vmatpush.bf16.msrb.mxu3 %v6125_v27  ;;  %v6081_v27 = vor.u32 %v7461_v25, %v6078_v26  ;;  %v7512_v25 = vld [vmem:[#allocation21 + $0xc4] sm:$0xf]  ;;  %v6282_v26 = vld [vmem:[#allocation21 + $0xd0] sm:$0xf0] }
 0x1c6   :  { %2400 = vmatpush.bf16.msra.mxu1 %v5809_v62  ;;  %v7457_v62 = vld [vmem:[#allocation15 + $0x32c] sm:$0xf] }
 0x1c7   :  { %2410 = vmatpush.bf16.msra.mxu2 %v6001_v4  ;;  %v6062_v4 = vld [vmem:[#allocation15 + $0x338] sm:$0xf0] }
 0x1c9   :  { %2369 = vmatpush.bf16.msrb.mxu3 %v6109_v35  ;;  %v6297_v35 = vor.u32 %v7518_v34, %v6296_v33 }
 0x1ca   :  { %2401 = vmatpush.bf16.msra.mxu1 %v5793_v38 }
 0x1cb   :  { %2411 = vmatpush.bf16.msra.mxu2 %v5985_v39  ;;  %3340 = vmatpush.bf16.msra.mxu0 %v6297_v35  ;;  %v6281_v39 = vor.u32 %v7514_v37, %v6280_v36  ;;  %v6328_v36 = vld [vmem:[#allocation21 + $0x120] sm:$0xf]  ;;  %v7526_v37 = vld [vmem:[#allocation21 + $0x12c] sm:$0xf0] }
 0x1cc   :  { %2318 = vmatmul.bf16.vlgmr.msra.gmra.mxu3 %v8422_v12  ;;  %6178 = vmatmul.msk.bf16.vlgmr.msrb.gmra.mxu0 %vm348_vm0, %v8427_v49 }
 0x1cd   :  { %2370 = vmatpush.bf16.msrb.mxu3 %v6093_v51  ;;  %2402 = vmatmul.bf16.vlgmr.msra.gmra.mxu1 %v8410_v48  ;;  %v6045_v48 = vor.u32 %v7455_v3, %v6044_v2  ;;  %v7506_v51 = vld [vmem:[#allocation21 + $0x8c] sm:$0xf0]  ;;  %v6408_v2 = vld [vmem:[#allocation21 + $0x1c0] sm:$0xf] }
 0x1ce   :  { %2515 = vmatpush.bf16.msrb.mxu1 %v6169_v47  ;;  %v6248_v47 = vld [vmem:[#allocation21 + $0x80] sm:$0xf]  ;;  %v7546_v3 = vld [vmem:[#allocation21 + $0x1cc] sm:$0xf0] }
 0x1cf   :  { %2412 = vmatpush.bf16.msra.mxu2 %v5969_v52  ;;  %3341 = vmatpush.bf16.msra.mxu0 %v6281_v39  ;;  %v1564_v52 = vperm.slane %v8440_v41, 0  ;;  %v7504_v39 = vld [vmem:[#allocation21 + $0x84] sm:$0xf] }
 0x1d0   :  { %v6253_v43 = vor.u32 %v7504_v39, %v6250_v42  ;;  %v7558_v39 = vld [vmem:[#allocation21 + $0x22c] sm:$0xf0] }
 0x1d1   :  { %2371 = vmatpush.bf16.msrb.mxu3 %v6077_v57  ;;  %v7502_v57 = vld [vmem:[#allocation21 + $0x6c] sm:$0xf0] }
 0x1d2   :  { %v6233_v60 = vor.u32 %v7502_v57, %v6232_v56  ;;  %v7500_v57 = vld [vmem:[#allocation21 + $0x64] sm:$0xf] }
 0x1d3   :  { %2413 = vmatpush.bf16.msra.mxu2 %v5953_v58  ;;  %3342 = vmatpush.bf16.msra.mxu0 %v6265_v46  ;;  %v6424_v58 = vld [vmem:[#allocation21 + $0x1e0] sm:$0xf] }
 0x1d4   :  { %v6536_v46 = vld [vmem:[#allocation21 + $0x2c0] sm:$0xf] }
 0x1d5   :  { %2372 = vmatpush.bf16.msrb.mxu3 %v6061_v0  ;;  %v7498_v0 = vld [vmem:[#allocation21 + $0x4c] sm:$0xf0] }
 0x1d6   :  { %v6217_v5 = vor.u32 %v7498_v0, %v6216_v63  ;;  %v6520_v63 = vld [vmem:[#allocation21 + $0x2a0] sm:$0xf]  ;;  %v7574_v0 = vld [vmem:[#allocation21 + $0x2ac] sm:$0xf0] }
 0x1d7   :  { %2414 = vmatpush.bf16.msra.mxu2 %v5937_v1  ;;  %v6425_v1 = vor.u32 %v7550_v61, %v6424_v58  ;;  %v6234_v58 = vld [vmem:[#allocation21 + $0x70] sm:$0xf0] }
 0x1d8   :  { %v6426_v61 = vld [vmem:[#allocation21 + $0x1f0] sm:$0xf0] }
 0x1d9   :  { %2373 = vmatpush.bf16.msrb.mxu3 %v6045_v48  ;;  %3354 = vmatpush.bf16.msra.mxu1 %v6425_v1  ;;  %v7542_v48 = vld [vmem:[#allocation21 + $0x1ac] sm:$0xf0] }
 0x1db   :  { %2415 = vmatpush.bf16.msra.mxu2 %v5921_v13  ;;  %v6393_v13 = vor.u32 %v7542_v48, %v6392_v9  ;;  %v6410_v9 = vld [vmem:[#allocation21 + $0x1d0] sm:$0xf0]  ;;  %v7570_v48 = vld [vmem:[#allocation21 + $0x28c] sm:$0xf0] }
 0x1dc   :  { %2374 = vmatmul.bf16.vlgmr.msrb.gmra.mxu3 %v8422_v12 }
 0x1dd   :  { %2422 = vmatpush.bf16.msra.mxu3 %v6161_v50  ;;  %6179 = vmatmul.msk.bf16.vlgmr.msrb.gmra.mxu1 %vm348_vm0, %v8427_v49  ;;  %v6184_v50 = vld [vmem:[#allocation21] sm:$0xf] }
 0x1de   :  { %2416 = vmatmul.bf16.vlgmr.msra.gmra.mxu2 %v8414_v44  ;;  %v6065_v44 = vor.u32 %v7457_v62, %v6062_v4  ;;  %v6344_v62 = vld [vmem:[#allocation21 + $0x140] sm:$0xf]  ;;  %v7530_v4 = vld [vmem:[#allocation21 + $0x14c] sm:$0xf0] }
 0x1df   :  { %2529 = vmatpush.bf16.msrb.mxu2 %v6173_v16  ;;  %v6185_v16 = vor.u32 %v7490_v14, %v6184_v50 }
 0x1e1   :  { %2423 = vmatpush.bf16.msra.mxu3 %v6145_v17  ;;  %v7538_v17 = vld [vmem:[#allocation21 + $0x18c] sm:$0xf0] }
 0x1e2   :  { %v6377_v20 = vor.u32 %v7538_v17, %v6376_v15  ;;  %v6202_v17 = vld [vmem:[#allocation21 + $0x30] sm:$0xf0] }
 0x1e5   :  { %2424 = vmatpush.bf16.msra.mxu3 %v6129_v40 }
 0x1e9   :  { %2425 = vmatpush.bf16.msra.mxu3 %v6113_v21  ;;  %v6360_v21 = vld [vmem:[#allocation21 + $0x160] sm:$0xf] }
 0x1ed   :  { %2426 = vmatpush.bf16.msra.mxu3 %v6097_v24  ;;  %v6361_v24 = vor.u32 %v7534_v22, %v6360_v21  ;;  %v7566_v21 = vld [vmem:[#allocation21 + $0x26c] sm:$0xf0] }
 0x1ee   :  { %6180 = vmatmul.msk.bf16.vlgmr.msrb.gmra.mxu2 %vm348_vm0, %v8427_v49 }
 0x1f1   :  { %2427 = vmatpush.bf16.msra.mxu3 %v6081_v27  ;;  %v6285_v27 = vor.u32 %v7512_v25, %v6282_v26  ;;  %v7488_v25 = vld [vmem:[#allocation21 + $0x4] sm:$0xf]  ;;  %v6186_v26 = vld [vmem:[#allocation21 + $0x10] sm:$0xf0] }
 0x1f5   :  { %2428 = vmatpush.bf16.msra.mxu3 %v6065_v44  ;;  %v6345_v44 = vor.u32 %v7530_v4, %v6344_v62  ;;  %v6189_v62 = vor.u32 %v7488_v25, %v6186_v26  ;;  %v6378_v4 = vld [vmem:[#allocation21 + $0x190] sm:$0xf0] }
 0x1f9   :  { %2429 = vmatpush.bf16.msra.mxu3 %v6049_v31  ;;  %v2221_v38 = vpop.f32.mrf.mxu0  ;;  %v7582_v31 = vld [vmem:[#allocation21 + $0x2ec] sm:$0xf0] }
 0x1fa   :  { %v2222_v54 = vadd.f32 %v2221_v38, %v1564_v52  ;;  %v6553_v33 = vor.u32 %v7582_v31, %v6552_v30  ;;  %v6329_v38 = vor.u32 %v7526_v37, %v6328_v36 }
 0x1fc   :  { %2430 = vmatmul.bf16.vlgmr.msra.gmra.mxu3 %v8422_v12  ;;  %v6249_v12 = vor.u32 %v7506_v51, %v6248_v47  ;;  %3368 = vmatpush.bf16.msra.mxu2 %v6553_v33  ;;  %v7578_v47 = vld [vmem:[#allocation21 + $0x2cc] sm:$0xf0]  ;;  %v6362_v33 = vld [vmem:[#allocation21 + $0x170] sm:$0xf0] }
 0x1fd   :  { %2543 = vmatpush.bf16.msrb.mxu3 %v6177_v32 }
 0x1fe   :  { %3343 = vmatpush.bf16.msra.mxu0 %v6249_v12  ;;  %v6537_v12 = vor.u32 %v7578_v47, %v6536_v46  ;;  %v6346_v46 = vld [vmem:[#allocation21 + $0x150] sm:$0xf0] }
 0x200   :  { %3369 = vmatpush.bf16.msra.mxu2 %v6537_v12  ;;  %v6440_v12 = vld [vmem:[#allocation21 + $0x200] sm:$0xf] }
 0x201   :  { %v8443_v53 = vpop.f32.mrf.mxu0 }
 0x202   :  { %3344 = vmatpush.bf16.msra.mxu0 %v6233_v60  ;;  %v6237_v60 = vor.u32 %v7500_v57, %v6234_v58  ;;  %v7614_v57 = vld [vmem:[#allocation21 + $0x3ec] sm:$0xf0] }
 0x206   :  { %3345 = vmatpush.bf16.msra.mxu0 %v6217_v5  ;;  %v6218_v5 = vld [vmem:[#allocation21 + $0x50] sm:$0xf0] }
 0x209   :  { %v2235_v55 = vpop.f32.mrf.mxu1  ;;  %v8449_v6 = vpop.f32.mrf.mxu0 }
 0x20a   :  { %v2236_v59 = vadd.f32 %v2235_v55, %v2222_v54  ;;  %3346 = vmatpush.bf16.msra.mxu0 %v6201_v11  ;;  %v6312_v54 = vld [vmem:[#allocation21 + $0x100] sm:$0xf]  ;;  %v7522_v55 = vld [vmem:[#allocation21 + $0x10c] sm:$0xf0] }
 0x20b   :  { %v6313_v56 = vor.u32 %v7522_v55, %v6312_v54  ;;  %v6504_v11 = vld [vmem:[#allocation21 + $0x280] sm:$0xf]  ;;  %v7554_v54 = vld [vmem:[#allocation21 + $0x20c] sm:$0xf0] }
 0x20c   :  { %6181 = vmatmul.msk.bf16.vlgmr.msrb.gmra.mxu3 %vm348_vm0, %v8427_v49  ;;  %v6409_v49 = vor.u32 %v7546_v3, %v6408_v2  ;;  %v6521_v2 = vor.u32 %v7574_v0, %v6520_v63  ;;  %v7496_v3 = vld [vmem:[#allocation21 + $0x44] sm:$0xf]  ;;  %v6505_v50 = vor.u32 %v7570_v48, %v6504_v11  ;;  %v6680_v55 = vld [vmem:[#allocation21 + $0x3e0] sm:$0xf]  ;;  %v6538_v48 = vld [vmem:[#allocation21 + $0x2d0] sm:$0xf0] }
 0x20d   :  { %v6221_v8 = vor.u32 %v7496_v3, %v6218_v5  ;;  %v6681_v58 = vor.u32 %v7614_v57, %v6680_v55  ;;  %v7524_v0 = vld [vmem:[#allocation21 + $0x124] sm:$0xf]  ;;  %v6304_v57 = vld [vmem:[#allocation21 + $0xe8] sm:$0xf] }
 0x20e   :  { %3355 = vmatpush.bf16.msra.mxu1 %v6409_v49  ;;  %3347 = vmatpush.bf16.msra.mxu0 %v6185_v16  ;;  %v7544_v49 = vld [vmem:[#allocation21 + $0x1c4] sm:$0xf] }
 0x20f   :  { %3370 = vmatpush.bf16.msra.mxu2 %v6521_v2  ;;  %v7492_v16 = vld [vmem:[#allocation21 + $0x24] sm:$0xf]  ;;  %3382 = vmatpush.bf16.msra.mxu3 %v6681_v58  ;;  %v7519_v58 = vld [vmem:[#allocation21 + $0xf4] sm:$0xf0] }
 0x210   :  { %v6205_v19 = vor.u32 %v7492_v16, %v6202_v17  ;;  %v7576_v11 = vld [vmem:[#allocation21 + $0x2c4] sm:$0xf]  ;;  %v6314_v17 = vld [vmem:[#allocation21 + $0x110] sm:$0xf0] }
 0x211   :  { %v8451_v40 = vpop.f32.mrf.mxu1  ;;  %v8453_v23 = vpop.f32.mrf.mxu0  ;;  %v7520_v16 = vld [vmem:[#allocation21 + $0x104] sm:$0xf] }
 0x212   :  { %3356 = vmatpush.bf16.msra.mxu1 %v6393_v13  ;;  %3396 = vmatpush.bf16.msrb.mxu0 %v6301_v45  ;;  %v6413_v13 = vor.u32 %v7544_v49, %v6410_v9  ;;  %v6488_v45 = vld [vmem:[#allocation21 + $0x260] sm:$0xf] }
 0x213   :  { %3371 = vmatpush.bf16.msra.mxu2 %v6505_v50  ;;  %v6664_v49 = vld [vmem:[#allocation21 + $0x3c0] sm:$0xf]  ;;  %v6541_v50 = vor.u32 %v7576_v11, %v6538_v48  ;;  %v6288_v48 = vld [vmem:[#allocation21 + $0xc8] sm:$0xf] }
 0x216   :  { %3357 = vmatpush.bf16.msra.mxu1 %v6377_v20  ;;  %3397 = vmatpush.bf16.msrb.mxu0 %v6285_v27  ;;  %v6394_v20 = vld [vmem:[#allocation21 + $0x1b0] sm:$0xf0]  ;;  %v7536_v27 = vld [vmem:[#allocation21 + $0x184] sm:$0xf] }
 0x217   :  { %v6397_v22 = vor.u32 %v7540_v18, %v6394_v20  ;;  %v6381_v29 = vor.u32 %v7536_v27, %v6378_v4  ;;  %v6317_v18 = vor.u32 %v7520_v16, %v6314_v17  ;;  %v7606_v20 = vld [vmem:[#allocation21 + $0x3ac] sm:$0xf0]  ;;  %v6632_v4 = vld [vmem:[#allocation21 + $0x380] sm:$0xf] }
 0x218   :  { %v6584_v17 = vld [vmem:[#allocation21 + $0x320] sm:$0xf] }
 0x219   :  { %v8455_v34 = vpop.f32.mrf.mxu1  ;;  %v8459_v51 = vpop.f32.mrf.mxu0 }
 0x21a   :  { %3358 = vmatpush.bf16.msra.mxu1 %v6361_v24  ;;  %3398 = vmatpush.bf16.msrb.mxu0 %v6269_v10  ;;  %v6489_v24 = vor.u32 %v7566_v21, %v6488_v45  ;;  %v8481_v45 = vld [vmem:[#allocation19] sm:$0xf] }
 0x21c   :  { %3372 = vmatpush.bf16.msra.mxu2 %v6489_v24  ;;  %v6522_v24 = vld [vmem:[#allocation21 + $0x2b0] sm:$0xf0] }
 0x21e   :  { %3359 = vmatpush.bf16.msra.mxu1 %v6345_v44  ;;  %3399 = vmatpush.bf16.msrb.mxu0 %v6253_v43  ;;  %v6472_v44 = vld [vmem:[#allocation21 + $0x240] sm:$0xf]  ;;  %v7528_v43 = vld [vmem:[#allocation21 + $0x144] sm:$0xf] }
 0x21f   :  { %v6473_v10 = vor.u32 %v7562_v28, %v6472_v44  ;;  %v6349_v47 = vor.u32 %v7528_v43, %v6346_v46  ;;  %v7602_v44 = vld [vmem:[#allocation21 + $0x38c] sm:$0xf0] }
 0x220   :  { %v2249_v32 = vpop.f32.mrf.mxu2  ;;  %v6633_v28 = vor.u32 %v7602_v44, %v6632_v4  ;;  %v7511_v4 = vld [vmem:[#allocation21 + $0xb4] sm:$0xf0]  ;;  %v2464_v44 = vperm.slane %v8481_v45, 1 }
 0x221   :  { %v8457_v35 = vadd.f32 %v2249_v32, %v2236_v59  ;;  %v7548_v59 = vld [vmem:[#allocation21 + $0x1e4] sm:$0xf]  ;;  %v8461_v7 = vpop.f32.mrf.mxu1  ;;  %v8465_v15 = vpop.f32.mrf.mxu0  ;;  %3373 = vmatpush.bf16.msra.mxu2 %v6473_v10 }
 0x222   :  { %3360 = vmatpush.bf16.msra.mxu1 %v6329_v38  ;;  %v6429_v1 = vor.u32 %v7548_v59, %v6426_v61  ;;  %3400 = vmatpush.bf16.msrb.mxu0 %v6237_v60  ;;  %v7532_v32 = vld [vmem:[#allocation21 + $0x164] sm:$0xf]  ;;  %v6456_v38 = vld [vmem:[#allocation21 + $0x220] sm:$0xf]  ;;  %v6554_v60 = vld [vmem:[#allocation21 + $0x2f0] sm:$0xf0] }
 0x223   :  { %v6365_v37 = vor.u32 %v7532_v32, %v6362_v33  ;;  %v6457_v42 = vor.u32 %v7558_v39, %v6456_v38  ;;  %v7580_v59 = vld [vmem:[#allocation21 + $0x2e4] sm:$0xf]  ;;  %v6506_v32 = vld [vmem:[#allocation21 + $0x290] sm:$0xf0]  ;;  %v6616_v39 = vld [vmem:[#allocation21 + $0x360] sm:$0xf] }
 0x224   :  { %v6557_v63 = vor.u32 %v7580_v59, %v6554_v60  ;;  %v7568_v10 = vld [vmem:[#allocation21 + $0x284] sm:$0xf]  ;;  %v6600_v60 = vld [vmem:[#allocation21 + $0x340] sm:$0xf] }
 0x225   :  { %3374 = vmatpush.bf16.msra.mxu2 %v6457_v42  ;;  %v6509_v33 = vor.u32 %v7568_v10, %v6506_v32  ;;  %v7598_v42 = vld [vmem:[#allocation21 + $0x36c] sm:$0xf0] }
 0x226   :  { %3361 = vmatpush.bf16.msra.mxu1 %v6313_v56  ;;  %3401 = vmatpush.bf16.msrb.mxu0 %v6221_v8  ;;  %v6441_v56 = vor.u32 %v7554_v54, %v6440_v12  ;;  %v7610_v8 = vld [vmem:[#allocation21 + $0x3cc] sm:$0xf0]  ;;  %v6617_v43 = vor.u32 %v7598_v42, %v6616_v39  ;;  %v6490_v12 = vld [vmem:[#allocation21 + $0x270] sm:$0xf0] }
 0x227   :  { %v6665_v9 = vor.u32 %v7610_v8, %v6664_v49  ;;  %v7560_v49 = vld [vmem:[#allocation21 + $0x244] sm:$0xf]  ;;  %v6474_v8 = vld [vmem:[#allocation21 + $0x250] sm:$0xf0]  ;;  %v7586_v10 = vld [vmem:[#allocation21 + $0x30c] sm:$0xf0] }
 0x228   :  { %v8463_v14 = vpop.f32.mrf.mxu2  ;;  %v6477_v16 = vor.u32 %v7560_v49, %v6474_v8  ;;  %v7503_v49 = vld [vmem:[#allocation21 + $0x74] sm:$0xf0] }
 0x229   :  { %3375 = vmatpush.bf16.msra.mxu2 %v6441_v56  ;;  %3383 = vmatpush.bf16.msra.mxu3 %v6665_v9 }
 0x22a   :  { %3410 = vmatpush.bf16.msrb.mxu1 %v6429_v1  ;;  %3402 = vmatpush.bf16.msrb.mxu0 %v6205_v19  ;;  %v8467_v30 = vpop.f32.mrf.mxu1  ;;  %v6330_v1 = vld [vmem:[#allocation21 + $0x130] sm:$0xf0]  ;;  %v6648_v19 = vld [vmem:[#allocation21 + $0x3a0] sm:$0xf] }
 0x22b   :  { %v6333_v5 = vor.u32 %v7524_v0, %v6330_v1  ;;  %v6649_v21 = vor.u32 %v7606_v20, %v6648_v19 }
 0x22d   :  { %3424 = vmatpush.bf16.msrb.mxu2 %v6557_v63  ;;  %3384 = vmatpush.bf16.msra.mxu3 %v6649_v21  ;;  %v7594_v63 = vld [vmem:[#allocation21 + $0x34c] sm:$0xf0]  ;;  %v7556_v21 = vld [vmem:[#allocation21 + $0x224] sm:$0xf] }
 0x22e   :  { %3411 = vmatpush.bf16.msrb.mxu1 %v6413_v13  ;;  %3403 = vmatpush.bf16.msrb.mxu0 %v6189_v62  ;;  %v2463_v62 = vperm.slane %v8481_v45, 0  ;;  %v6601_v1 = vor.u32 %v7594_v63, %v6600_v60  ;;  %v6666_v60 = vld [vmem:[#allocation21 + $0x3d0] sm:$0xf0] }
 0x231   :  { %v8471_v36 = vpop.f32.mrf.mxu2  ;;  %3425 = vmatpush.bf16.msrb.mxu2 %v6541_v50  ;;  %3385 = vmatpush.bf16.msra.mxu3 %v6633_v28  ;;  %v7515_v50 = vld [vmem:[#allocation21 + $0xd4] sm:$0xf0]  ;;  %v6568_v28 = vld [vmem:[#allocation21 + $0x300] sm:$0xf] }
 0x232   :  { %3412 = vmatpush.bf16.msrb.mxu1 %v6397_v22  ;;  %v8475_v2 = vpop.f32.mrf.mxu1  ;;  %v7572_v22 = vld [vmem:[#allocation21 + $0x2a4] sm:$0xf]  ;;  %v6569_v32 = vor.u32 %v7586_v10, %v6568_v28  ;;  %v7547_v28 = vld [vmem:[#allocation21 + $0x1d4] sm:$0xf0] }
 0x233   :  { %v6525_v26 = vor.u32 %v7572_v22, %v6522_v24  ;;  %v6458_v22 = vld [vmem:[#allocation21 + $0x230] sm:$0xf0]  ;;  %v6289_v24 = vor.u32 %v7515_v50, %v6288_v48  ;;  %v6432_v50 = vld [vmem:[#allocation21 + $0x1e8] sm:$0xf] }
 0x235   :  { %3426 = vmatpush.bf16.msrb.mxu2 %v6525_v26  ;;  %3386 = vmatpush.bf16.msra.mxu3 %v6617_v43  ;;  %v7612_v43 = vld [vmem:[#allocation21 + $0x3e4] sm:$0xf] }
 0x236   :  { %3413 = vmatpush.bf16.msrb.mxu1 %v6381_v29 }
 0x239   :  { %v8469_v31 = vpop.f32.mrf.mxu0  ;;  %v8479_v13 = vpop.f32.mrf.mxu2  ;;  %3427 = vmatpush.bf16.msrb.mxu2 %v6509_v33  ;;  %3387 = vmatpush.bf16.msra.mxu3 %v6601_v1  ;;  %v7552_v33 = vld [vmem:[#allocation21 + $0x204] sm:$0xf] }
 0x23a   :  { %3414 = vmatpush.bf16.msrb.mxu1 %v6365_v37 }
 0x23e   :  { %3415 = vmatpush.bf16.msrb.mxu1 %v6349_v47  ;;  %v7564_v47 = vld [vmem:[#allocation21 + $0x264] sm:$0xf] }
 0x23f   :  { %v8477_v3 = vpop.f32.mrf.mxu3  ;;  %v6493_v59 = vor.u32 %v7564_v47, %v6490_v12  ;;  %v6256_v47 = vld [vmem:[#allocation21 + $0x88] sm:$0xf]  ;;  %v7507_v12 = vld [vmem:[#allocation21 + $0x94] sm:$0xf0] }
 0x240   :  { %v6257_v63 = vor.u32 %v7507_v12, %v6256_v47  ;;  %v7495_v47 = vld [vmem:[#allocation21 + $0x34] sm:$0xf0]  ;;  %v6400_v12 = vld [vmem:[#allocation21 + $0x1a8] sm:$0xf] }
 0x241   :  { %v8473_v61 = vpop.f32.mrf.mxu0  ;;  %v8488_v37 = vpop.f32.mrf.mxu2  ;;  %3428 = vmatpush.bf16.msrb.mxu2 %v6493_v59  ;;  %v7608_v59 = vld [vmem:[#allocation21 + $0x3c4] sm:$0xf] }
 0x242   :  { %3416 = vmatpush.bf16.msrb.mxu1 %v6333_v5  ;;  %v6305_v5 = vor.u32 %v7519_v58, %v6304_v57 }
 0x245   :  { %3429 = vmatpush.bf16.msrb.mxu2 %v6477_v16  ;;  %v7551_v16 = vld [vmem:[#allocation21 + $0x1f4] sm:$0xf0] }
 0x246   :  { %3417 = vmatpush.bf16.msrb.mxu1 %v6317_v18  ;;  %v7590_v18 = vld [vmem:[#allocation21 + $0x32c] sm:$0xf0] }
 0x247   :  { %v8486_v29 = vpop.f32.mrf.mxu3  ;;  %v6585_v20 = vor.u32 %v7590_v18, %v6584_v17  ;;  %v7604_v17 = vld [vmem:[#allocation21 + $0x3a4] sm:$0xf]  ;;  %v6650_v18 = vld [vmem:[#allocation21 + $0x3b0] sm:$0xf0] }
 0x249   :  { %v2503_v25 = vpop.f32.mrf.mxu0  ;;  %v8496_v19 = vpop.f32.mrf.mxu2  ;;  %3388 = vmatpush.bf16.msra.mxu3 %v6585_v20 }
 0x24a   :  { %v8483_v27 = vpop.f32.mrf.mxu1  ;;  %v2504_v38 = vadd.f32 %v2503_v25, %v2463_v62  ;;  %v6461_v25 = vor.u32 %v7556_v21, %v6458_v22  ;;  %v6653_v22 = vor.u32 %v7604_v17, %v6650_v18  ;;  %v6306_v17 = vld [vmem:[#allocation21 + $0xf8] sm:$0xf0] }
 0x24c   :  { %v2550_v54 = vmax.f32 %v2504_v38, 0.0  ;;  %3430 = vmatpush.bf16.msrb.mxu2 %v6461_v25  ;;  %v6442_v38 = vld [vmem:[#allocation21 + $0x210] sm:$0xf0]  ;;  %v6224_v25 = vld [vmem:[#allocation21 + $0x48] sm:$0xf] }
 0x24d   :  { %v6445_v42 = vor.u32 %v7552_v33, %v6442_v38  ;;  %3389 = vmatpush.bf16.msra.mxu3 %v6569_v32  ;;  %v6634_v32 = vld [vmem:[#allocation21 + $0x390] sm:$0xf0] }
 0x24f   :  { %v8492_v9 = vpop.f32.mrf.mxu3 }
 0x250   :  { %3431 = vmatpush.bf16.msrb.mxu2 %v6445_v42 }
 0x251   :  { %v2505_v46 = vpop.f32.mrf.mxu0 }
 0x252   :  { %v8490_v55 = vpop.f32.mrf.mxu1  ;;  %v2506_v56 = vadd.f32 %v2505_v46, %v2463_v62  ;;  %v6272_v62 = vld [vmem:[#allocation21 + $0xa8] sm:$0xf]  ;;  %v6682_v46 = vld [vmem:[#allocation21 + $0x3f0] sm:$0xf0] }
 0x253   :  { %v6273_v39 = vor.u32 %v7511_v4, %v6272_v62  ;;  %v6416_v4 = vld [vmem:[#allocation21 + $0x1c8] sm:$0xf] }
 0x254   :  { %v2554_v0 = vmax.f32 %v2506_v56, 0.0 }
 0x256   :  { %v8494_v11 = vpack.c.bf16 %v2554_v0, %v2550_v54  ;;  %v6685_v54 = vor.u32 %v7612_v43, %v6682_v46  ;;  %v6669_v0 = vor.u32 %v7608_v59, %v6666_v60  ;;  %v6417_v43 = vor.u32 %v7547_v28, %v6416_v4  ;;  %v6208_v46 = vld [vmem:[#allocation21 + $0x28] sm:$0xf]  ;;  %v6618_v59 = vld [vmem:[#allocation21 + $0x370] sm:$0xf0] }
 0x257   :  { %v8500_v57 = vpop.f32.mrf.mxu3  ;;  %v1566_v60 = vperm.slane %v8440_v41, 2  ;;  %v1567_v4 = vperm.slane %v8440_v41, 3 }
 0x258   :  { %3348 = vmatmul.bf16.vlgmr.msra.gmra.mxu0 %v8494_v11  ;;  %3438 = vmatpush.bf16.msrb.mxu3 %v6685_v54  ;;  %v7543_v54 = vld [vmem:[#allocation21 + $0x1b4] sm:$0xf0] }
 0x259   :  { %3452 = vmatpush.bf16.msra.mxu0 %v6305_v5  ;;  %v6240_v5 = vld [vmem:[#allocation21 + $0x68] sm:$0xf] }
 0x25a   :  { %v2517_v26 = vpop.f32.mrf.mxu1  ;;  %v6241_v21 = vor.u32 %v7503_v49, %v6240_v5  ;;  %v6401_v5 = vor.u32 %v7543_v54, %v6400_v12  ;;  %v6192_v49 = vld [vmem:[#allocation21 + $0x8] sm:$0xf]  ;;  %v2336_v12 = vadd.f32 %v8465_v15, %v1566_v60 }
 0x25b   :  { %v2518_v56 = vadd.f32 %v2517_v26, %v2464_v44  ;;  %v7499_v26 = vld [vmem:[#allocation21 + $0x54] sm:$0xf0]  ;;  %v6352_v15 = vld [vmem:[#allocation21 + $0x148] sm:$0xf] }
 0x25c   :  { %3439 = vmatpush.bf16.msrb.mxu3 %v6669_v0  ;;  %v6225_v33 = vor.u32 %v7499_v26, %v6224_v25  ;;  %v2465_v25 = vperm.slane %v8481_v45, 2 }
 0x25d   :  { %3453 = vmatpush.bf16.msra.mxu0 %v6289_v24  ;;  %v2551_v8 = vmax.f32 %v2518_v56, 0.0  ;;  %v6433_v24 = vor.u32 %v7551_v16, %v6432_v50  ;;  %v7596_v56 = vld [vmem:[#allocation21 + $0x364] sm:$0xf]  ;;  %v7539_v50 = vld [vmem:[#allocation21 + $0x194] sm:$0xf0] }
 0x25e   :  { %v6621_v0 = vor.u32 %v7596_v56, %v6618_v59  ;;  %v7517_v16 = vld [vmem:[#allocation21 + $0xec] sm:$0xf]  ;;  %v7588_v56 = vld [vmem:[#allocation21 + $0x324] sm:$0xf]  ;;  %v6586_v59 = vld [vmem:[#allocation21 + $0x330] sm:$0xf0] }
 0x25f   :  { %v8511_v42 = vpop.f32.mrf.mxu3 }
 0x260   :  { %3440 = vmatpush.bf16.msrb.mxu3 %v6653_v22  ;;  %v6602_v22 = vld [vmem:[#allocation21 + $0x350] sm:$0xf0] }
 0x261   :  { %v8502_v58 = vpop.f32.mrf.mxu2  ;;  %3454 = vmatpush.bf16.msra.mxu0 %v6273_v39  ;;  %v1565_v39 = vperm.slane %v8440_v41, 1 }
 0x262   :  { %v2519_v1 = vpop.f32.mrf.mxu1 }
 0x263   :  { %v2520_v48 = vadd.f32 %v2519_v1, %v2464_v44  ;;  %v7600_v44 = vld [vmem:[#allocation21 + $0x384] sm:$0xf]  ;;  %v2278_v1 = vadd.f32 %v8449_v6, %v1565_v39 }
 0x264   :  { %v6637_v38 = vor.u32 %v7600_v44, %v6634_v32  ;;  %v6309_v44 = vor.u32 %v7517_v16, %v6306_v17  ;;  %v6368_v32 = vld [vmem:[#allocation21 + $0x168] sm:$0xf] }
 0x265   :  { %v2555_v20 = vmax.f32 %v2520_v48, 0.0  ;;  %3455 = vmatpush.bf16.msra.mxu0 %v6257_v63  ;;  %v6209_v63 = vor.u32 %v7495_v47, %v6208_v46  ;;  %v6384_v48 = vld [vmem:[#allocation21 + $0x188] sm:$0xf]  ;;  %v2292_v18 = vadd.f32 %v8455_v34, %v2278_v1  ;;  %v6290_v46 = vld [vmem:[#allocation21 + $0xd8] sm:$0xf0]  ;;  %v2280_v47 = vadd.f32 %v8453_v23, %v1565_v39 }
 0x266   :  { %3441 = vmatpush.bf16.msrb.mxu3 %v6637_v38  ;;  %v6385_v28 = vor.u32 %v7539_v50, %v6384_v48  ;;  %v7535_v38 = vld [vmem:[#allocation21 + $0x174] sm:$0xf0]  ;;  %v7509_v1 = vld [vmem:[#allocation21 + $0xac] sm:$0xf]  ;;  %v7584_v50 = vld [vmem:[#allocation21 + $0x304] sm:$0xf] }
 0x267   :  { %v8504_v62 = vpack.c.bf16 %v2555_v20, %v2551_v8  ;;  %v7491_v8 = vld [vmem:[#allocation21 + $0x14] sm:$0xf0]  ;;  %v2306_v34 = vadd.f32 %v8471_v36, %v2292_v18  ;;  %v8526_v54 = vpop.f32.mrf.mxu3 }
 0x268   :  { %3404 = vmatmul.bf16.vlgmr.msrb.gmra.mxu0 %v8494_v11  ;;  %v6193_v6 = vor.u32 %v7491_v8, %v6192_v49  ;;  %v2294_v49 = vadd.f32 %v8461_v7, %v2280_v47  ;;  %v2350_v8 = vadd.f32 %v8475_v2, %v2336_v12 }
 0x269   :  { %v8506_v10 = vpop.f32.mrf.mxu2  ;;  %3362 = vmatmul.bf16.vlgmr.msra.gmra.mxu1 %v8504_v62  ;;  %3456 = vmatpush.bf16.msra.mxu0 %v6241_v21  ;;  %v7592_v21 = vld [vmem:[#allocation21 + $0x344] sm:$0xf]  ;;  %v2320_v36 = vadd.f32 %v8492_v9, %v2306_v34  ;;  %v7531_v9 = vld [vmem:[#allocation21 + $0x154] sm:$0xf0] }
 0x26a   :  { %3466 = vmatpush.bf16.msra.mxu1 %v6433_v24  ;;  %3442 = vmatpush.bf16.msrb.mxu3 %v6621_v0  ;;  %v2334_v24 = vadd.f32 %v8459_v51, %v1566_v60  ;;  %v6605_v26 = vor.u32 %v7592_v21, %v6602_v22  ;;  %v2224_v51 = vadd.f32 %v8443_v53, %v1564_v52  ;;  %v7527_v21 = vld [vmem:[#allocation21 + $0x134] sm:$0xf0] }
 0x26b   :  { %v6589_v0 = vor.u32 %v7588_v56, %v6586_v59  ;;  %v2390_v52 = vadd.f32 %v8469_v31, %v1567_v4  ;;  %v6369_v53 = vor.u32 %v7535_v38, %v6368_v32  ;;  %v2264_v60 = vadd.f32 %v8477_v3, %v8457_v35  ;;  %v6560_v3 = vld [vmem:[#allocation21 + $0x2e8] sm:$0xf] }
 0x26c   :  { %v2238_v39 = vadd.f32 %v8451_v40, %v2224_v51  ;;  %v6570_v40 = vld [vmem:[#allocation21 + $0x310] sm:$0xf0]  ;;  %v2437_v16 = vmul.f32 %v2320_v36, %v2320_v36  ;;  %v2308_v7 = vadd.f32 %v8479_v13, %v2294_v49  ;;  %v6353_v2 = vor.u32 %v7531_v9, %v6352_v15  ;;  %v7579_v51 = vld [vmem:[#allocation21 + $0x2d4] sm:$0xf0]  ;;  %v6528_v15 = vld [vmem:[#allocation21 + $0x2a8] sm:$0xf] }
 0x26d   :  { %3457 = vmatpush.bf16.msra.mxu0 %v6225_v33  ;;  %v2348_v33 = vadd.f32 %v8467_v30, %v2334_v24  ;;  %v2404_v31 = vadd.f32 %v8483_v27, %v2390_v52  ;;  %v6573_v18 = vor.u32 %v7584_v50, %v6570_v40  ;;  %v2436_v22 = vmul.f32 %v2264_v60, %v2264_v60  ;;  %v7523_v36 = vld [vmem:[#allocation21 + $0x114] sm:$0xf0]  ;;  %v7549_v52 = vld [vmem:[#allocation21 + $0x1ec] sm:$0xf]  ;;  %v6226_v49 = vld [vmem:[#allocation21 + $0x58] sm:$0xf0] }
 0x26e   :  { %3467 = vmatpush.bf16.msra.mxu1 %v6417_v43  ;;  %v7513_v43 = vld [vmem:[#allocation21 + $0xcc] sm:$0xf]  ;;  %3443 = vmatpush.bf16.msrb.mxu3 %v6605_v26  ;;  %v2364_v32 = vadd.f32 %v8496_v19, %v2350_v8  ;;  %v2322_v13 = vadd.f32 %v8500_v57, %v2308_v7  ;;  %v6320_v19 = vld [vmem:[#allocation21 + $0x108] sm:$0xf]  ;;  %v6210_v7 = vld [vmem:[#allocation21 + $0x38] sm:$0xf0] }
 0x26f   :  { %v2362_v30 = vadd.f32 %v8488_v37, %v2348_v33  ;;  %v6293_v23 = vor.u32 %v7513_v43, %v6290_v46  ;;  %v6544_v46 = vld [vmem:[#allocation21 + $0x2c8] sm:$0xf]  ;;  %v2444_v47 = vadd.f32 %v2437_v16, %v2436_v22 }
 0x270   :  { %v2378_v59 = vadd.f32 %v8526_v54, %v2364_v32  ;;  %v6545_v41 = vor.u32 %v7579_v51, %v6544_v46  ;;  %v6512_v16 = vld [vmem:[#allocation21 + $0x288] sm:$0xf]  ;;  %v2466_v51 = vperm.slane %v8481_v45, 3 }
 0x271   :  { %v2531_v20 = vpop.f32.mrf.mxu2  ;;  %3458 = vmatpush.bf16.msra.mxu0 %v6209_v63  ;;  %v2376_v37 = vadd.f32 %v8511_v42, %v2362_v30  ;;  %v7583_v42 = vld [vmem:[#allocation21 + $0x2f4] sm:$0xf0]  ;;  %v6496_v22 = vld [vmem:[#allocation21 + $0x268] sm:$0xf] }
 0x272   :  { %3468 = vmatpush.bf16.msra.mxu1 %v6401_v5  ;;  %v2532_v63 = vadd.f32 %v2531_v20, %v2465_v25  ;;  %v6274_v5 = vld [vmem:[#allocation21 + $0xb8] sm:$0xf0]  ;;  %3444 = vmatpush.bf16.msrb.mxu3 %v6589_v0  ;;  %v6336_v20 = vld [vmem:[#allocation21 + $0x128] sm:$0xf]  ;;  %v6561_v34 = vor.u32 %v7583_v42, %v6560_v3 }
 0x273   :  { %v6277_v27 = vor.u32 %v7509_v1, %v6274_v5  ;;  %v2438_v24 = vmul.f32 %v2376_v37, %v2376_v37  ;;  %v6242_v0 = vld [vmem:[#allocation21 + $0x78] sm:$0xf0]  ;;  %v2442_v37 = vmul.f32 %v2378_v59, %v2378_v59  ;;  %v7497_v5 = vld [vmem:[#allocation21 + $0x4c] sm:$0xf]  ;;  %v6448_v45 = vld [vmem:[#allocation21 + $0x208] sm:$0xf] }
 0x274   :  { %v2552_v17 = vmax.f32 %v2532_v63, 0.0  ;;  %v7501_v63 = vld [vmem:[#allocation21 + $0x6c] sm:$0xf] }
 0x275   :  { %3459 = vmatpush.bf16.msra.mxu0 %v6193_v6  ;;  %v2418_v6 = vadd.f32 %v8502_v58, %v2404_v31  ;;  %v2392_v58 = vadd.f32 %v8473_v61, %v1567_v4  ;;  %v2445_v30 = vadd.f32 %v2444_v47, %v2438_v24  ;;  %v6434_v61 = vld [vmem:[#allocation21 + $0x1f8] sm:$0xf0]  ;;  %v6245_v54 = vor.u32 %v7501_v63, %v6242_v0  ;;  %v7567_v24 = vld [vmem:[#allocation21 + $0x274] sm:$0xf0]  ;;  %v7529_v63 = vld [vmem:[#allocation21 + $0x14c] sm:$0xf] }
 0x276   :  { %3469 = vmatpush.bf16.msra.mxu1 %v6385_v28  ;;  %v7505_v28 = vld [vmem:[#allocation21 + $0x8c] sm:$0xf]  ;;  %3445 = vmatpush.bf16.msrb.mxu3 %v6573_v18  ;;  %v6437_v1 = vor.u32 %v7549_v52, %v6434_v61  ;;  %v6497_v32 = vor.u32 %v7567_v24, %v6496_v22  ;;  %v6354_v0 = vld [vmem:[#allocation21 + $0x158] sm:$0xf0]  ;;  %v7555_v52 = vld [vmem:[#allocation21 + $0x214] sm:$0xf0] }
 0x277   :  { %v2406_v4 = vadd.f32 %v8490_v55, %v2392_v58  ;;  %v7545_v55 = vld [vmem:[#allocation21 + $0x1cc] sm:$0xf]  ;;  %v6688_v61 = vld [vmem:[#allocation21 + $0x3e8] sm:$0xf] }
 0x278   :  { %3460 = vmatmul.bf16.vlgmr.msra.gmra.mxu0 %v8494_v11  ;;  %v7493_v18 = vld [vmem:[#allocation21 + $0x2c] sm:$0xf] }
 0x279   :  { %3508 = vmatpush.bf16.msrb.mxu0 %v6309_v44  ;;  %v2533_v48 = vpop.f32.mrf.mxu2  ;;  %3418 = vmatmul.bf16.vlgmr.msrb.gmra.mxu1 %v8504_v62  ;;  %v2252_v44 = vadd.f32 %v8463_v14, %v2238_v39  ;;  %v6337_v14 = vor.u32 %v7527_v21, %v6336_v20  ;;  %v7575_v39 = vld [vmem:[#allocation21 + $0x2b4] sm:$0xf0]  ;;  %v2420_v9 = vadd.f32 %v8506_v10, %v2406_v4  ;;  %v6402_v20 = vld [vmem:[#allocation21 + $0x1b8] sm:$0xf0] }
 0x27a   :  { %v2534_v35 = vadd.f32 %v2533_v48, %v2465_v25  ;;  %3470 = vmatpush.bf16.msra.mxu1 %v6369_v53  ;;  %v6258_v25 = vld [vmem:[#allocation21 + $0x98] sm:$0xf0]  ;;  %v2441_v53 = vmul.f32 %v2322_v13, %v2322_v13  ;;  %v6529_v31 = vor.u32 %v7575_v39, %v6528_v15  ;;  %v6480_v13 = vld [vmem:[#allocation21 + $0x248] sm:$0xf]  ;;  %v7615_v4 = vld [vmem:[#allocation21 + $0x3f4] sm:$0xf0] }
 0x27b   :  { %v6261_v12 = vor.u32 %v7505_v28, %v6258_v25  ;;  %v2266_v56 = vadd.f32 %v8486_v29, %v2252_v44  ;;  %v6321_v29 = vor.u32 %v7523_v36, %v6320_v19  ;;  %v6418_v48 = vld [vmem:[#allocation21 + $0x1d8] sm:$0xf0]  ;;  %v7489_v28 = vld [vmem:[#allocation21 + $0xc] sm:$0xf]  ;;  %v6464_v19 = vld [vmem:[#allocation21 + $0x228] sm:$0xf] }
 0x27c   :  { %v2556_v26 = vmax.f32 %v2534_v35, 0.0  ;;  %v6229_v35 = vor.u32 %v7497_v5, %v6226_v49  ;;  %v6421_v42 = vor.u32 %v7545_v55, %v6418_v48  ;;  %v6194_v25 = vld [vmem:[#allocation21 + $0x18] sm:$0xf0]  ;;  %v6672_v49 = vld [vmem:[#allocation21 + $0x3c8] sm:$0xf] }
 0x27d   :  { %3509 = vmatpush.bf16.msrb.mxu0 %v6293_v23  ;;  %v2440_v60 = vmul.f32 %v2266_v56, %v2266_v56  ;;  %v6197_v46 = vor.u32 %v7489_v28, %v6194_v25  ;;  %v7559_v56 = vld [vmem:[#allocation21 + $0x234] sm:$0xf0]  ;;  %v7565_v28 = vld [vmem:[#allocation21 + $0x26c] sm:$0xf]  ;;  %v6498_v25 = vld [vmem:[#allocation21 + $0x278] sm:$0xf0] }
 0x27e   :  { %v8547_v38 = vpack.c.bf16 %v2556_v26, %v2552_v17  ;;  %3471 = vmatpush.bf16.msra.mxu1 %v6353_v2  ;;  %v7571_v17 = vld [vmem:[#allocation21 + $0x294] sm:$0xf0]  ;;  %v6465_v36 = vor.u32 %v7559_v56, %v6464_v19  ;;  %v6576_v56 = vld [vmem:[#allocation21 + $0x308] sm:$0xf] }
 0x27f   :  { %v2431_v33 = vpop.f32.mrf.mxu3  ;;  %v2449_v50 = vadd.f32 %v2441_v53, %v2440_v60  ;;  %v6513_v2 = vor.u32 %v7571_v17, %v6512_v16  ;;  %v7581_v53 = vld [vmem:[#allocation21 + $0x2ec] sm:$0xf]  ;;  %v6689_v60 = vor.u32 %v7615_v4, %v6688_v61  ;;  %v6656_v17 = vld [vmem:[#allocation21 + $0x3a8] sm:$0xf]  ;;  %v6674_v61 = vld [vmem:[#allocation21 + $0x3d8] sm:$0xf0] }
 0x280   :  { %v2432_v43 = vadd.f32 %v2431_v33, %v2418_v6  ;;  %3376 = vmatmul.bf16.vlgmr.msra.gmra.mxu2 %v8547_v38  ;;  %v6213_v6 = vor.u32 %v7493_v18, %v6210_v7  ;;  %v7537_v33 = vld [vmem:[#allocation21 + $0x18c] sm:$0xf] }
 0x281   :  { %3510 = vmatpush.bf16.msrb.mxu0 %v6277_v27  ;;  %3480 = vmatpush.bf16.msra.mxu2 %v6561_v34  ;;  %v2450_v10 = vadd.f32 %v2449_v50, %v2442_v37  ;;  %v7541_v27 = vld [vmem:[#allocation21 + $0x1ac] sm:$0xf]  ;;  %v6386_v34 = vld [vmem:[#allocation21 + $0x198] sm:$0xf0] }
 0x282   :  { %v2439_v57 = vmul.f32 %v2432_v43, %v2432_v43  ;;  %3472 = vmatpush.bf16.msra.mxu1 %v6337_v14  ;;  %v6405_v26 = vor.u32 %v7541_v27, %v6402_v20  ;;  %v7563_v43 = vld [vmem:[#allocation21 + $0x254] sm:$0xf0]  ;;  %v6389_v47 = vor.u32 %v7537_v33, %v6386_v34  ;;  %v7533_v14 = vld [vmem:[#allocation21 + $0x16c] sm:$0xf]  ;;  %v6608_v33 = vld [vmem:[#allocation21 + $0x348] sm:$0xf] }
 0x283   :  { %v6481_v58 = vor.u32 %v7563_v43, %v6480_v13  ;;  %v7525_v37 = vld [vmem:[#allocation21 + $0x12c] sm:$0xf]  ;;  %v7603_v27 = vld [vmem:[#allocation21 + $0x394] sm:$0xf0]  ;;  %v6482_v43 = vld [vmem:[#allocation21 + $0x258] sm:$0xf0] }
 0x284   :  { %v2446_v23 = vadd.f32 %v2445_v30, %v2439_v57  ;;  %v7521_v50 = vld [vmem:[#allocation21 + $0x10c] sm:$0xf]  ;;  %v7595_v34 = vld [vmem:[#allocation21 + $0x354] sm:$0xf0] }
 0x285   :  { %3511 = vmatpush.bf16.msrb.mxu0 %v6261_v12  ;;  %3481 = vmatpush.bf16.msra.mxu2 %v6545_v41  ;;  %v6370_v12 = vld [vmem:[#allocation21 + $0x178] sm:$0xf0]  ;;  %v7569_v20 = vld [vmem:[#allocation21 + $0x28c] sm:$0xf] }
 0x286   :  { %2447 = vadd.xlane.f32.xlu1 %v2446_v23  ;;  %3473 = vmatpush.bf16.msra.mxu1 %v6321_v29  ;;  %v6373_v57 = vor.u32 %v7533_v14, %v6370_v12  ;;  %v6562_v23 = vld [vmem:[#allocation21 + $0x2f8] sm:$0xf0]  ;;  %v6357_v29 = vor.u32 %v7529_v63, %v6354_v0  ;;  %v7561_v13 = vld [vmem:[#allocation21 + $0x24c] sm:$0xf] }
 0x287   :  { %v2433_v8 = vpop.f32.mrf.mxu3  ;;  %v6565_v5 = vor.u32 %v7581_v53, %v6562_v23  ;;  %v7557_v14 = vld [vmem:[#allocation21 + $0x22c] sm:$0xf]  ;;  %v6690_v63 = vld [vmem:[#allocation21 + $0x3f8] sm:$0xf0] }
 0x288   :  { %v2434_v40 = vadd.f32 %v2433_v8, %v2420_v9  ;;  %v6338_v9 = vld [vmem:[#allocation21 + $0x138] sm:$0xf0]  ;;  %v7611_v8 = vld [vmem:[#allocation21 + $0x3d4] sm:$0xf0]  ;;  %v7605_v53 = vld [vmem:[#allocation21 + $0x3ac] sm:$0xf] }
 0x289   :  { %3512 = vmatpush.bf16.msrb.mxu0 %v6245_v54  ;;  %3482 = vmatpush.bf16.msra.mxu2 %v6529_v31  ;;  %v6449_v54 = vor.u32 %v7555_v52, %v6448_v45  ;;  %v6546_v31 = vld [vmem:[#allocation21 + $0x2d8] sm:$0xf0]  ;;  %v6341_v55 = vor.u32 %v7525_v37, %v6338_v9  ;;  %v6673_v48 = vor.u32 %v7611_v8, %v6672_v49  ;;  %v7609_v52 = vld [vmem:[#allocation21 + $0x3cc] sm:$0xf] }
 0x28a   :  { %v2443_v3 = vmul.f32 %v2434_v40, %v2434_v40  ;;  %3522 = vmatpush.bf16.msrb.mxu1 %v6437_v1  ;;  %v6322_v40 = vld [vmem:[#allocation21 + $0x118] sm:$0xf0]  ;;  %v6677_v4 = vor.u32 %v7609_v52, %v6674_v61  ;;  %v7710_v52 = vld [vmem:[#allocation24 + $0x2ec] sm:$0xf0]  ;;  %v7640_v61 = vld [vmem:[#allocation24 + $0xc4] sm:$0xf] }
 0x28b   :  { %3474 = vmatmul.bf16.vlgmr.msra.gmra.mxu1 %v8504_v62  ;;  %v6658_v23 = vld [vmem:[#allocation21 + $0x3b8] sm:$0xf0] }
 0x28c   :  { %v2451_v21 = vadd.f32 %v2450_v10, %v2443_v3  ;;  %v7573_v3 = vld [vmem:[#allocation21 + $0x2ac] sm:$0xf]  ;;  %v6325_v10 = vor.u32 %v7521_v50, %v6322_v40  ;;  %v6626_v37 = vld [vmem:[#allocation21 + $0x378] sm:$0xf0]  ;;  %v6808_v50 = vld [vmem:[#allocation24 + $0xe0] sm:$0xf] }
 0x28d   :  { %3513 = vmatpush.bf16.msrb.mxu0 %v6229_v35  ;;  %3483 = vmatpush.bf16.msra.mxu2 %v6513_v2  ;;  %v7607_v35 = vld [vmem:[#allocation21 + $0x3b4] sm:$0xf0]  ;;  %v6640_v2 = vld [vmem:[#allocation21 + $0x388] sm:$0xf]  ;;  %v6610_v49 = vld [vmem:[#allocation21 + $0x358] sm:$0xf0] }
 0x28e   :  { %3523 = vmatpush.bf16.msrb.mxu1 %v6421_v42  ;;  %2452 = vadd.xlane.f32.xlu1 %v2451_v21  ;;  %v6530_v42 = vld [vmem:[#allocation21 + $0x2b8] sm:$0xf0]  ;;  %v6657_v18 = vor.u32 %v7607_v35, %v6656_v17  ;;  %v6641_v22 = vor.u32 %v7603_v27, %v6640_v2  ;;  %v7646_v40 = vld [vmem:[#allocation24 + $0xec] sm:$0xf0]  ;;  %v6792_v35 = vld [vmem:[#allocation24 + $0xc0] sm:$0xf] }
 0x28f   :  { %v2545_v44 = vpop.f32.mrf.mxu3  ;;  %v6533_v7 = vor.u32 %v7573_v3, %v6530_v42  ;;  %v6514_v21 = vld [vmem:[#allocation21 + $0x298] sm:$0xf0]  ;;  %v7642_v3 = vld [vmem:[#allocation24 + $0xcc] sm:$0xf0]  ;;  %v6760_v2 = vld [vmem:[#allocation24 + $0x80] sm:$0xf] }
 0x290   :  { %3432 = vmatmul.bf16.vlgmr.msrb.gmra.mxu2 %v8547_v38  ;;  %v2546_v59 = vadd.f32 %v2545_v44, %v2466_v51  ;;  %v6517_v24 = vor.u32 %v7569_v20, %v6514_v21  ;;  %v6793_v42 = vor.u32 %v7642_v3, %v6792_v35  ;;  %v7634_v27 = vld [vmem:[#allocation24 + $0x8c] sm:$0xf0]  ;;  %v6744_v21 = vld [vmem:[#allocation24 + $0x60] sm:$0xf] }
 0x291   :  { %3514 = vmatpush.bf16.msrb.mxu0 %v6213_v6  ;;  %3484 = vmatpush.bf16.msra.mxu2 %v6497_v32  ;;  %v6624_v6 = vld [vmem:[#allocation21 + $0x368] sm:$0xf]  ;;  %v6501_v32 = vor.u32 %v7565_v28, %v6498_v25  ;;  %v6761_v20 = vor.u32 %v7634_v27, %v6760_v2  ;;  %v6728_v25 = vld [vmem:[#allocation24 + $0x40] sm:$0xf]  ;;  %v7650_v35 = vld [vmem:[#allocation24 + $0x10c] sm:$0xf0] }
 0x292   :  { %3524 = vmatpush.bf16.msrb.mxu1 %v6405_v26  ;;  %v2553_v15 = vmax.f32 %v2546_v59, 0.0  ;;  %v7599_v26 = vld [vmem:[#allocation21 + $0x374] sm:$0xf0]  ;;  %v7016_v3 = vld [vmem:[#allocation24 + $0x280] sm:$0xf] }
 0x293   :  { %v6625_v44 = vor.u32 %v7599_v26, %v6624_v6  ;;  %v7587_v59 = vld [vmem:[#allocation21 + $0x314] sm:$0xf0]  ;;  %v7678_v26 = vld [vmem:[#allocation24 + $0x1ec] sm:$0xf0] }
 0x294   :  { %v6577_v0 = vor.u32 %v7587_v59, %v6576_v56  ;;  %v7666_v56 = vld [vmem:[#allocation24 + $0x18c] sm:$0xf0]  ;;  %v7644_v59 = vld [vmem:[#allocation24 + $0xe4] sm:$0xf] }
 0x295   :  { %3515 = vmatpush.bf16.msrb.mxu0 %v6197_v46  ;;  %3485 = vmatpush.bf16.msra.mxu2 %v6481_v58  ;;  %v6609_v46 = vor.u32 %v7595_v34, %v6608_v33  ;;  %v7591_v58 = vld [vmem:[#allocation21 + $0x334] sm:$0xf0]  ;;  %v6920_v33 = vld [vmem:[#allocation24 + $0x1c0] sm:$0xf]  ;;  %v7674_v34 = vld [vmem:[#allocation24 + $0x1cc] sm:$0xf0] }
 0x296   :  { %3525 = vmatpush.bf16.msrb.mxu1 %v6389_v47  ;;  %v6592_v47 = vld [vmem:[#allocation21 + $0x328] sm:$0xf] }
 0x297   :  { %v2547_v30 = vpop.f32.mrf.mxu3  ;;  %v6593_v12 = vor.u32 %v7591_v58, %v6592_v47  ;;  %v7670_v47 = vld [vmem:[#allocation24 + $0x1ac] sm:$0xf0] }
 0x298   :  { %v2548_v41 = vadd.f32 %v2547_v30, %v2466_v51  ;;  %3516 = vmatmul.bf16.vlgmr.msrb.gmra.mxu0 %v8494_v11  ;;  %v7577_v11 = vld [vmem:[#allocation21 + $0x2cc] sm:$0xf]  ;;  %v6485_v51 = vor.u32 %v7561_v13, %v6482_v43  ;;  %v6450_v30 = vld [vmem:[#allocation21 + $0x218] sm:$0xf0]  ;;  %v6712_v13 = vld [vmem:[#allocation24 + $0x20] sm:$0xf] }
 0x299   :  { %3486 = vmatpush.bf16.msra.mxu2 %v6465_v36  ;;  %v6549_v16 = vor.u32 %v7577_v11, %v6546_v31  ;;  %v7613_v36 = vld [vmem:[#allocation21 + $0x3ec] sm:$0xf]  ;;  %v6594_v31 = vld [vmem:[#allocation21 + $0x338] sm:$0xf0]  ;;  %v7622_v43 = vld [vmem:[#allocation24 + $0x2c] sm:$0xf0] }
 0x29a   :  { %v2557_v39 = vmax.f32 %v2548_v41, 0.0  ;;  %3526 = vmatpush.bf16.msrb.mxu1 %v6373_v57  ;;  %v7553_v57 = vld [vmem:[#allocation21 + $0x20c] sm:$0xf]  ;;  %v6693_v41 = vor.u32 %v7613_v36, %v6690_v63  ;;  %v6872_v63 = vld [vmem:[#allocation24 + $0x160] sm:$0xf] }
 0x29b   :  { %v6453_v45 = vor.u32 %v7553_v57, %v6450_v30  ;;  %v7589_v11 = vld [vmem:[#allocation21 + $0x32c] sm:$0xf]  ;;  %v6810_v57 = vld [vmem:[#allocation24 + $0xf0] sm:$0xf0] }
 0x29c   :  { %v8561_v1 = vpack.c.bf16 %v2557_v39, %v2553_v15  ;;  %v6661_v15 = vor.u32 %v7605_v53, %v6658_v23  ;;  %v7601_v39 = vld [vmem:[#allocation21 + $0x38c] sm:$0xf]  ;;  %v6813_v36 = vor.u32 %v7644_v59, %v6810_v57  ;;  %v6794_v53 = vld [vmem:[#allocation24 + $0xd0] sm:$0xf0]  ;;  %v6856_v23 = vld [vmem:[#allocation24 + $0x140] sm:$0xf] }
 0x29d   :  { %3487 = vmatpush.bf16.msra.mxu2 %v6449_v54  ;;  %v7616_v59 = vld [vmem:[#allocation24 + $0x4] sm:$0xf]  ;;  %v6698_v57 = vld [vmem:[#allocation24 + $0x10] sm:$0xf0] }
 0x29e   :  { %3527 = vmatpush.bf16.msrb.mxu1 %v6357_v29  ;;  %3390 = vmatmul.bf16.vlgmr.msra.gmra.mxu3 %v8561_v1  ;;  %v6642_v29 = vld [vmem:[#allocation21 + $0x398] sm:$0xf0] }
 0x29f   :  { %3494 = vmatpush.bf16.msra.mxu3 %v6689_v60  ;;  %v6645_v54 = vor.u32 %v7601_v39, %v6642_v29  ;;  %v7597_v60 = vld [vmem:[#allocation21 + $0x36c] sm:$0xf]  ;;  %v6797_v39 = vor.u32 %v7640_v61, %v6794_v53  ;;  %v7048_v29 = vld [vmem:[#allocation24 + $0x2c0] sm:$0xf] }
 0x2a0   :  { %3488 = vmatmul.bf16.vlgmr.msra.gmra.mxu2 %v8547_v38  ;;  %v6629_v9 = vor.u32 %v7597_v60, %v6626_v37  ;;  %v7636_v60 = vld [vmem:[#allocation24 + $0xa4] sm:$0xf]  ;;  %v7192_v61 = vld [vmem:[#allocation24 + $0x3e0] sm:$0xf] }
 0x2a1   :  { %3536 = vmatpush.bf16.msrb.mxu2 %v6565_v5  ;;  %v7593_v5 = vld [vmem:[#allocation21 + $0x34c] sm:$0xf] }
 0x2a2   :  { %3528 = vmatpush.bf16.msrb.mxu1 %v6341_v55  ;;  %v6613_v8 = vor.u32 %v7593_v5, %v6610_v49  ;;  %v6597_v55 = vor.u32 %v7589_v11, %v6594_v31  ;;  %v6778_v5 = vld [vmem:[#allocation24 + $0xb0] sm:$0xf0]  ;;  %v7654_v11 = vld [vmem:[#allocation24 + $0x12c] sm:$0xf0]  ;;  %v7032_v31 = vld [vmem:[#allocation24 + $0x2a0] sm:$0xf] }
 0x2a3   :  { %3495 = vmatpush.bf16.msra.mxu3 %v6673_v48  ;;  %v7585_v48 = vld [vmem:[#allocation21 + $0x30c] sm:$0xf]  ;;  %v6781_v49 = vor.u32 %v7636_v60, %v6778_v5  ;;  %v7708_v60 = vld [vmem:[#allocation24 + $0x2e4] sm:$0xf] }
 0x2a5   :  { %3537 = vmatpush.bf16.msrb.mxu2 %v6549_v16  ;;  %v6809_v16 = vor.u32 %v7646_v40, %v6808_v50  ;;  %v6762_v50 = vld [vmem:[#allocation24 + $0x90] sm:$0xf0] }
 0x2a6   :  { %3529 = vmatpush.bf16.msrb.mxu1 %v6325_v10  ;;  %v6776_v10 = vld [vmem:[#allocation24 + $0xa0] sm:$0xf] }
 0x2a7   :  { %3496 = vmatpush.bf16.msra.mxu3 %v6657_v18  ;;  %4354 = vmatpush.bf16.msra.mxu0 %v6809_v16  ;;  %v7638_v18 = vld [vmem:[#allocation24 + $0xac] sm:$0xf0] }
 0x2a9   :  { %3538 = vmatpush.bf16.msrb.mxu2 %v6533_v7  ;;  %3530 = vmatmul.bf16.vlgmr.msrb.gmra.mxu1 %v8504_v62  ;;  %v6466_v62 = vld [vmem:[#allocation21 + $0x238] sm:$0xf0]  ;;  %v6777_v7 = vor.u32 %v7638_v18, %v6776_v10  ;;  %v7698_v10 = vld [vmem:[#allocation24 + $0x28c] sm:$0xf0]  ;;  %v7628_v18 = vld [vmem:[#allocation24 + $0x64] sm:$0xf] }
 0x2aa   :  { %v6469_v19 = vor.u32 %v7557_v14, %v6466_v62  ;;  %v6696_v14 = vld [vmem:[#allocation24] sm:$0xf]  ;;  %v7618_v62 = vld [vmem:[#allocation24 + $0xc] sm:$0xf0]  ;;  %v7017_v2 = vor.u32 %v7698_v10, %v7016_v3  ;;  %v7652_v10 = vld [vmem:[#allocation24 + $0x124] sm:$0xf] }
 0x2ab   :  { %3497 = vmatpush.bf16.msra.mxu3 %v6641_v22  ;;  %4355 = vmatpush.bf16.msra.mxu0 %v6793_v42  ;;  %v7630_v22 = vld [vmem:[#allocation24 + $0x6c] sm:$0xf0] }
 0x2ac   :  { %v6745_v6 = vor.u32 %v7630_v22, %v6744_v21  ;;  %v6938_v21 = vld [vmem:[#allocation24 + $0x1f0] sm:$0xf0] }
 0x2ad   :  { %3539 = vmatpush.bf16.msrb.mxu2 %v6517_v24  ;;  %v6936_v24 = vld [vmem:[#allocation24 + $0x1e0] sm:$0xf] }
 0x2ae   :  { %3446 = vmatmul.bf16.vlgmr.msrb.gmra.mxu3 %v8561_v1  ;;  %v6937_v28 = vor.u32 %v7678_v26, %v6936_v24  ;;  %v7000_v24 = vld [vmem:[#allocation24 + $0x260] sm:$0xf] }
 0x2af   :  { %3498 = vmatpush.bf16.msra.mxu3 %v6625_v44  ;;  %4356 = vmatpush.bf16.msra.mxu0 %v6777_v7  ;;  %v7626_v44 = vld [vmem:[#allocation24 + $0x4c] sm:$0xf0]  ;;  %v6746_v7 = vld [vmem:[#allocation24 + $0x70] sm:$0xf0] }
 0x2b0   :  { %4368 = vmatpush.bf16.msra.mxu1 %v6937_v28  ;;  %v6749_v27 = vor.u32 %v7628_v18, %v6746_v7  ;;  %v7624_v28 = vld [vmem:[#allocation24 + $0x44] sm:$0xf]  ;;  %v6842_v18 = vld [vmem:[#allocation24 + $0x130] sm:$0xf0] }
 0x2b1   :  { %3540 = vmatpush.bf16.msrb.mxu2 %v6501_v32  ;;  %v6729_v32 = vor.u32 %v7626_v44, %v6728_v25  ;;  %v6730_v25 = vld [vmem:[#allocation24 + $0x50] sm:$0xf0]  ;;  %v7672_v44 = vld [vmem:[#allocation24 + $0x1c4] sm:$0xf] }
 0x2b2   :  { %v7700_v7 = vld [vmem:[#allocation24 + $0x2a4] sm:$0xf] }
 0x2b3   :  { %3499 = vmatpush.bf16.msra.mxu3 %v6609_v46  ;;  %4357 = vmatpush.bf16.msra.mxu0 %v6761_v20  ;;  %v6904_v46 = vld [vmem:[#allocation24 + $0x1a0] sm:$0xf]  ;;  %v7676_v20 = vld [vmem:[#allocation24 + $0x1e4] sm:$0xf] }
 0x2b4   :  { %v6905_v58 = vor.u32 %v7670_v47, %v6904_v46  ;;  %v6941_v22 = vor.u32 %v7676_v20, %v6938_v21  ;;  %v7620_v46 = vld [vmem:[#allocation24 + $0x24] sm:$0xf]  ;;  %v7034_v20 = vld [vmem:[#allocation24 + $0x2b0] sm:$0xf0] }
 0x2b5   :  { %3541 = vmatpush.bf16.msrb.mxu2 %v6485_v51  ;;  %v6713_v51 = vor.u32 %v7622_v43, %v6712_v13  ;;  %v7690_v13 = vld [vmem:[#allocation24 + $0x24c] sm:$0xf0]  ;;  %v7668_v47 = vld [vmem:[#allocation24 + $0x1a4] sm:$0xf] }
 0x2b7   :  { %3500 = vmatpush.bf16.msra.mxu3 %v6593_v12  ;;  %4358 = vmatpush.bf16.msra.mxu0 %v6745_v6  ;;  %v6888_v12 = vld [vmem:[#allocation24 + $0x180] sm:$0xf]  ;;  %v7694_v6 = vld [vmem:[#allocation24 + $0x26c] sm:$0xf0] }
 0x2b8   :  { %v6889_v30 = vor.u32 %v7666_v56, %v6888_v12  ;;  %v7001_v26 = vor.u32 %v7694_v6, %v7000_v24  ;;  %v6968_v12 = vld [vmem:[#allocation24 + $0x220] sm:$0xf]  ;;  %v7730_v6 = vld [vmem:[#allocation24 + $0x38c] sm:$0xf0] }
 0x2b9   :  { %3542 = vmatpush.bf16.msrb.mxu2 %v6469_v19  ;;  %v6697_v19 = vor.u32 %v7618_v62, %v6696_v14  ;;  %v6906_v14 = vld [vmem:[#allocation24 + $0x1b0] sm:$0xf0]  ;;  %v7144_v24 = vld [vmem:[#allocation24 + $0x380] sm:$0xf] }
 0x2ba   :  { %v6909_v62 = vor.u32 %v7668_v47, %v6906_v14  ;;  %v7692_v14 = vld [vmem:[#allocation24 + $0x264] sm:$0xf] }
 0x2bb   :  { %3501 = vmatpush.bf16.msra.mxu3 %v6577_v0  ;;  %4359 = vmatpush.bf16.msra.mxu0 %v6729_v32  ;;  %v7662_v0 = vld [vmem:[#allocation24 + $0x16c] sm:$0xf0]  ;;  %v6733_v32 = vor.u32 %v7624_v28, %v6730_v25  ;;  %v7145_v28 = vor.u32 %v7730_v6, %v7144_v24  ;;  %v7648_v25 = vld [vmem:[#allocation24 + $0x104] sm:$0xf] }
 0x2bd   :  { %3543 = vmatpush.bf16.msrb.mxu2 %v6453_v45  ;;  %v7064_v45 = vld [vmem:[#allocation24 + $0x2e0] sm:$0xf] }
 0x2be   :  { %3502 = vmatmul.bf16.vlgmr.msra.gmra.mxu3 %v8561_v1 }
 0x2bf   :  { %3550 = vmatpush.bf16.msrb.mxu3 %v6693_v41  ;;  %4360 = vmatpush.bf16.msra.mxu0 %v6713_v51  ;;  %v6873_v41 = vor.u32 %v7662_v0, %v6872_v63  ;;  %v6714_v51 = vld [vmem:[#allocation24 + $0x30] sm:$0xf0] }
 0x2c0   :  { %3544 = vmatmul.bf16.vlgmr.msrb.gmra.mxu2 %v8547_v38  ;;  %v6578_v38 = vld [vmem:[#allocation21 + $0x318] sm:$0xf0]  ;;  %v6890_v63 = vld [vmem:[#allocation24 + $0x190] sm:$0xf0] }
 0x2c1   :  { %v6581_v17 = vor.u32 %v7585_v48, %v6578_v38  ;;  %v7702_v48 = vld [vmem:[#allocation24 + $0x2ac] sm:$0xf0]  ;;  %v7632_v38 = vld [vmem:[#allocation24 + $0x84] sm:$0xf] }
 0x2c2   :  { %v7033_v40 = vor.u32 %v7702_v48, %v7032_v31  ;;  %v6765_v16 = vor.u32 %v7632_v38, %v6762_v50  ;;  %v7656_v31 = vld [vmem:[#allocation24 + $0x144] sm:$0xf]  ;;  %v7050_v50 = vld [vmem:[#allocation24 + $0x2d0] sm:$0xf0] }
 0x2c3   :  { %3551 = vmatpush.bf16.msrb.mxu3 %v6677_v4  ;;  %4361 = vmatpush.bf16.msra.mxu0 %v6697_v19  ;;  %v7065_v4 = vor.u32 %v7710_v52, %v7064_v45  ;;  %v7686_v19 = vld [vmem:[#allocation24 + $0x22c] sm:$0xf0]  ;;  %v7704_v48 = vld [vmem:[#allocation24 + $0x2c4] sm:$0xf] }
 0x2c4   :  { %v6969_v56 = vor.u32 %v7686_v19, %v6968_v12  ;;  %v7682_v52 = vld [vmem:[#allocation24 + $0x20c] sm:$0xf0] }
 0x2c5   :  { %4382 = vmatpush.bf16.msra.mxu2 %v7065_v4 }
 0x2c7   :  { %3552 = vmatpush.bf16.msrb.mxu3 %v6661_v15  ;;  %4410 = vmatpush.bf16.msrb.mxu0 %v6813_v36  ;;  %v7658_v15 = vld [vmem:[#allocation24 + $0x14c] sm:$0xf0]  ;;  %v6701_v36 = vor.u32 %v7616_v59, %v6698_v57  ;;  %v7112_v57 = vld [vmem:[#allocation24 + $0x340] sm:$0xf] }
 0x2c8   :  { %v6857_v37 = vor.u32 %v7658_v15, %v6856_v23  ;;  %v7742_v23 = vld [vmem:[#allocation24 + $0x3ec] sm:$0xf0]  ;;  %v7660_v15 = vld [vmem:[#allocation24 + $0x164] sm:$0xf] }
 0x2cb   :  { %3553 = vmatpush.bf16.msrb.mxu3 %v6645_v54  ;;  %v7706_v54 = vld [vmem:[#allocation24 + $0x2cc] sm:$0xf0]  ;;  %4411 = vmatpush.bf16.msrb.mxu0 %v6797_v39  ;;  %v6874_v39 = vld [vmem:[#allocation24 + $0x170] sm:$0xf0] }
 0x2cf   :  { %3554 = vmatpush.bf16.msrb.mxu3 %v6629_v9  ;;  %v7049_v9 = vor.u32 %v7706_v54, %v7048_v29  ;;  %4412 = vmatpush.bf16.msrb.mxu0 %v6781_v49  ;;  %v7193_v29 = vor.u32 %v7742_v23, %v7192_v61  ;;  %v6877_v54 = vor.u32 %v7660_v15, %v6874_v39  ;;  %v7176_v49 = vld [vmem:[#allocation24 + $0x3c0] sm:$0xf] }
 0x2d0   :  { %v7096_v15 = vld [vmem:[#allocation24 + $0x320] sm:$0xf] }
 0x2d1   :  { %4383 = vmatpush.bf16.msra.mxu2 %v7049_v9 }
 0x2d3   :  { %3555 = vmatpush.bf16.msrb.mxu3 %v6613_v8  ;;  %v6840_v8 = vld [vmem:[#allocation24 + $0x120] sm:$0xf]  ;;  %4413 = vmatpush.bf16.msrb.mxu0 %v6765_v16  ;;  %v7053_v16 = vor.u32 %v7704_v48, %v7050_v50  ;;  %v7714_v48 = vld [vmem:[#allocation24 + $0x30c] sm:$0xf0] }
 0x2d5   :  { %4384 = vmatpush.bf16.msra.mxu2 %v7033_v40  ;;  %v3349_v0 = vpop.f32.mrf.mxu0  ;;  %v8574_v40 = vld [vmem:[#allocation22] sm:$0xf] }
 0x2d7   :  { %3556 = vmatpush.bf16.msrb.mxu3 %v6597_v55  ;;  %v6841_v55 = vor.u32 %v7654_v11, %v6840_v8  ;;  %4414 = vmatpush.bf16.msrb.mxu0 %v6749_v27  ;;  %v7738_v8 = vld [vmem:[#allocation24 + $0x3cc] sm:$0xf0]  ;;  %v6845_v27 = vor.u32 %v7652_v10, %v6842_v18  ;;  %v6800_v18 = vld [vmem:[#allocation24 + $0xc8] sm:$0xf] }
 0x2d8   :  { %v7177_v11 = vor.u32 %v7738_v8, %v7176_v49  ;;  %v6816_v49 = vld [vmem:[#allocation24 + $0xe8] sm:$0xf]  ;;  %v7647_v8 = vld [vmem:[#allocation24 + $0xf4] sm:$0xf0] }
 0x2d9   :  { %4385 = vmatpush.bf16.msra.mxu2 %v7017_v2  ;;  %v2692_v2 = vperm.slane %v8574_v40, 0  ;;  %v6817_v50 = vor.u32 %v7647_v8, %v6816_v49  ;;  %v7675_v49 = vld [vmem:[#allocation24 + $0x1d4] sm:$0xf0]  ;;  %v7724_v8 = vld [vmem:[#allocation24 + $0x364] sm:$0xf] }
 0x2db   :  { %3557 = vmatpush.bf16.msrb.mxu3 %v6581_v17  ;;  %v6824_v17 = vld [vmem:[#allocation24 + $0x100] sm:$0xf]  ;;  %4415 = vmatpush.bf16.msrb.mxu0 %v6733_v32  ;;  %v7696_v32 = vld [vmem:[#allocation24 + $0x284] sm:$0xf] }
 0x2dc   :  { %v6825_v42 = vor.u32 %v7650_v35, %v6824_v17  ;;  %v7160_v17 = vld [vmem:[#allocation24 + $0x3a0] sm:$0xf]  ;;  %v7734_v35 = vld [vmem:[#allocation24 + $0x3ac] sm:$0xf0] }
 0x2dd   :  { %4386 = vmatpush.bf16.msra.mxu2 %v7001_v26  ;;  %v3351_v3 = vpop.f32.mrf.mxu0 }
 0x2de   :  { %3558 = vmatmul.bf16.vlgmr.msrb.gmra.mxu3 %v8561_v1  ;;  %v6921_v1 = vor.u32 %v7674_v34, %v6920_v33  ;;  %v6922_v33 = vld [vmem:[#allocation24 + $0x1d0] sm:$0xf0] }
 0x2df   :  { %v6925_v34 = vor.u32 %v7672_v44, %v6922_v33  ;;  %4396 = vmatpush.bf16.msra.mxu3 %v7193_v29  ;;  %v6826_v44 = vld [vmem:[#allocation24 + $0x110] sm:$0xf0]  ;;  %v3350_v33 = vadd.f32 %v3349_v0, %v2692_v2  ;;  %v7688_v0 = vld [vmem:[#allocation24 + $0x244] sm:$0xf] }
 0x2e0   :  { %4369 = vmatpush.bf16.msra.mxu1 %v6921_v1  ;;  %v6984_v1 = vld [vmem:[#allocation24 + $0x240] sm:$0xf] }
 0x2e1   :  { %v6985_v43 = vor.u32 %v7690_v13, %v6984_v1  ;;  %v7018_v1 = vld [vmem:[#allocation24 + $0x290] sm:$0xf0] }
 0x2e2   :  { %v7021_v13 = vor.u32 %v7696_v32, %v7018_v1  ;;  %v7736_v32 = vld [vmem:[#allocation24 + $0x3c4] sm:$0xf] }
 0x2e3   :  { %4387 = vmatpush.bf16.msra.mxu2 %v6985_v43  ;;  %4397 = vmatpush.bf16.msra.mxu3 %v7177_v11  ;;  %v3352_v43 = vadd.f32 %v3351_v3, %v2692_v2  ;;  %v7740_v3 = vld [vmem:[#allocation24 + $0x3e4] sm:$0xf] }
 0x2e4   :  { %4370 = vmatpush.bf16.msra.mxu1 %v6905_v58  ;;  %v6717_v58 = vor.u32 %v7620_v46, %v6714_v51  ;;  %v7128_v46 = vld [vmem:[#allocation24 + $0x360] sm:$0xf]  ;;  %v7726_v51 = vld [vmem:[#allocation24 + $0x36c] sm:$0xf0] }
 0x2e6   :  { %4416 = vmatpush.bf16.msrb.mxu0 %v6717_v58  ;;  %v8570_v4 = vpop.f32.mrf.mxu1  ;;  %v7129_v58 = vor.u32 %v7726_v51, %v7128_v46  ;;  %v7635_v51 = vld [vmem:[#allocation24 + $0x94] sm:$0xf0] }
 0x2e7   :  { %4388 = vmatpush.bf16.msra.mxu2 %v6969_v56  ;;  %v3364_v12 = vadd.f32 %v8570_v4, %v3350_v33  ;;  %v3405_v56 = vpop.f32.mrf.mxu0  ;;  %v7718_v4 = vld [vmem:[#allocation24 + $0x32c] sm:$0xf0]  ;;  %v7178_v33 = vld [vmem:[#allocation24 + $0x3d0] sm:$0xf0] }
 0x2e8   :  { %4371 = vmatpush.bf16.msra.mxu1 %v6889_v30  ;;  %v7664_v30 = vld [vmem:[#allocation24 + $0x184] sm:$0xf]  ;;  %v7097_v29 = vor.u32 %v7718_v4, %v7096_v15 }
 0x2e9   :  { %v6893_v45 = vor.u32 %v7664_v30, %v6890_v63  ;;  %v7722_v30 = vld [vmem:[#allocation24 + $0x34c] sm:$0xf0] }
 0x2ea   :  { %4417 = vmatpush.bf16.msrb.mxu0 %v6701_v36  ;;  %v7113_v63 = vor.u32 %v7722_v30, %v7112_v57  ;;  %v6752_v30 = vld [vmem:[#allocation24 + $0x68] sm:$0xf] }
 0x2ec   :  { %4372 = vmatpush.bf16.msra.mxu1 %v6873_v41  ;;  %v6952_v41 = vld [vmem:[#allocation24 + $0x200] sm:$0xf] }
 0x2ed   :  { %v6953_v53 = vor.u32 %v7682_v52, %v6952_v41 }
 0x2ee   :  { %v3365_v21 = vpop.f32.mrf.mxu1 }
 0x2ef   :  { %4389 = vmatpush.bf16.msra.mxu2 %v6953_v53  ;;  %v3366_v59 = vadd.f32 %v3365_v21, %v3352_v43 }
 0x2f0   :  { %4373 = vmatpush.bf16.msra.mxu1 %v6857_v37  ;;  %v7066_v37 = vld [vmem:[#allocation24 + $0x2f0] sm:$0xf0] }
 0x2f1   :  { %v7069_v5 = vor.u32 %v7708_v60, %v7066_v37  ;;  %v6970_v60 = vld [vmem:[#allocation24 + $0x230] sm:$0xf0]  ;;  %v2693_v37 = vperm.slane %v8574_v40, 1 }
 0x2f3   :  { %4438 = vmatpush.bf16.msrb.mxu2 %v7069_v5 }
 0x2f4   :  { %4374 = vmatpush.bf16.msra.mxu1 %v6841_v55  ;;  %v6858_v55 = vld [vmem:[#allocation24 + $0x150] sm:$0xf0] }
 0x2f5   :  { %v6861_v38 = vor.u32 %v7656_v31, %v6858_v55  ;;  %v7080_v55 = vld [vmem:[#allocation24 + $0x300] sm:$0xf] }
 0x2f6   :  { %v3419_v36 = vpop.f32.mrf.mxu1 }
 0x2f7   :  { %4439 = vmatpush.bf16.msrb.mxu2 %v7053_v16  ;;  %v7081_v16 = vor.u32 %v7714_v48, %v7080_v55 }
 0x2f8   :  { %4375 = vmatpush.bf16.msra.mxu1 %v6825_v42  ;;  %v7161_v42 = vor.u32 %v7734_v35, %v7160_v17  ;;  %v7680_v17 = vld [vmem:[#allocation24 + $0x204] sm:$0xf]  ;;  %v6954_v35 = vld [vmem:[#allocation24 + $0x210] sm:$0xf0] }
 0x2f9   :  { %v6957_v2 = vor.u32 %v7680_v17, %v6954_v35  ;;  %v7623_v17 = vld [vmem:[#allocation24 + $0x34] sm:$0xf0]  ;;  %v6912_v35 = vld [vmem:[#allocation24 + $0x1a8] sm:$0xf] }
 0x2fa   :  { %4398 = vmatpush.bf16.msra.mxu3 %v7161_v42  ;;  %v3406_v42 = vadd.f32 %v3405_v56, %v2693_v37 }
 0x2fc   :  { %4424 = vmatpush.bf16.msrb.mxu1 %v6941_v22  ;;  %v7037_v22 = vor.u32 %v7700_v7, %v7034_v20  ;;  %v7643_v7 = vld [vmem:[#allocation24 + $0xd4] sm:$0xf0] }
 0x2fd   :  { %v6801_v6 = vor.u32 %v7643_v7, %v6800_v18  ;;  %v7720_v18 = vld [vmem:[#allocation24 + $0x344] sm:$0xf]  ;;  %v7114_v7 = vld [vmem:[#allocation24 + $0x350] sm:$0xf0] }
 0x2fe   :  { %4440 = vmatpush.bf16.msrb.mxu2 %v7037_v22  ;;  %4399 = vmatpush.bf16.msra.mxu3 %v7145_v28  ;;  %v3421_v20 = vpop.f32.mrf.mxu1 }
 0x300   :  { %4425 = vmatpush.bf16.msrb.mxu1 %v6925_v34  ;;  %v6829_v34 = vor.u32 %v7648_v25, %v6826_v44  ;;  %v3420_v25 = vadd.f32 %v3419_v36, %v3406_v42  ;;  %v7639_v44 = vld [vmem:[#allocation24 + $0xb4] sm:$0xf0] }
 0x301   :  { %v7631_v36 = vld [vmem:[#allocation24 + $0x74] sm:$0xf0] }
 0x302   :  { %4441 = vmatpush.bf16.msrb.mxu2 %v7021_v13  ;;  %4400 = vmatpush.bf16.msra.mxu3 %v7129_v58  ;;  %v6768_v13 = vld [vmem:[#allocation24 + $0x88] sm:$0xf]  ;;  %v7162_v58 = vld [vmem:[#allocation24 + $0x3b0] sm:$0xf0]  ;;  %v7671_v42 = vld [vmem:[#allocation24 + $0x1b4] sm:$0xf0] }
 0x303   :  { %v8572_v9 = vpop.f32.mrf.mxu2  ;;  %v6769_v57 = vor.u32 %v7635_v51, %v6768_v13  ;;  %v6818_v13 = vld [vmem:[#allocation24 + $0xf8] sm:$0xf0] }
 0x304   :  { %4426 = vmatpush.bf16.msrb.mxu1 %v6909_v62  ;;  %v7002_v62 = vld [vmem:[#allocation24 + $0x270] sm:$0xf0]  ;;  %v3378_v41 = vadd.f32 %v8572_v9, %v3364_v12 }
 0x305   :  { %v7005_v19 = vor.u32 %v7692_v14, %v7002_v62 }
 0x306   :  { %4401 = vmatpush.bf16.msra.mxu3 %v7113_v63  ;;  %v6944_v63 = vld [vmem:[#allocation24 + $0x1e8] sm:$0xf] }
 0x307   :  { %4442 = vmatpush.bf16.msrb.mxu2 %v7005_v19 }
 0x308   :  { %4427 = vmatpush.bf16.msrb.mxu1 %v6893_v45  ;;  %v6986_v45 = vld [vmem:[#allocation24 + $0x250] sm:$0xf0]  ;;  %v3475_v56 = vpop.f32.mrf.mxu1 }
 0x309   :  { %v6989_v52 = vor.u32 %v7688_v0, %v6986_v45  ;;  %v7679_v45 = vld [vmem:[#allocation24 + $0x1f4] sm:$0xf0] }
 0x30a   :  { %4402 = vmatpush.bf16.msra.mxu3 %v7097_v29  ;;  %v6945_v29 = vor.u32 %v7679_v45, %v6944_v63  ;;  %v7641_v63 = vld [vmem:[#allocation24 + $0xcc] sm:$0xf] }
 0x30b   :  { %v3379_v26 = vpop.f32.mrf.mxu2  ;;  %4443 = vmatpush.bf16.msrb.mxu2 %v6989_v52  ;;  %v7146_v52 = vld [vmem:[#allocation24 + $0x390] sm:$0xf0] }
 0x30c   :  { %4428 = vmatpush.bf16.msrb.mxu1 %v6877_v54  ;;  %v3380_v53 = vadd.f32 %v3379_v26, %v3366_v59  ;;  %v7684_v54 = vld [vmem:[#allocation24 + $0x224] sm:$0xf]  ;;  %v6784_v26 = vld [vmem:[#allocation24 + $0xa8] sm:$0xf] }
 0x30d   :  { %v6973_v11 = vor.u32 %v7684_v54, %v6970_v60  ;;  %v6785_v1 = vor.u32 %v7639_v44, %v6784_v26  ;;  %v6736_v54 = vld [vmem:[#allocation24 + $0x48] sm:$0xf]  ;;  %v7627_v60 = vld [vmem:[#allocation24 + $0x54] sm:$0xf0] }
 0x30e   :  { %4403 = vmatpush.bf16.msra.mxu3 %v7081_v16  ;;  %v6720_v16 = vld [vmem:[#allocation24 + $0x28] sm:$0xf]  ;;  %v7619_v26 = vld [vmem:[#allocation24 + $0x14] sm:$0xf0] }
 0x30f   :  { %4444 = vmatpush.bf16.msrb.mxu2 %v6973_v11  ;;  %v7130_v11 = vld [vmem:[#allocation24 + $0x370] sm:$0xf0] }
 0x310   :  { %4429 = vmatpush.bf16.msrb.mxu1 %v6861_v38  ;;  %v3407_v38 = vpop.f32.mrf.mxu0 }
 0x311   :  { %v3408_v28 = vadd.f32 %v3407_v38, %v2693_v37  ;;  %v6928_v37 = vld [vmem:[#allocation24 + $0x1c8] sm:$0xf]  ;;  %v6737_v38 = vor.u32 %v7627_v60, %v6736_v54  ;;  %v7707_v54 = vld [vmem:[#allocation24 + $0x2d4] sm:$0xf0]  ;;  %v7637_v60 = vld [vmem:[#allocation24 + $0xac] sm:$0xf] }
 0x313   :  { %v3433_v61 = vpop.f32.mrf.mxu2  ;;  %4445 = vmatpush.bf16.msrb.mxu2 %v6957_v2  ;;  %v3422_v43 = vadd.f32 %v3421_v20, %v3408_v28  ;;  %v3477_v2 = vpop.f32.mrf.mxu1  ;;  %v6896_v28 = vld [vmem:[#allocation24 + $0x188] sm:$0xf] }
 0x314   :  { %4430 = vmatpush.bf16.msrb.mxu1 %v6845_v27  ;;  %v7194_v27 = vld [vmem:[#allocation24 + $0x3f0] sm:$0xf0]  ;;  %v3434_v46 = vadd.f32 %v3433_v61, %v3420_v25 }
 0x315   :  { %v7197_v21 = vor.u32 %v7740_v3, %v7194_v27  ;;  %v7117_v27 = vor.u32 %v7720_v18, %v7114_v7  ;;  %v6832_v18 = vld [vmem:[#allocation24 + $0x108] sm:$0xf]  ;;  %v7651_v7 = vld [vmem:[#allocation24 + $0x114] sm:$0xf0] }
 0x317   :  { %4452 = vmatpush.bf16.msrb.mxu3 %v7197_v21 }
 0x318   :  { %4431 = vmatpush.bf16.msrb.mxu1 %v6829_v34  ;;  %v7181_v34 = vor.u32 %v7736_v32, %v7178_v33  ;;  %v3461_v14 = vpop.f32.mrf.mxu0  ;;  %v7667_v32 = vld [vmem:[#allocation24 + $0x194] sm:$0xf0]  ;;  %v7716_v33 = vld [vmem:[#allocation24 + $0x324] sm:$0xf] }
 0x31b   :  { %v3435_v22 = vpop.f32.mrf.mxu2  ;;  %4453 = vmatpush.bf16.msrb.mxu3 %v7181_v34  ;;  %v7098_v34 = vld [vmem:[#allocation24 + $0x330] sm:$0xf0] }
 0x31c   :  { %v3436_v12 = vadd.f32 %v3435_v22, %v3422_v43  ;;  %v6721_v22 = vor.u32 %v7623_v17, %v6720_v16  ;;  %v7101_v43 = vor.u32 %v7716_v33, %v7098_v34  ;;  %v7695_v34 = vld [vmem:[#allocation24 + $0x274] sm:$0xf0] }
 0x320   :  { %v3463_v55 = vpop.f32.mrf.mxu0 }
 0x321   :  { %v3391_v47 = vpop.f32.mrf.mxu3 }
 0x322   :  { %v3392_v23 = vadd.f32 %v3391_v47, %v3378_v41  ;;  %v7732_v47 = vld [vmem:[#allocation24 + $0x3a4] sm:$0xf] }
 0x323   :  { %v7165_v62 = vor.u32 %v7732_v47, %v7162_v58  ;;  %v7728_v41 = vld [vmem:[#allocation24 + $0x384] sm:$0xf]  ;;  %v3489_v61 = vpop.f32.mrf.mxu2 }
 0x324   :  { %v3564_v31 = vmax.f32 %v3392_v23, 0.0  ;;  %v2694_v23 = vperm.slane %v8574_v40, 2 }
 0x325   :  { %4454 = vmatpush.bf16.msrb.mxu3 %v7165_v62  ;;  %v6880_v62 = vld [vmem:[#allocation24 + $0x168] sm:$0xf] }
 0x326   :  { %v3464_v3 = vadd.f32 %v3463_v55, %v2694_v23  ;;  %v7040_v55 = vld [vmem:[#allocation24 + $0x2a8] sm:$0xf] }
 0x328   :  { %v3478_v25 = vadd.f32 %v3477_v2, %v3464_v3  ;;  %v3517_v16 = vpop.f32.mrf.mxu0  ;;  %v7024_v2 = vld [vmem:[#allocation24 + $0x288] sm:$0xf] }
 0x329   :  { %v3393_v39 = vpop.f32.mrf.mxu3 }
 0x32a   :  { %v3394_v5 = vadd.f32 %v3393_v39, %v3380_v53  ;;  %v7149_v53 = vor.u32 %v7728_v41, %v7146_v52  ;;  %v6753_v39 = vor.u32 %v7631_v36, %v6752_v30  ;;  %v7082_v30 = vld [vmem:[#allocation24 + $0x310] sm:$0xf0]  ;;  %v7711_v36 = vld [vmem:[#allocation24 + $0x2f4] sm:$0xf0] }
 0x32b   :  { %v3491_v21 = vpop.f32.mrf.mxu2 }
 0x32c   :  { %v3568_v9 = vmax.f32 %v3394_v5, 0.0  ;;  %4455 = vmatpush.bf16.msrb.mxu3 %v7149_v53 }
 0x32e   :  { %v8580_v10 = vpack.c.bf16 %v3568_v9, %v3564_v31  ;;  %v7133_v31 = vor.u32 %v7724_v8, %v7130_v11  ;;  %v3462_v9 = vadd.f32 %v3461_v14, %v2694_v23  ;;  %v6897_v14 = vor.u32 %v7667_v32, %v6896_v28  ;;  %v7008_v32 = vld [vmem:[#allocation24 + $0x268] sm:$0xf] }
 0x32f   :  { %v2695_v28 = vperm.slane %v8574_v40, 3 }
 0x330   :  { %4362 = vmatmul.bf16.vlgmr.msra.gmra.mxu0 %v8580_v10  ;;  %4456 = vmatpush.bf16.msrb.mxu3 %v7133_v31  ;;  %v3476_v20 = vadd.f32 %v3475_v56, %v3462_v9  ;;  %v6848_v31 = vld [vmem:[#allocation24 + $0x128] sm:$0xf]  ;;  %v7655_v9 = vld [vmem:[#allocation24 + $0x134] sm:$0xf0] }
 0x331   :  { %4466 = vmatpush.bf16.msra.mxu0 %v6817_v50  ;;  %v3447_v24 = vpop.f32.mrf.mxu3  ;;  %v6929_v50 = vor.u32 %v7675_v49, %v6928_v37  ;;  %v6786_v37 = vld [vmem:[#allocation24 + $0xb8] sm:$0xf0]  ;;  %v6849_v17 = vor.u32 %v7655_v9, %v6848_v31  ;;  %v3518_v40 = vadd.f32 %v3517_v16, %v2695_v28  ;;  %v8596_v16 = vpop.xlane.xlu1 %2447 }
 0x332   :  { %v3448_v19 = vadd.f32 %v3447_v24, %v3434_v46  ;;  %v6913_v24 = vor.u32 %v7671_v42, %v6912_v35  ;;  %v3490_v44 = vadd.f32 %v3489_v61, %v3476_v20  ;;  %v3492_v46 = vadd.f32 %v3491_v21, %v3478_v25  ;;  %v3531_v35 = vpop.f32.mrf.mxu1  ;;  %v7629_v20 = vld [vmem:[#allocation24 + $0x6c] sm:$0xf]  ;;  %v6754_v21 = vld [vmem:[#allocation24 + $0x78] sm:$0xf0] }
 0x333   :  { %v6789_v11 = vor.u32 %v7637_v60, %v6786_v37  ;;  %v7665_v60 = vld [vmem:[#allocation24 + $0x18c] sm:$0xf]  ;;  %v6898_v37 = vld [vmem:[#allocation24 + $0x198] sm:$0xf0] }
 0x334   :  { %v3565_v15 = vmax.f32 %v3448_v19, 0.0  ;;  %4457 = vmatpush.bf16.msrb.mxu3 %v7117_v27  ;;  %v7699_v27 = vld [vmem:[#allocation24 + $0x294] sm:$0xf0] }
 0x335   :  { %4467 = vmatpush.bf16.msra.mxu0 %v6801_v6  ;;  %v6704_v6 = vld [vmem:[#allocation24 + $0x8] sm:$0xf]  ;;  %v7025_v25 = vor.u32 %v7699_v27, %v7024_v2  ;;  %v7074_v2 = vld [vmem:[#allocation24 + $0x2f8] sm:$0xf0]  ;;  %v8601_v27 = vld [vmem:[%s8746_s15 + $0x8] sm:$0xff] }
 0x336   :  { %v6705_v58 = vor.u32 %v7619_v26, %v6704_v6  ;;  %v6946_v6 = vld [vmem:[#allocation24 + $0x1f8] sm:$0xf0]  ;;  %v6833_v26 = vor.u32 %v7651_v7, %v6832_v18  ;;  %v7709_v7 = vld [vmem:[#allocation24 + $0x2ec] sm:$0xf] }
 0x337   :  { %v6882_v18 = vld [vmem:[#allocation24 + $0x178] sm:$0xf0] }
 0x338   :  { %4458 = vmatpush.bf16.msrb.mxu3 %v7101_v43  ;;  %v7673_v43 = vld [vmem:[#allocation24 + $0x1cc] sm:$0xf] }
 0x339   :  { %4468 = vmatpush.bf16.msra.mxu0 %v6785_v1  ;;  %v3449_v59 = vpop.f32.mrf.mxu3  ;;  %v7645_v1 = vld [vmem:[#allocation24 + $0xec] sm:$0xf] }
 0x33a   :  { %v3450_v0 = vadd.f32 %v3449_v59, %v3436_v12  ;;  %v7663_v12 = vld [vmem:[#allocation24 + $0x174] sm:$0xf0]  ;;  %v6821_v56 = vor.u32 %v7645_v1, %v6818_v13  ;;  %v7072_v59 = vld [vmem:[#allocation24 + $0x2e8] sm:$0xf]  ;;  %v7625_v1 = vld [vmem:[#allocation24 + $0x4c] sm:$0xf] }
 0x33b   :  { %v6881_v61 = vor.u32 %v7663_v12, %v6880_v62  ;;  %v7073_v23 = vor.u32 %v7711_v36, %v7072_v59  ;;  %v6738_v13 = vld [vmem:[#allocation24 + $0x58] sm:$0xf0]  ;;  %v6992_v62 = vld [vmem:[#allocation24 + $0x248] sm:$0xf] }
 0x33c   :  { %v3569_v4 = vmax.f32 %v3450_v0, 0.0  ;;  %v6802_v0 = vld [vmem:[#allocation24 + $0xd8] sm:$0xf0] }
 0x33d   :  { %4469 = vmatpush.bf16.msra.mxu0 %v6769_v57  ;;  %v7712_v57 = vld [vmem:[#allocation24 + $0x304] sm:$0xf]  ;;  %v6722_v59 = vld [vmem:[#allocation24 + $0x38] sm:$0xf0] }
 0x33e   :  { %v8584_v5 = vpack.c.bf16 %v3569_v4, %v3565_v15  ;;  %v7085_v45 = vor.u32 %v7712_v57, %v7082_v30  ;;  %v6805_v15 = vor.u32 %v7641_v63, %v6802_v0  ;;  %v6864_v4 = vld [vmem:[#allocation24 + $0x148] sm:$0xf]  ;;  %v3533_v57 = vpop.f32.mrf.mxu1  ;;  %v7669_v30 = vld [vmem:[#allocation24 + $0x1ac] sm:$0xf]  ;;  %v6914_v36 = vld [vmem:[#allocation24 + $0x1b8] sm:$0xf0]  ;;  %v3532_v0 = vadd.f32 %v3531_v35, %v3518_v40 }
 0x33f   :  { %v6901_v35 = vor.u32 %v7665_v60, %v6898_v37  ;;  %v7653_v40 = vld [vmem:[#allocation24 + $0x12c] sm:$0xf]  ;;  %v8626_v60 = vld [vmem:[%s8745_s14] sm:$0x3] }
 0x340   :  { %4376 = vmatmul.bf16.vlgmr.msra.gmra.mxu1 %v8584_v5  ;;  %4418 = vmatmul.bf16.vlgmr.msrb.gmra.mxu0 %v8580_v10 }
 0x341   :  { %4470 = vmatpush.bf16.msra.mxu0 %v6753_v39  ;;  %4480 = vmatpush.bf16.msra.mxu1 %v6945_v29  ;;  %v3503_v48 = vpop.f32.mrf.mxu3  ;;  %v7659_v39 = vld [vmem:[#allocation24 + $0x154] sm:$0xf0]  ;;  %v7056_v29 = vld [vmem:[#allocation24 + $0x2c8] sm:$0xf] }
 0x342   :  { %v3504_v51 = vadd.f32 %v3503_v48, %v3490_v44  ;;  %4459 = vmatpush.bf16.msrb.mxu3 %v7085_v45  ;;  %v6865_v49 = vor.u32 %v7659_v39, %v6864_v4  ;;  %v7057_v8 = vor.u32 %v7707_v54, %v7056_v29  ;;  %v7703_v48 = vld [vmem:[#allocation24 + $0x2b4] sm:$0xf0]  ;;  %v6757_v44 = vor.u32 %v7629_v20, %v6754_v21  ;;  %v7617_v29 = vld [vmem:[#allocation24 + $0xc] sm:$0xf]  ;;  %v6706_v54 = vld [vmem:[#allocation24 + $0x18] sm:$0xf0] }
 0x343   :  { %v7041_v3 = vor.u32 %v7703_v48, %v7040_v55  ;;  %v6917_v4 = vor.u32 %v7669_v30, %v6914_v36  ;;  %v7687_v39 = vld [vmem:[#allocation24 + $0x234] sm:$0xf0]  ;;  %v6709_v55 = vor.u32 %v7617_v29, %v6706_v54  ;;  %v6960_v48 = vld [vmem:[#allocation24 + $0x208] sm:$0xf] }
 0x344   :  { %v3566_v41 = vmax.f32 %v3504_v51, 0.0  ;;  %v3519_v51 = vpop.f32.mrf.mxu0  ;;  %v7152_v36 = vld [vmem:[#allocation24 + $0x388] sm:$0xf]  ;;  %v7727_v54 = vld [vmem:[#allocation24 + $0x374] sm:$0xf0] }
 0x345   :  { %4471 = vmatpush.bf16.msra.mxu0 %v6737_v38  ;;  %4481 = vmatpush.bf16.msra.mxu1 %v6929_v50  ;;  %v7633_v38 = vld [vmem:[#allocation24 + $0x8c] sm:$0xf]  ;;  %v6770_v50 = vld [vmem:[#allocation24 + $0x98] sm:$0xf0]  ;;  %v3520_v63 = vadd.f32 %v3519_v51, %v2695_v28  ;;  %v7136_v29 = vld [vmem:[#allocation24 + $0x368] sm:$0xf] }
 0x346   :  { %v6773_v42 = vor.u32 %v7633_v38, %v6770_v50  ;;  %v7683_v38 = vld [vmem:[#allocation24 + $0x214] sm:$0xf0]  ;;  %v7200_v50 = vld [vmem:[#allocation24 + $0x3e8] sm:$0xf] }
 0x349   :  { %4472 = vmatpush.bf16.msra.mxu0 %v6721_v22  ;;  %4482 = vmatpush.bf16.msra.mxu1 %v6913_v24  ;;  %v3505_v47 = vpop.f32.mrf.mxu3  ;;  %v3545_v22 = vpop.f32.mrf.mxu2  ;;  %v7677_v24 = vld [vmem:[#allocation24 + $0x1ec] sm:$0xf] }
 0x34a   :  { %v3506_v19 = vadd.f32 %v3505_v47, %v3492_v46  ;;  %v6949_v33 = vor.u32 %v7677_v24, %v6946_v6  ;;  %v6930_v46 = vld [vmem:[#allocation24 + $0x1d8] sm:$0xf0]  ;;  %v6961_v24 = vor.u32 %v7683_v38, %v6960_v48  ;;  %v7723_v48 = vld [vmem:[#allocation24 + $0x354] sm:$0xf0]  ;;  %v7689_v38 = vld [vmem:[#allocation24 + $0x24c] sm:$0xf] }
 0x34b   :  { %v6933_v12 = vor.u32 %v7673_v43, %v6930_v46  ;;  %v8613_v43 = vld [vmem:[%s8746_s15] sm:$0xff] }
 0x34c   :  { %v3570_v52 = vmax.f32 %v3506_v19, 0.0  ;;  %v7691_v19 = vld [vmem:[#allocation24 + $0x254] sm:$0xf0] }
 0x34d   :  { %4473 = vmatpush.bf16.msra.mxu0 %v6705_v58  ;;  %4483 = vmatpush.bf16.msra.mxu1 %v6897_v14  ;;  %v7009_v58 = vor.u32 %v7695_v34, %v7008_v32  ;;  %v6741_v14 = vor.u32 %v7625_v1, %v6738_v13  ;;  %v7739_v32 = vld [vmem:[#allocation24 + $0x3d4] sm:$0xf0]  ;;  %v6866_v34 = vld [vmem:[#allocation24 + $0x158] sm:$0xf0]  ;;  %v7705_v1 = vld [vmem:[#allocation24 + $0x2cc] sm:$0xf] }
 0x34e   :  { %v8588_v53 = vpack.c.bf16 %v3570_v52, %v3566_v41  ;;  %v6993_v41 = vor.u32 %v7691_v19, %v6992_v62  ;;  %v7058_v13 = vld [vmem:[#allocation24 + $0x2d8] sm:$0xf0]  ;;  %v7735_v62 = vld [vmem:[#allocation24 + $0x3b4] sm:$0xf0] }
 0x34f   :  { %v7042_v19 = vld [vmem:[#allocation24 + $0x2b8] sm:$0xf0] }
 0x350   :  { %4390 = vmatmul.bf16.vlgmr.msra.gmra.mxu2 %v8588_v53  ;;  %4432 = vmatmul.bf16.vlgmr.msrb.gmra.mxu1 %v8584_v5 }
 0x351   :  { %4522 = vmatpush.bf16.msrb.mxu0 %v6821_v56  ;;  %4484 = vmatpush.bf16.msra.mxu1 %v6881_v61  ;;  %v7621_v56 = vld [vmem:[#allocation24 + $0x2c] sm:$0xf]  ;;  %v3547_v45 = vpop.f32.mrf.mxu2  ;;  %v6976_v61 = vld [vmem:[#allocation24 + $0x228] sm:$0xf] }
 0x352   :  { %4474 = vmatmul.bf16.vlgmr.msra.gmra.mxu0 %v8580_v10  ;;  %4494 = vmatpush.bf16.msra.mxu2 %v7073_v23  ;;  %v6725_v52 = vor.u32 %v7621_v56, %v6722_v59  ;;  %v3534_v23 = vadd.f32 %v3533_v57, %v3520_v63  ;;  %v6977_v9 = vor.u32 %v7687_v39, %v6976_v61  ;;  %v2453_v56 = vpop.xlane.xlu1 %2452  ;;  %v7731_v63 = vld [vmem:[#allocation24 + $0x394] sm:$0xf0]  ;;  %v7026_v61 = vld [vmem:[#allocation24 + $0x298] sm:$0xf0] }
 0x355   :  { %4523 = vmatpush.bf16.msrb.mxu0 %v6805_v15  ;;  %4485 = vmatpush.bf16.msra.mxu1 %v6865_v49  ;;  %v3546_v15 = vadd.f32 %v3545_v22, %v3532_v0  ;;  %v3548_v49 = vadd.f32 %v3547_v45, %v3534_v23  ;;  %v7649_v0 = vld [vmem:[#allocation24 + $0x10c] sm:$0xf] }
 0x356   :  { %4495 = vmatpush.bf16.msra.mxu2 %v7057_v8 }
 0x359   :  { %4524 = vmatpush.bf16.msrb.mxu0 %v6789_v11  ;;  %4486 = vmatpush.bf16.msra.mxu1 %v6849_v17  ;;  %v4599_v11 = vlaneseq }
 0x35a   :  { %4496 = vmatpush.bf16.msra.mxu2 %v7041_v3  ;;  %v7743_v3 = vld [vmem:[#allocation24 + $0x3f4] sm:$0xf0] }
 0x35b   :  { %v8603_v22 = vand.u32 127, %v4599_v11  ;;  %v7201_v6 = vor.u32 %v7743_v3, %v7200_v50  ;;  %v7137_v11 = vor.u32 %v7727_v54, %v7136_v29  ;;  %v6994_v50 = vld [vmem:[#allocation24 + $0x258] sm:$0xf0]  ;;  %v7719_v3 = vld [vmem:[#allocation24 + $0x334] sm:$0xf0] }
 0x35d   :  { %4525 = vmatpush.bf16.msrb.mxu0 %v6773_v42  ;;  %4487 = vmatpush.bf16.msra.mxu1 %v6833_v26  ;;  %v7661_v42 = vld [vmem:[#allocation24 + $0x16c] sm:$0xf]  ;;  %v8616_v46 = vadd.s32 4294967288, %v8603_v22  ;;  %v4601_v23 = vperm.slane %v8596_v16, %v8603_v22 }
 0x35e   :  { %4497 = vmatpush.bf16.msra.mxu2 %v7025_v25  ;;  %v6885_v28 = vor.u32 %v7661_v42, %v6882_v18  ;;  %v7077_v25 = vor.u32 %v7709_v7, %v7074_v2  ;;  %v7685_v42 = vld [vmem:[#allocation24 + $0x22c] sm:$0xf]  ;;  %v6978_v18 = vld [vmem:[#allocation24 + $0x238] sm:$0xf0] }
 0x35f   :  { %v4603_v45 = vperm.slane %v2453_v56, %v8616_v46  ;;  %v6981_v2 = vor.u32 %v7685_v42, %v6978_v18  ;;  %v7717_v56 = vld [vmem:[#allocation24 + $0x32c] sm:$0xf] }
 0x360   :  { %4446 = vmatmul.bf16.vlgmr.msrb.gmra.mxu2 %v8588_v53  ;;  %4488 = vmatmul.bf16.vlgmr.msra.gmra.mxu1 %v8584_v5 }
 0x361   :  { %v3559_v47 = vpop.f32.mrf.mxu3  ;;  %4526 = vmatpush.bf16.msrb.mxu0 %v6757_v44  ;;  %4536 = vmatpush.bf16.msrb.mxu1 %v6949_v33  ;;  %v7184_v44 = vld [vmem:[#allocation24 + $0x3c8] sm:$0xf]  ;;  %v7657_v33 = vld [vmem:[#allocation24 + $0x14c] sm:$0xf]  ;;  %v4605_v37 = vsel %vm4604_vm1, %v4603_v45, %v4601_v23 }
 0x362   :  { %4498 = vmatpush.bf16.msra.mxu2 %v7009_v58  ;;  %v3560_v8 = vadd.f32 %v3559_v47, %v3546_v15  ;;  %v7185_v51 = vor.u32 %v7739_v32, %v7184_v44  ;;  %v6869_v47 = vor.u32 %v7657_v33, %v6866_v34  ;;  %v7061_v58 = vor.u32 %v7705_v1, %v7058_v13  ;;  %v7737_v32 = vld [vmem:[#allocation24 + $0x3cc] sm:$0xf]  ;;  %v7186_v33 = vld [vmem:[#allocation24 + $0x3d8] sm:$0xf0] }
 0x363   :  { %v7153_v15 = vor.u32 %v7731_v63, %v7152_v36  ;;  %v7189_v34 = vor.u32 %v7737_v32, %v7186_v33  ;;  %v7733_v1 = vld [vmem:[#allocation24 + $0x3ac] sm:$0xf]  ;;  %v7170_v13 = vld [vmem:[#allocation24 + $0x3b8] sm:$0xf0] }
 0x364   :  { %v3567_v20 = vmax.f32 %v3560_v8, 0.0  ;;  %v7010_v8 = vld [vmem:[#allocation24 + $0x278] sm:$0xf0] }
 0x365   :  { %4527 = vmatpush.bf16.msrb.mxu0 %v6741_v14  ;;  %4537 = vmatpush.bf16.msrb.mxu1 %v6933_v12  ;;  %v7168_v14 = vld [vmem:[#allocation24 + $0x3a8] sm:$0xf]  ;;  %v6850_v12 = vld [vmem:[#allocation24 + $0x138] sm:$0xf0] }
 0x366   :  { %4499 = vmatpush.bf16.msra.mxu2 %v6993_v41  ;;  %v7169_v59 = vor.u32 %v7735_v62, %v7168_v14  ;;  %v6853_v57 = vor.u32 %v7653_v40, %v6850_v12  ;;  %v6834_v41 = vld [vmem:[#allocation24 + $0x118] sm:$0xf0]  ;;  %v7725_v14 = vld [vmem:[#allocation24 + $0x36c] sm:$0xf] }
 0x367   :  { %v7138_v62 = vld [vmem:[#allocation24 + $0x378] sm:$0xf0]  ;;  %v7721_v12 = vld [vmem:[#allocation24 + $0x34c] sm:$0xf] }
 0x368   :  { %v7141_v40 = vor.u32 %v7725_v14, %v7138_v62 }
 0x369   :  { %v3561_v31 = vpop.f32.mrf.mxu3  ;;  %4528 = vmatpush.bf16.msrb.mxu0 %v6725_v52  ;;  %4538 = vmatpush.bf16.msrb.mxu1 %v6917_v4  ;;  %v7697_v52 = vld [vmem:[#allocation24 + $0x28c] sm:$0xf]  ;;  %v6837_v4 = vor.u32 %v7649_v0, %v6834_v41 }
 0x36a   :  { %v3562_v17 = vadd.f32 %v3561_v31, %v3548_v49  ;;  %4500 = vmatpush.bf16.msra.mxu2 %v6977_v9  ;;  %v7029_v39 = vor.u32 %v7697_v52, %v7026_v61  ;;  %v7693_v49 = vld [vmem:[#allocation24 + $0x26c] sm:$0xf]  ;;  %v4607_v31 = vmul.f32 %v4605_v37, %v8626_v60  ;;  %v8188_v52 = vmov 0.0  }
 0x36b   :  { %v7013_v9 = vor.u32 %v7693_v49, %v7010_v8  ;;  %309 = vst.msk [vmem:[#allocation2] sm:$0x3] %vm308_vm2, %v8188_v52  ;;  %v8640_v49 = vld [vmem:[#allocation25] sm:$0xf] }
 0x36c   :  { %v3571_v21 = vmax.f32 %v3562_v17, 0.0  ;;  %v6997_v17 = vor.u32 %v7689_v38, %v6994_v50  ;;  %310 = vst.msk [vmem:[#allocation3] sm:$0x3] %vm308_vm2, %v8188_v52 }
 0x36d   :  { %4529 = vmatpush.bf16.msrb.mxu0 %v6709_v55  ;;  %4539 = vmatpush.bf16.msrb.mxu1 %v6901_v35  ;;  %v7120_v55 = vld [vmem:[#allocation24 + $0x348] sm:$0xf] }
 0x36e   :  { %v8605_v26 = vpack.c.bf16 %v3571_v21, %v3567_v20  ;;  %4501 = vmatpush.bf16.msra.mxu2 %v6961_v24  ;;  %v7121_v16 = vor.u32 %v7723_v48, %v7120_v55  ;;  %v7104_v35 = vld [vmem:[#allocation24 + $0x328] sm:$0xf]  ;;  %v7715_v20 = vld [vmem:[#allocation24 + $0x314] sm:$0xf0]  ;;  %v7681_v21 = vld [vmem:[#allocation24 + $0x20c] sm:$0xf] }
 0x36f   :  { %v7105_v7 = vor.u32 %v7719_v3, %v7104_v35  ;;  %v6962_v24 = vld [vmem:[#allocation24 + $0x218] sm:$0xf0] }
 0x370   :  { %4404 = vmatmul.bf16.vlgmr.msra.gmra.mxu3 %v8605_v26  ;;  %4530 = vmatmul.bf16.vlgmr.msrb.gmra.mxu0 %v8580_v10  ;;  %v7701_v10 = vld [vmem:[#allocation24 + $0x2ac] sm:$0xf] }
 0x371   :  { %4635 = vmatpush.msra.mxu0 %v8601_v27  ;;  %4508 = vmatpush.bf16.msra.mxu3 %v7201_v6  ;;  %v7045_v30 = vor.u32 %v7701_v10, %v7042_v19  ;;  %v7741_v6 = vld [vmem:[#allocation24 + $0x3ec] sm:$0xf]  ;;  %v7122_v10 = vld [vmem:[#allocation24 + $0x358] sm:$0xf0] }
 0x372   :  { %4540 = vmatpush.bf16.msrb.mxu1 %v6885_v28  ;;  %4550 = vmatpush.bf16.msrb.mxu2 %v7077_v25  ;;  %v7202_v28 = vld [vmem:[#allocation24 + $0x3f8] sm:$0xf0]  ;;  %v6965_v25 = vor.u32 %v7681_v21, %v6962_v24  ;;  %v7125_v19 = vor.u32 %v7721_v12, %v7122_v10  ;;  %v4615_v48 = vld [vmem:[#allocation2] sm:$0x3] }
 0x373   :  { %4636 = vmatpush.msra.mxu0 %v8613_v43  ;;  %4502 = vmatmul.bf16.vlgmr.msra.gmra.mxu2 %v8588_v53  ;;  %v7205_v44 = vor.u32 %v7741_v6, %v7202_v28 }
 0x375   :  { %4509 = vmatpush.bf16.msra.mxu3 %v7185_v51  ;;  %v7729_v51 = vld [vmem:[#allocation24 + $0x38c] sm:$0xf] }
 0x376   :  { %4541 = vmatpush.bf16.msrb.mxu1 %v6869_v47  ;;  %4551 = vmatpush.bf16.msrb.mxu2 %v7061_v58  ;;  %v7154_v47 = vld [vmem:[#allocation24 + $0x398] sm:$0xf0] }
 0x377   :  { %v7157_v58 = vor.u32 %v7729_v51, %v7154_v47 }
 0x379   :  { %4510 = vmatpush.bf16.msra.mxu3 %v7169_v59  ;;  %v7106_v59 = vld [vmem:[#allocation24 + $0x338] sm:$0xf0] }
 0x37a   :  { %4542 = vmatpush.bf16.msrb.mxu1 %v6853_v57  ;;  %4552 = vmatpush.bf16.msrb.mxu2 %v7045_v30  ;;  %v7109_v57 = vor.u32 %v7717_v56, %v7106_v59  ;;  %v7713_v30 = vld [vmem:[#allocation24 + $0x30c] sm:$0xf] }
 0x37d   :  { %4511 = vmatpush.bf16.msra.mxu3 %v7153_v15 }
 0x37e   :  { %4543 = vmatpush.bf16.msrb.mxu1 %v6837_v4  ;;  %4553 = vmatpush.bf16.msrb.mxu2 %v7029_v39 }
 0x380   :  { %4460 = vmatmul.bf16.vlgmr.msrb.gmra.mxu3 %v8605_v26  ;;  %7206 = vmatmul.msk.f32.vlgmr.msra.gmra.mxu0 %vm348_vm0, %v4607_v31 }
 0x381   :  { %4512 = vmatpush.bf16.msra.mxu3 %v7137_v11  ;;  %4544 = vmatmul.bf16.vlgmr.msrb.gmra.mxu1 %v8584_v5  ;;  %v3706_v11 = vperm.slane %v8640_v49, 0 }
 0x382   :  { %4664 = vmatpush.msra.mxu1 %v8601_v27  ;;  %4554 = vmatpush.bf16.msrb.mxu2 %v7013_v9  ;;  %v7088_v27 = vld [vmem:[#allocation24 + $0x308] sm:$0xf]  ;;  %v3707_v9 = vperm.slane %v8640_v49, 1 }
 0x383   :  { %v7089_v5 = vor.u32 %v7715_v20, %v7088_v27 }
 0x384   :  { %4665 = vmatpush.msra.mxu1 %v8613_v43  ;;  %v7173_v43 = vor.u32 %v7733_v1, %v7170_v13 }
 0x385   :  { %4513 = vmatpush.bf16.msra.mxu3 %v7121_v16 }
 0x386   :  { %4555 = vmatpush.bf16.msrb.mxu2 %v6997_v17 }
 0x389   :  { %4514 = vmatpush.bf16.msra.mxu3 %v7105_v7 }
 0x38a   :  { %4556 = vmatpush.bf16.msrb.mxu2 %v6981_v2 }
 0x38d   :  { %4515 = vmatpush.bf16.msra.mxu3 %v7089_v5 }
 0x38e   :  { %4557 = vmatpush.bf16.msrb.mxu2 %v6965_v25 }
 0x390   :  { %4516 = vmatmul.bf16.vlgmr.msra.gmra.mxu3 %v8605_v26 }
 0x391   :  { %4564 = vmatpush.bf16.msrb.mxu3 %v7205_v44  ;;  %4558 = vmatmul.bf16.vlgmr.msrb.gmra.mxu2 %v8588_v53  ;;  %v7090_v53 = vld [vmem:[#allocation24 + $0x318] sm:$0xf0] }
 0x392   :  { %v7093_v36 = vor.u32 %v7713_v30, %v7090_v53 }
 0x395   :  { %4565 = vmatpush.bf16.msrb.mxu3 %v7189_v34  ;;  %v3708_v34 = vperm.slane %v8640_v49, 2 }
 0x399   :  { %4566 = vmatpush.bf16.msrb.mxu3 %v7173_v43 }
 0x39d   :  { %4567 = vmatpush.bf16.msrb.mxu3 %v7157_v58 }
 0x3a1   :  { %4568 = vmatpush.bf16.msrb.mxu3 %v7141_v40 }
 0x3a5   :  { %4569 = vmatpush.bf16.msrb.mxu3 %v7125_v19 }
 0x3a9   :  { %4570 = vmatpush.bf16.msrb.mxu3 %v7109_v57 }
 0x3ad   :  { %4571 = vmatpush.bf16.msrb.mxu3 %v7093_v36  ;;  %v4363_v63 = vpop.f32.mrf.mxu0 }
 0x3ae   :  { %v4364_v38 = vadd.f32 %v4363_v63, %v3706_v11 }
 0x3b0   :  { %4572 = vmatmul.bf16.vlgmr.msrb.gmra.mxu3 %v8605_v26 }
 0x3b5   :  { %v4365_v0 = vpop.f32.mrf.mxu0 }
 0x3b6   :  { %v4366_v21 = vadd.f32 %v4365_v0, %v3706_v11 }
 0x3bd   :  { %v4419_v45 = vpop.f32.mrf.mxu0  ;;  %v4377_v23 = vpop.f32.mrf.mxu1 }
 0x3be   :  { %v4378_v16 = vadd.f32 %v4377_v23, %v4364_v38  ;;  %v4420_v17 = vadd.f32 %v4419_v45, %v3707_v9 }
 0x3c5   :  { %v4421_v41 = vpop.f32.mrf.mxu0  ;;  %v4379_v39 = vpop.f32.mrf.mxu1 }
 0x3c6   :  { %v4380_v6 = vadd.f32 %v4379_v39, %v4366_v21  ;;  %v4422_v28 = vadd.f32 %v4421_v41, %v3707_v9 }
 0x3cd   :  { %v4433_v8 = vpop.f32.mrf.mxu1 }
 0x3ce   :  { %v4434_v3 = vadd.f32 %v4433_v8, %v4420_v17 }
 0x3cf   :  { %v4475_v61 = vpop.f32.mrf.mxu0 }
 0x3d0   :  { %v4476_v14 = vadd.f32 %v4475_v61, %v3708_v34  ;;  %v3709_v61 = vperm.slane %v8640_v49, 3 }
 0x3d3   :  { %v4391_v15 = vpop.f32.mrf.mxu2 }
 0x3d4   :  { %v4392_v42 = vadd.f32 %v4391_v15, %v4378_v16 }
 0x3d5   :  { %v4435_v18 = vpop.f32.mrf.mxu1 }
 0x3d6   :  { %v4436_v44 = vadd.f32 %v4435_v18, %v4422_v28  ;;  %v4686_v18 = vld [vmem:[%s8748_s17 + $0x8] sm:$0xff]  ;;  %v4692_v28 = vld [vmem:[%s8748_s17 + $0x38] sm:$0xff] }
 0x3d7   :  { %v4477_v4 = vpop.f32.mrf.mxu0  ;;  %4732 = vmatpush.msra.mxu3 %v4686_v18 }
 0x3d8   :  { %v4478_v30 = vadd.f32 %v4477_v4, %v3708_v34  ;;  %v4677_v34 = vld [vmem:[%s8747_s16 + $0x8] sm:$0xff] }
 0x3db   :  { %v4393_v54 = vpop.f32.mrf.mxu2 }
 0x3dc   :  { %v4394_v32 = vadd.f32 %v4393_v54, %v4380_v6  ;;  %v4688_v6 = vld [vmem:[%s8748_s17 + $0x18] sm:$0xff] }
 0x3dd   :  { %v4489_v43 = vpop.f32.mrf.mxu1  ;;  %4772 = vmatpush.msrb.mxu1 %v4688_v6 }
 0x3de   :  { %v4490_v12 = vadd.f32 %v4489_v43, %v4476_v14  ;;  %v4680_v43 = vld [vmem:[%s8747_s16 + $0x20] sm:$0xff] }
 0x3e3   :  { %v4447_v31 = vpop.f32.mrf.mxu2 }
 0x3e4   :  { %v4448_v7 = vadd.f32 %v4447_v31, %v4434_v3 }
 0x3e5   :  { %v4491_v57 = vpop.f32.mrf.mxu1 }
 0x3e6   :  { %v4492_v63 = vadd.f32 %v4491_v57, %v4478_v30  ;;  %v5020_v30 = vld [vmem:[#allocation27] sm:$0xff] }
 0x3e7   :  { %v5029_v18 = vperm.slane %v5020_v30, 7 }
 0x3eb   :  { %v4449_v27 = vpop.f32.mrf.mxu2 }
 0x3ec   :  { %v4450_v1 = vadd.f32 %v4449_v27, %v4436_v44 }
 0x3ed   :  { %v4531_v29 = vpop.f32.mrf.mxu0 }
 0x3f3   :  { %v4405_v37 = vpop.f32.mrf.mxu3 }
 0x3f4   :  { %v4406_v2 = vadd.f32 %v4405_v37, %v4392_v42  ;;  %v4532_v37 = vadd.f32 %v4531_v29, %v3709_v61  ;;  %v4685_v29 = vld [vmem:[%s8748_s17] sm:$0xff] }
 0x3f5   :  { %v8642_v26 = vpop.f32.mrf.mxu0  ;;  %4712 = vmatpush.msra.mxu2 %v4685_v29 }
 0x3f6   :  { %v4578_v5 = vmul.f32 %v4406_v2, %v4406_v2  ;;  %v4503_v58 = vpop.f32.mrf.mxu2  ;;  %v4534_v4 = vadd.f32 %v8642_v26, %v3709_v61  ;;  %v5023_v61 = vperm.slane %v5020_v30, 1 }
 0x3f7   :  { %v4504_v19 = vadd.f32 %v4503_v58, %v4490_v12  ;;  %v4683_v58 = vld [vmem:[%s8747_s16 + $0x38] sm:$0xff] }
 0x3fb   :  { %v4407_v55 = vpop.f32.mrf.mxu3 }
 0x3fc   :  { %v4408_v13 = vadd.f32 %v4407_v55, %v4394_v32 }
 0x3fd   :  { %v4638_v50 = vpop.f32.mrf.mxu0 }
 0x3fe   :  { %v4641_v35 = vadd.f32 %v4638_v50, %v4615_v48  ;;  %v4582_v62 = vmul.f32 %v4408_v13, %v4408_v13  ;;  %v4505_v36 = vpop.f32.mrf.mxu2  ;;  %v4545_v39 = vpop.f32.mrf.mxu1  ;;  %v4679_v13 = vld [vmem:[%s8747_s16 + $0x18] sm:$0xff] }
 0x3ff   :  { %v4506_v45 = vadd.f32 %v4505_v36, %v4492_v63  ;;  %v4546_v8 = vadd.f32 %v4545_v39, %v4532_v37  ;;  %v5024_v36 = vperm.slane %v5020_v30, 2 }
 0x400   :  { %4643 = vst.msk [vmem:[#allocation2] sm:$0x3] %vm308_vm2, %v4641_v35 }
 0x403   :  { %v4461_v20 = vpop.f32.mrf.mxu3 }
 0x404   :  { %v4462_v24 = vadd.f32 %v4461_v20, %v4448_v7 }
 0x406   :  { %v4579_v25 = vmul.f32 %v4462_v24, %v4462_v24  ;;  %v4547_v55 = vpop.f32.mrf.mxu1  ;;  %v4687_v24 = vld [vmem:[%s8748_s17 + $0x10] sm:$0xff] }
 0x407   :  { %v4548_v50 = vadd.f32 %v4547_v55, %v4534_v4  ;;  %4752 = vmatpush.msrb.mxu0 %v4687_v24  ;;  %v4675_v14 = vld [vmem:[#allocation2] sm:$0x3] }
 0x408   :  { %v4586_v33 = vadd.f32 %v4579_v25, %v4578_v5  ;;  %v4644_v5 = vld [vmem:[#allocation3] sm:$0x3] }
 0x40b   :  { %v4463_v51 = vpop.f32.mrf.mxu3 }
 0x40c   :  { %v4464_v47 = vadd.f32 %v4463_v51, %v4450_v1  ;;  %v4678_v1 = vld [vmem:[%s8747_s16 + $0x10] sm:$0xff]  ;;  %v4681_v51 = vld [vmem:[%s8747_s16 + $0x28] sm:$0xff] }
 0x40e   :  { %v4583_v40 = vmul.f32 %v4464_v47, %v4464_v47  ;;  %v4682_v47 = vld [vmem:[%s8747_s16 + $0x30] sm:$0xff] }
 0x410   :  { %v4591_v10 = vadd.f32 %v4583_v40, %v4582_v62 }
 0x413   :  { %v4517_v56 = vpop.f32.mrf.mxu3 }
 0x414   :  { %v4518_v59 = vadd.f32 %v4517_v56, %v4504_v19  ;;  %v4559_v54 = vpop.f32.mrf.mxu2 }
 0x415   :  { %v4560_v11 = vadd.f32 %v4559_v54, %v4546_v8 }
 0x416   :  { %v4580_v53 = vmul.f32 %v4518_v59, %v4518_v59 }
 0x418   :  { %v4587_v0 = vadd.f32 %v4586_v33, %v4580_v53  ;;  %v4676_v33 = vld [vmem:[%s8747_s16] sm:$0xff] }
 0x41b   :  { %v4519_v41 = vpop.f32.mrf.mxu3 }
 0x41c   :  { %v4520_v52 = vadd.f32 %v4519_v41, %v4506_v45  ;;  %v4561_v38 = vpop.f32.mrf.mxu2  ;;  %v5025_v41 = vperm.slane %v5020_v30, 3 }
 0x41d   :  { %v4562_v17 = vadd.f32 %v4561_v38, %v4548_v50 }
 0x41e   :  { %v4584_v23 = vmul.f32 %v4520_v52, %v4520_v52 }
 0x420   :  { %v4592_v15 = vadd.f32 %v4591_v10, %v4584_v23  ;;  %v5054_v23 = vld [vmem:[#allocation28] sm:$0xff] }
 0x421   :  { %v5057_v38 = vperm.slane %v5054_v23, 1 }
 0x433   :  { %v4573_v31 = vpop.f32.mrf.mxu3 }
 0x434   :  { %v4574_v9 = vadd.f32 %v4573_v31, %v4560_v11  ;;  %v5058_v11 = vperm.slane %v5054_v23, 2 }
 0x436   :  { %v4581_v48 = vmul.f32 %v4574_v9, %v4574_v9  ;;  %v5056_v9 = vperm.slane %v5054_v23, 0 }
 0x438   :  { %v4588_v16 = vadd.f32 %v4587_v0, %v4581_v48 }
 0x43a   :  { %4589 = vadd.xlane.f32.xlu0 %v4588_v16 }
 0x43b   :  { %v4575_v35 = vpop.f32.mrf.mxu3 }
 0x43c   :  { %v4576_v3 = vadd.f32 %v4575_v35, %v4562_v17  ;;  %v5028_v17 = vperm.slane %v5020_v30, 6 }
 0x43e   :  { %v4585_v42 = vmul.f32 %v4576_v3, %v4576_v3  ;;  %v5059_v3 = vperm.slane %v5054_v23, 3 }
 0x440   :  { %v4593_v49 = vadd.f32 %v4592_v15, %v4585_v42  ;;  %v5022_v15 = vperm.slane %v5020_v30, 0 }
 0x442   :  { %4594 = vadd.xlane.f32.xlu0 %v4593_v49 }
 0x4ad   :  { %v4590_v26 = vpop.xlane.xlu0 %4589 }
 0x4ae   :  { %v4610_v2 = vperm.slane %v4590_v26, %v8603_v22  ;;  %v4689_v22 = vld [vmem:[%s8748_s17 + $0x20] sm:$0xff]  ;;  %v5026_v26 = vperm.slane %v5020_v30, 4 }
 0x4af   :  { %4792 = vmatpush.msrb.mxu2 %v4689_v22 }
 0x4b5   :  { %v4595_v7 = vpop.xlane.xlu0 %4594 }
 0x4b6   :  { %v4611_v27 = vperm.slane %v4595_v7, %v8616_v46  ;;  %v4690_v46 = vld [vmem:[%s8748_s17 + $0x28] sm:$0xff]  ;;  %v5027_v7 = vperm.slane %v5020_v30, 5 }
 0x4b7   :  { %4812 = vmatpush.msrb.mxu3 %v4690_v46 }
 0x4b8   :  { %v4612_v20 = vsel %vm4604_vm1, %v4611_v27, %v4610_v2 }
 0x4b9   :  { %v4614_v21 = vmul.f32 %v4612_v20, %v8626_v60  ;;  %v4691_v60 = vld [vmem:[%s8748_s17 + $0x30] sm:$0xff] }
 0x4ba   :  { %4832 = vmatpush.msra.mxu0 %v4691_v60 }
 0x4bb   :  { %7207 = vmatmul.msk.f32.vlgmr.msra.gmra.mxu1 %vm348_vm0, %v4614_v21 }
 0x4bc   :  { %4852 = vmatpush.msra.mxu1 %v4692_v28 }
 0x538   :  { %v4667_v25 = vpop.f32.mrf.mxu1 }
 0x539   :  { %v4670_v44 = vadd.f32 %v4667_v25, %v4644_v5 }
 0x53b   :  { %4671 = vst.msk [vmem:[#allocation3] sm:$0x3] %vm308_vm2, %v4670_v44 }
 0x542   :  { %v4684_v32 = vld [vmem:[#allocation3] sm:$0x3] }
 0x543   :  { %7208 = vmatmul.msk.f32.vlgmr.msra.gmra.mxu2 %vm4693_vm3, %v4684_v32  ;;  %7209 = vmatmul.msk.f32.vlgmr.msra.gmra.mxu3 %vm4693_vm3, %v4684_v32 }
 0x544   :  { %7210 = vmatmul.msk.f32.vlgmr.msrb.gmra.mxu0 %vm4693_vm3, %v4684_v32  ;;  %7211 = vmatmul.msk.f32.vlgmr.msrb.gmra.mxu1 %vm4693_vm3, %v4684_v32 }
 0x545   :  { %4875 = vmatpush.msra.mxu2 %v4676_v33  ;;  %4895 = vmatpush.msra.mxu3 %v4677_v34  ;;  %v5061_v33 = vperm.slane %v5054_v23, 5 }
 0x546   :  { %4915 = vmatpush.msrb.mxu0 %v4678_v1  ;;  %4935 = vmatpush.msrb.mxu1 %v4679_v13 }
 0x54b   :  { %7212 = vmatmul.msk.f32.vlgmr.msrb.gmra.mxu2 %vm4693_vm3, %v4684_v32  ;;  %7213 = vmatmul.msk.f32.vlgmr.msrb.gmra.mxu3 %vm4693_vm3, %v4684_v32 }
 0x54c   :  { %7214 = vmatmul.msk.f32.vlgmr.msra.gmra.mxu0 %vm4693_vm3, %v4684_v32  ;;  %7215 = vmatmul.msk.f32.vlgmr.msra.gmra.mxu1 %vm4693_vm3, %v4684_v32  ;;  %v5060_v32 = vperm.slane %v5054_v23, 4 }
 0x54d   :  { %4955 = vmatpush.msrb.mxu2 %v4680_v43  ;;  %4975 = vmatpush.msrb.mxu3 %v4681_v51 }
 0x54e   :  { %4995 = vmatpush.msra.mxu0 %v4682_v47  ;;  %5015 = vmatpush.msra.mxu1 %v4683_v58 }
 0x553   :  { %7216 = vmatmul.msk.f32.vlgmr.msra.gmra.mxu2 %vm4693_vm3, %v4675_v14  ;;  %7217 = vmatmul.msk.f32.vlgmr.msra.gmra.mxu3 %vm4693_vm3, %v4675_v14 }
 0x554   :  { %7218 = vmatmul.msk.f32.vlgmr.msrb.gmra.mxu0 %vm4693_vm3, %v4675_v14  ;;  %7219 = vmatmul.msk.f32.vlgmr.msrb.gmra.mxu1 %vm4693_vm3, %v4675_v14 }
 0x55b   :  { %7220 = vmatmul.msk.f32.vlgmr.msrb.gmra.mxu2 %vm4693_vm3, %v4675_v14  ;;  %7221 = vmatmul.msk.f32.vlgmr.msrb.gmra.mxu3 %vm4693_vm3, %v4675_v14 }
 0x55c   :  { %7222 = vmatmul.msk.f32.vlgmr.msra.gmra.mxu0 %vm4693_vm3, %v4675_v14  ;;  %7223 = vmatmul.msk.f32.vlgmr.msra.gmra.mxu1 %vm4693_vm3, %v4675_v14 }
 0x5c1   :  { %v4754_v62 = vpop.f32.mrf.mxu0  ;;  %v4774_v40 = vpop.f32.mrf.mxu1 }
 0x5c6   :  { %v4714_v12 = vpop.f32.mrf.mxu2  ;;  %v4734_v10 = vpop.f32.mrf.mxu3 }
 0x5c9   :  { %v4834_v19 = vpop.f32.mrf.mxu0  ;;  %v4854_v56 = vpop.f32.mrf.mxu1 }
 0x5ce   :  { %v4794_v59 = vpop.f32.mrf.mxu2  ;;  %v4814_v57 = vpop.f32.mrf.mxu3 }
 0x5d1   :  { %v4917_v53 = vpop.f32.mrf.mxu0  ;;  %v4937_v63 = vpop.f32.mrf.mxu1 }
 0x5d2   :  { %v4918_v0 = vadd.f32 %v4917_v53, %v4754_v62  ;;  %v4938_v45 = vadd.f32 %v4937_v63, %v4774_v40  ;;  %v5062_v62 = vperm.slane %v5054_v23, 6  ;;  %v5063_v40 = vperm.slane %v5054_v23, 7 }
 0x5d4   :  { %v5040_v52 = vadd.f32 %v5024_v36, %v4918_v0  ;;  %v5041_v31 = vadd.f32 %v5025_v41, %v4938_v45 }
 0x5d6   :  { %v4877_v39 = vpop.f32.mrf.mxu2  ;;  %v4897_v54 = vpop.f32.mrf.mxu3  ;;  %v5048_v55 = vmax.f32 %v5040_v52, 0.0  ;;  %v5049_v29 = vmax.f32 %v5041_v31, 0.0 }
 0x5d7   :  { %v4878_v37 = vadd.f32 %v4877_v39, %v4714_v12  ;;  %v4898_v8 = vadd.f32 %v4897_v54, %v4734_v10 }
 0x5d8   :  { %v5074_v2 = vmul.f32 %v5058_v11, %v5048_v55  ;;  %v5075_v25 = vmul.f32 %v5059_v3, %v5049_v29 }
 0x5d9   :  { %v5038_v4 = vadd.f32 %v5022_v15, %v4878_v37  ;;  %v5039_v48 = vadd.f32 %v5023_v61, %v4898_v8  ;;  %v4997_v50 = vpop.f32.mrf.mxu0  ;;  %v5017_v35 = vpop.f32.mrf.mxu1  ;;  %v7765_v15 = vld [vmem:[#allocation4] ss:$0 sm:$0xff] }
 0x5da   :  { %v4998_v16 = vadd.f32 %v4997_v50, %v4834_v19  ;;  %v5018_v21 = vadd.f32 %v5017_v35, %v4854_v56  ;;  %v5084_v34 = vsel %vm5080_vm4, %v5074_v2, 0.0  ;;  %v5086_v12 = vsel %vm5080_vm4, %v5075_v25, 0.0 }
 0x5db   :  { %v5046_v42 = vmax.f32 %v5038_v4, 0.0  ;;  %v5047_v49 = vmax.f32 %v5039_v48, 0.0 }
 0x5dc   :  { %v5044_v24 = vadd.f32 %v5028_v17, %v4998_v16  ;;  %v5045_v1 = vadd.f32 %v5029_v18, %v5018_v21 }
 0x5dd   :  { %v5072_v27 = vmul.f32 %v5056_v9, %v5046_v42  ;;  %v5073_v20 = vmul.f32 %v5057_v38, %v5047_v49 }
 0x5de   :  { %v4957_v6 = vpop.f32.mrf.mxu2  ;;  %v4977_v22 = vpop.f32.mrf.mxu3  ;;  %v5052_v47 = vmax.f32 %v5044_v24, 0.0  ;;  %v5053_v10 = vmax.f32 %v5045_v1, 0.0 }
 0x5df   :  { %v5081_v46 = vsel %vm5080_vm4, %v5072_v27, 0.0  ;;  %v5082_v60 = vsel %vm5080_vm4, %v5073_v20, 0.0  ;;  %v4958_v28 = vadd.f32 %v4957_v6, %v4794_v59  ;;  %v4978_v5 = vadd.f32 %v4977_v22, %v4814_v57 }
 0x5e0   :  { %v5083_v44 = vadd.f32 %v5082_v60, %v5081_v46  ;;  %v5078_v57 = vmul.f32 %v5062_v62, %v5052_v47  ;;  %v5079_v36 = vmul.f32 %v5063_v40, %v5053_v10 }
 0x5e1   :  { %v5042_v13 = vadd.f32 %v5026_v26, %v4958_v28  ;;  %v5043_v43 = vadd.f32 %v5027_v7, %v4978_v5 }
 0x5e2   :  { %v5085_v51 = vadd.f32 %v5084_v34, %v5083_v44  ;;  %v5092_v45 = vsel %vm5080_vm4, %v5078_v57, 0.0  ;;  %v5094_v52 = vsel %vm5080_vm4, %v5079_v36, 0.0 }
 0x5e3   :  { %v5050_v58 = vmax.f32 %v5042_v13, 0.0  ;;  %v5051_v14 = vmax.f32 %v5043_v43, 0.0 }
 0x5e4   :  { %v5087_v59 = vadd.f32 %v5086_v12, %v5085_v51 }
 0x5e5   :  { %v5076_v19 = vmul.f32 %v5060_v32, %v5050_v58  ;;  %v5077_v56 = vmul.f32 %v5061_v33, %v5051_v14 }
 0x5e7   :  { %v5088_v30 = vsel %vm5080_vm4, %v5076_v19, 0.0  ;;  %v5090_v63 = vsel %vm5080_vm4, %v5077_v56, 0.0 }
 0x5e8   :  { %v5089_v53 = vadd.f32 %v5088_v30, %v5087_v59 }
 0x5ea   :  { %v5091_v0 = vadd.f32 %v5090_v63, %v5089_v53 }
 0x5ec   :  { %v5093_v41 = vadd.f32 %v5092_v45, %v5091_v0 }
 0x5ee   :  { %v5095_v23 = vadd.f32 %v5094_v52, %v5093_v41 }
 0x5f0   :  { %5096 = vadd.xlane.f32.xlu2 %v5095_v23 }
 0x663   :  { %v5097_v61 = vpop.xlane.xlu2 %5096 }
 0x664   :  { %v5102_v39 = vadd.f32 %v7765_v15, %v5097_v61 }
 0x666   :  { %5104 = vst.msk [vmem:[%s8752_s21] sm:$0x3] %vm5103_vm5, %v5102_v39 }
 0x667   :  { %5109 = vsyncpa [#allocation6], 1 }
 0x668   :  { %5110 = vsyncpa [#allocation8], 1 }
 0x669   :  { %5111 = vsyncpa [#allocation11], 1 }
 0x66a   :  { %5112 = vsyncpa [#allocation14], 1 }
 0x66b   :  { %5113 = vsyncpa [#allocation17], 1 }
 0x66c   :  { %5114 = vsyncpa [#allocation20], 1 }
 0x66d   :  { %5115 = vsyncpa [#allocation23], 1 }
 0x66e   :  { %5116 = vsyncpa [#allocation26], 1 }
 0x66f   :  { %5117 = vsyncpa [#allocation29], 1 }

</bundles_post_ra>
